<compile_context>
chip_gen: v6e
topology: v6e:2x2x1
jax: 0.10.0
libtpu: 0.0.40
codegen_flags: <defaults>
</compile_context>

<pallas_src>
import jax
import jax.numpy as jnp
from jax.experimental import pallas as pl
from jax.experimental.pallas import tpu as pltpu

# ------------------------- configuration (small, consistent with forward) ---
SEQ_LEN = 16
PRED_LEN = 8
ENC_IN = 4
D_MODEL = 32
N_HEADS = 4
HEAD_DIM = D_MODEL // N_HEADS
D_FF = 64
MOVING_AVG = 5

STRIDE = 8                                  # conv_stride == conv_kernel
PATCH_NUM = 4
PATCH_STRIDE = STRIDE // PATCH_NUM          # 2
PATCH_KERNEL = PATCH_STRIDE                 # 2
PATCH_PADDING = 0
CONV_PADDING = 0

ACTUAL_LEN = SEQ_LEN + PRED_LEN                                        # 24
SEQ_CONV_LEN = (SEQ_LEN + 2 * CONV_PADDING - STRIDE) // STRIDE + 1     # 2
PRED_CONV_LEN = (PRED_LEN + 2 * CONV_PADDING - STRIDE) // STRIDE + 1   # 1
PATCH_CONV_LEN = (STRIDE + 2 * PATCH_PADDING - PATCH_KERNEL) // PATCH_STRIDE + 1   # 4
CONV_LEN = (ACTUAL_LEN + 2 * PATCH_PADDING - PATCH_KERNEL) // PATCH_STRIDE + 1     # 12
EPS = 1e-5

NUM_BRANCHES = 2                                         # seasonal, trend
NSEG = (SEQ_CONV_LEN - 1) + PRED_CONV_LEN                # segments per branch (2)
PATCH_DIM = PATCH_KERNEL * ENC_IN                        # 8
OUT_W = STRIDE * ENC_IN                                  # 32 (dense per-instance writeback)

# packed bias / LayerNorm vector slab layout (per branch): rows of width VEC_W
VEC_W = D_FF                                             # 64
VEC_ROWS = 16
# row indices in the slab:
#  0 b_q | 1 b_k | 2 b_v | 3 b_o | 4 ln1_g | 5 ln1_b | 6 b_1(64) | 7 b_2
#  8 ln2_g | 9 ln2_b | 10 lnf_g | 11 lnf_b | 12 fused transConv bias (32)

# With PRED_CONV_LEN == 1 the single autoregressive segment only reads the
# normalized encoder, so all (branch, segment) instances are independent and
# can be fused into one kernel launch.
assert PRED_CONV_LEN == 1
# TODO(synk): general PRED_CONV_LEN > 1 autoregressive chaining (sequential
# dependency between prediction segments) is not emitted in the fused kernel.


# ------------------------------- Pallas kernel ------------------------------
def _ln(x, g, b):
    mu = jnp.mean(x, axis=-1, keepdims=True)
    var = jnp.mean((x - mu) ** 2, axis=-1, keepdims=True)
    return (x - mu) * jax.lax.rsqrt(var + EPS) * g + b


def hmf_fused_kernel(xp_ref, posbe_ref, we_ref, wqkv_ref, wo_ref,
                     w1_ref, w2_ref, wfin_ref, vec_ref, out_ref):
    """Single invocation covers BOTH branches (seasonal, trend).

    xp:    (G, NINST, L, PATCH_DIM)   patchified segments (NINST = NSEG*B)
    posbe: (G, NINST, L, D)           positional rows with b_e folded in
    out:   (G, NINST, STRIDE*C)       dense per-instance output slab
    """
    L = PATCH_CONV_LEN
    ninst = xp_ref.shape[1]

    # Static unroll over the two independent branches: one kernel launch,
    # per-branch weights, interleavable instruction streams.
    for g in range(NUM_BRANCHES):
        xp = xp_ref[g]                     # (ninst, L, P)
        posbe = posbe_ref[g]               # (ninst, L, D)
        vec = vec_ref[g]                   # (VEC_ROWS, VEC_W)

        def vrow(r, w=D_MODEL, _vec=vec):
            return _vec[r:r + 1, :w]       # (1, w) row, broadcasts over (ninst, L, w)

        # ---- patch value embedding (Conv1d, kernel == stride -> matmul) + pos (+b_e)
        emb = jnp.einsum('blp,pd->bld', xp, we_ref[g],
                         preferred_element_type=jnp.float32) + posbe

        # ---- fused QKV projection: single (.,32)x(32,96) contraction
        qkv = jnp.einsum('bld,de->ble', emb, wqkv_ref[g],
                         preferred_element_type=jnp.float32)
        q = qkv[:, :, 0 * D_MODEL:1 * D_MODEL] + vrow(0)
        k = qkv[:, :, 1 * D_MODEL:2 * D_MODEL] + vrow(1)
        v = qkv[:, :, 2 * D_MODEL:3 * D_MODEL] + vrow(2)

        # ---- multi-head self-attention: fold (head, instance) into one batch axis
        def split_heads(x):                # (ninst, L, D) -> (H*ninst, L, HEAD_DIM)
            return jnp.concatenate(
                [x[:, :, h * HEAD_DIM:(h + 1) * HEAD_DIM] for h in range(N_HEADS)],
                axis=0)

        qh, kh, vh = split_heads(q), split_heads(k), split_heads(v)
        scale = 1.0 / (HEAD_DIM ** 0.5)
        s = jnp.einsum('nld,nsd->nls', qh, kh,
                       preferred_element_type=jnp.float32) * scale
        p = jax.nn.softmax(s, axis=-1)                       # no mask (mask_flag=False)
        oh = jnp.einsum('nls,nsd->nld', p, vh,
                        preferred_element_type=jnp.float32)  # (H*ninst, L, HEAD_DIM)
        # fold heads back along channels, then ONE full-W_o matmul
        o = jnp.concatenate([oh[h * ninst:(h + 1) * ninst] for h in range(N_HEADS)],
                            axis=-1)                         # (ninst, L, D)
        attn = jnp.einsum('bld,de->ble', o, wo_ref[g],
                          preferred_element_type=jnp.float32) + vrow(3)

        # ---- DecoderonlyLayer: residual + norm, FFN (relu), residual + norm
        x = _ln(emb + attn, vrow(4), vrow(5))
        y = jnp.einsum('bld,df->blf', x, w1_ref[g],
                       preferred_element_type=jnp.float32) + vrow(6, D_FF)
        y = jnp.maximum(y, 0.0)                              # activation = 'relu'
        y = jnp.einsum('blf,fd->bld', y, w2_ref[g],
                       preferred_element_type=jnp.float32) + vrow(7)
        x = _ln(x + y, vrow(8), vrow(9))

        # ---- Decoder final norm
        x = _ln(x, vrow(10), vrow(11))

        # ---- fused [Linear(d_model -> enc_in)  o  transConv(L patches -> STRIDE steps)]
        # fold the patch axis into the contraction: (ninst, L*D) x (L*D, STRIDE*C)
        xf = jnp.concatenate([x[:, l, :] for l in range(L)], axis=-1)   # (ninst, L*D)
        out = jnp.einsum('bf,fo->bo', xf, wfin_ref[g],
                         preferred_element_type=jnp.float32) + vrow(12, OUT_W)
        out_ref[g] = out                                     # one dense slab store


def hmf_fused_call(xp, posbe, we, wqkv, wo, w1, w2, wfin, vec, *, ninst):
    vspec = pl.BlockSpec(memory_space=pltpu.MemorySpace.VMEM)   # whole array in VMEM
    return pl.pallas_call(
        hmf_fused_kernel,
        out_shape=jax.ShapeDtypeStruct((NUM_BRANCHES, ninst, OUT_W), jnp.float32),
        in_specs=[vspec] * 9,
        out_specs=vspec,
    )(xp, posbe, we, wqkv, wo, w1, w2, wfin, vec)


# ------------------------------- plain-JAX glue ------------------------------
def series_decomp(x, kernel):
    """Autoformer series_decomp: returns (seasonal residual, trend moving-mean)."""
    pad = (kernel - 1) // 2
    front = jnp.repeat(x[:, :1, :], pad, axis=1)
    end = jnp.repeat(x[:, -1:, :], pad, axis=1)
    xp = jnp.concatenate([front, x, end], axis=1)
    T = x.shape[1]
    windows = jnp.stack([xp[:, i:i + T, :] for i in range(kernel)], axis=0)
    moving_mean = jnp.mean(windows, axis=0)
    return x - moving_mean, moving_mean


def build_branch_inputs(params, init_enc, init_dec):
    """Normalize and patchify both segments of one branch."""
    B = init_enc.shape[0]
    means = jnp.mean(init_enc, axis=1, keepdims=True)
    enc = init_enc - means
    stdev = jnp.sqrt(jnp.var(enc, axis=1, keepdims=True) + EPS)   # unbiased=False
    enc = enc / stdev
    dec = (init_dec - means) / stdev
    inp = jnp.concatenate([enc, dec[:, -PRED_LEN:, :]], axis=1)   # (B, ACTUAL_LEN, C)

    # teacher segments over the encoder part + single AR segment (reads enc only)
    segs = [inp[:, i * STRIDE:(i + 1) * STRIDE, :] for i in range(SEQ_CONV_LEN - 1)]
    segs.append(enc[:, (SEQ_CONV_LEN - 1) * STRIDE:SEQ_CONV_LEN * STRIDE, :])
    segs = jnp.stack(segs, axis=0)                                # (NSEG, B, STRIDE, C)

    # patchify (kernel == stride, non-overlapping -> reshape is exact)
    xp = segs.reshape(NSEG, B, PATCH_CONV_LEN, PATCH_DIM)
    xp = xp.reshape(NSEG * B, PATCH_CONV_LEN, PATCH_DIM)

    # positional rows for the patches actually used, b_e folded in
    pos = params['pos_emb'][:NSEG * PATCH_CONV_LEN].reshape(NSEG, 1, PATCH_CONV_LEN, D_MODEL)
    posbe = jnp.broadcast_to(pos, (NSEG, B, PATCH_CONV_LEN, D_MODEL)) + params['b_e']
    posbe = posbe.reshape(NSEG * B, PATCH_CONV_LEN, D_MODEL)
    return xp, posbe, enc, means, stdev


def fuse_branch_params(p):
    """Derive the fused kernel weights (QKV fusion, proj∘transConv fusion, vec slab)."""
    wqkv = jnp.concatenate([p['W_q'], p['W_k'], p['W_v']], axis=1)          # (D, 3D)
    # out[b, s*C+c] = sum_{l,d} x[b,l,d] * W_t[l,s] * W_p[d,c]  (+ folded bias)
    wfin = jnp.einsum('ls,dc->ldsc', p['W_t'], p['W_p'])
    wfin = wfin.reshape(PATCH_CONV_LEN * D_MODEL, OUT_W)
    bfin = (p['W_t'].sum(axis=0)[:, None] * p['b_p'].reshape(1, ENC_IN) + p['b_t'])
    bfin = bfin.reshape(1, OUT_W)

    def pad_row(v):
        v = v.reshape(-1)
        return jnp.pad(v, (0, VEC_W - v.shape[0]))

    rows = [p['b_q'], p['b_k'], p['b_v'], p['b_o'],
            p['ln1_g'], p['ln1_b'], p['b_1'], p['b_2'],
            p['ln2_g'], p['ln2_b'], p['lnf_g'], p['lnf_b'], bfin]
    vec = jnp.stack([pad_row(r) for r in rows]
                    + [jnp.zeros((VEC_W,), jnp.float32)] * (VEC_ROWS - len(rows)))
    return dict(W_e=p['W_e'], W_qkv=wqkv, W_o=p['W_o'], W_1=p['W_1'],
                W_2=p['W_2'], W_fin=wfin, vec=vec)


def forecast(params_s, params_t, x_enc, x_dec):
    s_enc, t_enc = series_decomp(x_enc, MOVING_AVG)
    s_dec, t_dec = series_decomp(x_dec, MOVING_AVG)

    xp_s, posbe_s, enc_s, mean_s, std_s = build_branch_inputs(params_s, s_enc, s_dec)
    xp_t, posbe_t, enc_t, mean_t, std_t = build_branch_inputs(params_t, t_enc, t_dec)

    fs = fuse_branch_params(params_s)
    ft = fuse_branch_params(params_t)
    stack = lambda k: jnp.stack([fs[k], ft[k]], axis=0)

    B = x_enc.shape[0]
    ninst = NSEG * B

    out = hmf_fused_call(
        jnp.stack([xp_s, xp_t], axis=0), jnp.stack([posbe_s, posbe_t], axis=0),
        stack('W_e'), stack('W_qkv'), stack('W_o'), stack('W_1'), stack('W_2'),
        stack('W_fin'), stack('vec'), ninst=ninst)
    # (2, ninst, STRIDE*C) -> (2, NSEG, B, STRIDE, C)
    out = out.reshape(NUM_BRANCHES, NSEG, B, STRIDE, ENC_IN)

    def assemble(seg_out, enc, means, stdev):
        pieces = [enc[:, :STRIDE, :]] + [seg_out[i] for i in range(NSEG)]
        y = jnp.concatenate(pieces, axis=1)              # (B, ACTUAL_LEN, C)
        return y * stdev + means

    s_out = assemble(out[0], enc_s, mean_s, std_s)
    t_out = assemble(out[1], enc_t, mean_t, std_t)
    return s_out + t_out


def model_forward(params_s, params_t, x_enc, x_mark_enc, x_dec, x_mark_dec):
    # x_mark_* are unused by the value-only patch embedding (matches the forward loop).
    # TODO(synk): training-mode teacher-forcing branch (train_autoregression=False) not emitted.
    dec_out = forecast(params_s, params_t, x_enc, x_dec)
    return dec_out[:, -(ACTUAL_LEN - STRIDE):, :]


# ------------------------------- parameters ----------------------------------
def init_branch_params(key):
    ks = jax.random.split(key, 10)

    def w(k, shape, scale=0.1):
        return jax.random.normal(k, shape, jnp.float32) * scale

    p = {
        'W_e': w(ks[0], (PATCH_DIM, D_MODEL)),
        'b_e': jnp.zeros((1, D_MODEL), jnp.float32),
        'pos_emb': w(ks[1], (CONV_LEN, D_MODEL), 0.02),
        'W_q': w(ks[2], (D_MODEL, D_MODEL)), 'b_q': jnp.zeros((1, D_MODEL), jnp.float32),
        'W_k': w(ks[3], (D_MODEL, D_MODEL)), 'b_k': jnp.zeros((1, D_MODEL), jnp.float32),
        'W_v': w(ks[4], (D_MODEL, D_MODEL)), 'b_v': jnp.zeros((1, D_MODEL), jnp.float32),
        'W_o': w(ks[5], (D_MODEL, D_MODEL)), 'b_o': jnp.zeros((1, D_MODEL), jnp.float32),
        'ln1_g': jnp.ones((1, D_MODEL), jnp.float32), 'ln1_b': jnp.zeros((1, D_MODEL), jnp.float32),
        'W_1': w(ks[6], (D_MODEL, D_FF)), 'b_1': jnp.zeros((1, D_FF), jnp.float32),
        'W_2': w(ks[7], (D_FF, D_MODEL)), 'b_2': jnp.zeros((1, D_MODEL), jnp.float32),
        'ln2_g': jnp.ones((1, D_MODEL), jnp.float32), 'ln2_b': jnp.zeros((1, D_MODEL), jnp.float32),
        'lnf_g': jnp.ones((1, D_MODEL), jnp.float32), 'lnf_b': jnp.zeros((1, D_MODEL), jnp.float32),
        'W_p': w(ks[8], (D_MODEL, ENC_IN)), 'b_p': jnp.zeros((1, ENC_IN), jnp.float32),
        'W_t': w(ks[9], (PATCH_CONV_LEN, STRIDE)), 'b_t': jnp.zeros((STRIDE, ENC_IN), jnp.float32),
    }
    return p


# ----------------------------------- main -------------------------------------
if __name__ == "__main__":
    key = jax.random.PRNGKey(0)
    k_ps, k_pt, k_xe, k_xd = jax.random.split(key, 4)

    params_s = init_branch_params(k_ps)   # seasonal branch
    params_t = init_branch_params(k_pt)   # trend branch

    B = 2
    x_enc = jax.random.normal(k_xe, (B, SEQ_LEN, ENC_IN), jnp.float32)
    x_dec = jax.random.normal(k_xd, (B, SEQ_LEN, ENC_IN), jnp.float32)  # only last PRED_LEN used
    x_mark_enc = jnp.zeros((B, SEQ_LEN, 4), jnp.float32)
    x_mark_dec = jnp.zeros((B, SEQ_LEN, 4), jnp.float32)

    fwd = jax.jit(model_forward)
    out = fwd(params_s, params_t, x_enc, x_mark_enc, x_dec, x_mark_dec)
    out = jax.block_until_ready(out)

    assert out.shape == (B, ACTUAL_LEN - STRIDE, ENC_IN), out.shape
    assert jnp.all(jnp.isfinite(out))
    print("KERNEL_OK")
</pallas_src>

<mosaic_0001>
module attributes {stable_mosaic.version = 11 : i64} {
  func.func @hmf_fused_kernel(%arg0: memref<2x4x4x8xf32, #tpu.memory_space<vmem>>, %arg1: memref<2x4x4x32xf32, #tpu.memory_space<vmem>>, %arg2: memref<2x8x32xf32, #tpu.memory_space<vmem>>, %arg3: memref<2x32x96xf32, #tpu.memory_space<vmem>>, %arg4: memref<2x32x32xf32, #tpu.memory_space<vmem>>, %arg5: memref<2x32x64xf32, #tpu.memory_space<vmem>>, %arg6: memref<2x64x32xf32, #tpu.memory_space<vmem>>, %arg7: memref<2x128x32xf32, #tpu.memory_space<vmem>>, %arg8: memref<2x16x64xf32, #tpu.memory_space<vmem>>, %arg9: memref<2x4x32xf32, #tpu.memory_space<vmem>>) attributes {dimension_semantics = [], scalar_prefetch = 0 : i64, scratch_operands = 0 : i64, tpu.core_type = #tpu.core_type<tc>} {
    %c0 = arith.constant 0 : index
    %c0_0 = arith.constant 0 : index
    %c0_1 = arith.constant 0 : index
    %c0_2 = arith.constant 0 : index
    %0 = vector.load %arg0[%c0, %c0_0, %c0_1, %c0_2] : memref<2x4x4x8xf32, #tpu.memory_space<vmem>>, vector<1x4x4x8xf32>
    %1 = vector.shape_cast %0 : vector<1x4x4x8xf32> to vector<4x4x8xf32>
    %c0_3 = arith.constant 0 : index
    %c0_4 = arith.constant 0 : index
    %c0_5 = arith.constant 0 : index
    %c0_6 = arith.constant 0 : index
    %2 = vector.load %arg1[%c0_3, %c0_4, %c0_5, %c0_6] : memref<2x4x4x32xf32, #tpu.memory_space<vmem>>, vector<1x4x4x32xf32>
    %3 = vector.shape_cast %2 : vector<1x4x4x32xf32> to vector<4x4x32xf32>
    %c0_7 = arith.constant 0 : index
    %c0_8 = arith.constant 0 : index
    %c0_9 = arith.constant 0 : index
    %4 = vector.load %arg8[%c0_7, %c0_8, %c0_9] : memref<2x16x64xf32, #tpu.memory_space<vmem>>, vector<1x16x64xf32>
    %5 = vector.shape_cast %4 : vector<1x16x64xf32> to vector<16x64xf32>
    %c0_10 = arith.constant 0 : index
    %c0_11 = arith.constant 0 : index
    %c0_12 = arith.constant 0 : index
    %6 = vector.load %arg2[%c0_10, %c0_11, %c0_12] : memref<2x8x32xf32, #tpu.memory_space<vmem>>, vector<1x8x32xf32>
    %7 = vector.shape_cast %6 : vector<1x8x32xf32> to vector<8x32xf32>
    "tpu.trace_start"() <{level = 10 : i32, message = "blp,pd->bld"}> : () -> ()
    %cst = arith.constant dense<0.000000e+00> : vector<4x4x32xf32>
    %8 = tpu.matmul %1, %7, %cst {dimension_numbers = #tpu.dot_dimension_numbers<[2], [0], [0, 1], [1], [0, 0, 0, 1, 1, 1], [], []>} : vector<4x4x8xf32>, vector<8x32xf32>, vector<4x4x32xf32> -> vector<4x4x32xf32>
    "tpu.trace_stop"() : () -> ()
    %9 = arith.addf %8, %3 : vector<4x4x32xf32>
    %c0_13 = arith.constant 0 : index
    %c0_14 = arith.constant 0 : index
    %c0_15 = arith.constant 0 : index
    %10 = vector.load %arg3[%c0_13, %c0_14, %c0_15] : memref<2x32x96xf32, #tpu.memory_space<vmem>>, vector<1x32x96xf32>
    %11 = vector.shape_cast %10 : vector<1x32x96xf32> to vector<32x96xf32>
    "tpu.trace_start"() <{level = 10 : i32, message = "bld,de->ble"}> : () -> ()
    %cst_16 = arith.constant dense<0.000000e+00> : vector<4x4x96xf32>
    %12 = tpu.matmul %9, %11, %cst_16 {dimension_numbers = #tpu.dot_dimension_numbers<[2], [0], [0, 1], [1], [0, 0, 0, 1, 1, 1], [], []>} : vector<4x4x32xf32>, vector<32x96xf32>, vector<4x4x96xf32> -> vector<4x4x96xf32>
    "tpu.trace_stop"() : () -> ()
    %13 = vector.extract_strided_slice %12 {offsets = [0, 0, 0], sizes = [4, 4, 32], strides = [1, 1, 1]} : vector<4x4x96xf32> to vector<4x4x32xf32>
    %14 = vector.extract_strided_slice %5 {offsets = [0, 0], sizes = [1, 32], strides = [1, 1]} : vector<16x64xf32> to vector<1x32xf32>
    %15 = vector.shape_cast %14 : vector<1x32xf32> to vector<1x1x32xf32>
    %16 = vector.broadcast %15 : vector<1x1x32xf32> to vector<4x4x32xf32>
    %17 = arith.addf %13, %16 : vector<4x4x32xf32>
    %18 = vector.extract_strided_slice %12 {offsets = [0, 0, 32], sizes = [4, 4, 32], strides = [1, 1, 1]} : vector<4x4x96xf32> to vector<4x4x32xf32>
    %19 = vector.extract_strided_slice %5 {offsets = [1, 0], sizes = [1, 32], strides = [1, 1]} : vector<16x64xf32> to vector<1x32xf32>
    %20 = vector.shape_cast %19 : vector<1x32xf32> to vector<1x1x32xf32>
    %21 = vector.broadcast %20 : vector<1x1x32xf32> to vector<4x4x32xf32>
    %22 = arith.addf %18, %21 : vector<4x4x32xf32>
    %23 = vector.extract_strided_slice %12 {offsets = [0, 0, 64], sizes = [4, 4, 32], strides = [1, 1, 1]} : vector<4x4x96xf32> to vector<4x4x32xf32>
    %24 = vector.extract_strided_slice %5 {offsets = [2, 0], sizes = [1, 32], strides = [1, 1]} : vector<16x64xf32> to vector<1x32xf32>
    %25 = vector.shape_cast %24 : vector<1x32xf32> to vector<1x1x32xf32>
    %26 = vector.broadcast %25 : vector<1x1x32xf32> to vector<4x4x32xf32>
    %27 = arith.addf %23, %26 : vector<4x4x32xf32>
    %28 = vector.extract_strided_slice %17 {offsets = [0, 0, 0], sizes = [4, 4, 8], strides = [1, 1, 1]} : vector<4x4x32xf32> to vector<4x4x8xf32>
    %29 = vector.extract_strided_slice %17 {offsets = [0, 0, 8], sizes = [4, 4, 8], strides = [1, 1, 1]} : vector<4x4x32xf32> to vector<4x4x8xf32>
    %30 = vector.extract_strided_slice %17 {offsets = [0, 0, 16], sizes = [4, 4, 8], strides = [1, 1, 1]} : vector<4x4x32xf32> to vector<4x4x8xf32>
    %31 = vector.extract_strided_slice %17 {offsets = [0, 0, 24], sizes = [4, 4, 8], strides = [1, 1, 1]} : vector<4x4x32xf32> to vector<4x4x8xf32>
    %32 = tpu.concatenate %28, %29, %30, %31 in 0 : vector<4x4x8xf32>, vector<4x4x8xf32>, vector<4x4x8xf32>, vector<4x4x8xf32> -> vector<16x4x8xf32>
    %33 = vector.extract_strided_slice %22 {offsets = [0, 0, 0], sizes = [4, 4, 8], strides = [1, 1, 1]} : vector<4x4x32xf32> to vector<4x4x8xf32>
    %34 = vector.extract_strided_slice %22 {offsets = [0, 0, 8], sizes = [4, 4, 8], strides = [1, 1, 1]} : vector<4x4x32xf32> to vector<4x4x8xf32>
    %35 = vector.extract_strided_slice %22 {offsets = [0, 0, 16], sizes = [4, 4, 8], strides = [1, 1, 1]} : vector<4x4x32xf32> to vector<4x4x8xf32>
    %36 = vector.extract_strided_slice %22 {offsets = [0, 0, 24], sizes = [4, 4, 8], strides = [1, 1, 1]} : vector<4x4x32xf32> to vector<4x4x8xf32>
    %37 = tpu.concatenate %33, %34, %35, %36 in 0 : vector<4x4x8xf32>, vector<4x4x8xf32>, vector<4x4x8xf32>, vector<4x4x8xf32> -> vector<16x4x8xf32>
    %38 = vector.extract_strided_slice %27 {offsets = [0, 0, 0], sizes = [4, 4, 8], strides = [1, 1, 1]} : vector<4x4x32xf32> to vector<4x4x8xf32>
    %39 = vector.extract_strided_slice %27 {offsets = [0, 0, 8], sizes = [4, 4, 8], strides = [1, 1, 1]} : vector<4x4x32xf32> to vector<4x4x8xf32>
    %40 = vector.extract_strided_slice %27 {offsets = [0, 0, 16], sizes = [4, 4, 8], strides = [1, 1, 1]} : vector<4x4x32xf32> to vector<4x4x8xf32>
    %41 = vector.extract_strided_slice %27 {offsets = [0, 0, 24], sizes = [4, 4, 8], strides = [1, 1, 1]} : vector<4x4x32xf32> to vector<4x4x8xf32>
    %42 = tpu.concatenate %38, %39, %40, %41 in 0 : vector<4x4x8xf32>, vector<4x4x8xf32>, vector<4x4x8xf32>, vector<4x4x8xf32> -> vector<16x4x8xf32>
    "tpu.trace_start"() <{level = 10 : i32, message = "nld,nsd->nls"}> : () -> ()
    %cst_17 = arith.constant dense<0.000000e+00> : vector<16x4x4xf32>
    %43 = tpu.matmul %32, %37, %cst_17 {dimension_numbers = #tpu.dot_dimension_numbers<[2], [2], [1], [1], [0, 0, 0, 1, 1, 1], [0], [0]>} : vector<16x4x8xf32>, vector<16x4x8xf32>, vector<16x4x4xf32> -> vector<16x4x4xf32>
    "tpu.trace_stop"() : () -> ()
    %cst_18 = arith.constant 0.353553385 : f32
    %44 = vector.broadcast %cst_18 : f32 to vector<16x4x4xf32>
    %45 = arith.mulf %43, %44 : vector<16x4x4xf32>
    %cst_19 = arith.constant dense<0xFF800000> : vector<16x4xf32>
    %46 = vector.multi_reduction <maximumf>, %45, %cst_19 [2] : vector<16x4x4xf32> to vector<16x4xf32>
    %cst_20 = arith.constant 0xFF800000 : f32
    %47 = vector.broadcast %cst_20 : f32 to vector<16x4xf32>
    %48 = arith.maximumf %47, %46 : vector<16x4xf32>
    %49 = vector.shape_cast %48 : vector<16x4xf32> to vector<16x4x1xf32>
    %50 = vector.broadcast %49 : vector<16x4x1xf32> to vector<16x4x4xf32>
    %51 = arith.subf %45, %50 : vector<16x4x4xf32>
    %52 = math.exp %51 : vector<16x4x4xf32>
    %cst_21 = arith.constant dense<0.000000e+00> : vector<16x4xf32>
    %53 = vector.multi_reduction <add>, %52, %cst_21 [2] : vector<16x4x4xf32> to vector<16x4xf32>
    %54 = vector.shape_cast %53 : vector<16x4xf32> to vector<16x4x1xf32>
    %55 = vector.broadcast %54 : vector<16x4x1xf32> to vector<16x4x4xf32>
    %56 = arith.divf %52, %55 : vector<16x4x4xf32>
    "tpu.trace_start"() <{level = 10 : i32, message = "nls,nsd->nld"}> : () -> ()
    %cst_22 = arith.constant dense<0.000000e+00> : vector<16x4x8xf32>
    %57 = tpu.matmul %56, %42, %cst_22 {dimension_numbers = #tpu.dot_dimension_numbers<[2], [1], [1], [2], [0, 0, 0, 1, 1, 2], [0], [0]>} : vector<16x4x4xf32>, vector<16x4x8xf32>, vector<16x4x8xf32> -> vector<16x4x8xf32>
    "tpu.trace_stop"() : () -> ()
    %58 = vector.extract_strided_slice %57 {offsets = [0, 0, 0], sizes = [4, 4, 8], strides = [1, 1, 1]} : vector<16x4x8xf32> to vector<4x4x8xf32>
    %59 = vector.extract_strided_slice %57 {offsets = [4, 0, 0], sizes = [4, 4, 8], strides = [1, 1, 1]} : vector<16x4x8xf32> to vector<4x4x8xf32>
    %60 = vector.extract_strided_slice %57 {offsets = [8, 0, 0], sizes = [4, 4, 8], strides = [1, 1, 1]} : vector<16x4x8xf32> to vector<4x4x8xf32>
    %61 = vector.extract_strided_slice %57 {offsets = [12, 0, 0], sizes = [4, 4, 8], strides = [1, 1, 1]} : vector<16x4x8xf32> to vector<4x4x8xf32>
    %62 = tpu.concatenate %58, %59, %60, %61 in 2 : vector<4x4x8xf32>, vector<4x4x8xf32>, vector<4x4x8xf32>, vector<4x4x8xf32> -> vector<4x4x32xf32>
    %c0_23 = arith.constant 0 : index
    %c0_24 = arith.constant 0 : index
    %c0_25 = arith.constant 0 : index
    %63 = vector.load %arg4[%c0_23, %c0_24, %c0_25] : memref<2x32x32xf32, #tpu.memory_space<vmem>>, vector<1x32x32xf32>
    %64 = vector.shape_cast %63 : vector<1x32x32xf32> to vector<32x32xf32>
    "tpu.trace_start"() <{level = 10 : i32, message = "bld,de->ble"}> : () -> ()
    %cst_26 = arith.constant dense<0.000000e+00> : vector<4x4x32xf32>
    %65 = tpu.matmul %62, %64, %cst_26 {dimension_numbers = #tpu.dot_dimension_numbers<[2], [0], [0, 1], [1], [0, 0, 0, 1, 1, 1], [], []>} : vector<4x4x32xf32>, vector<32x32xf32>, vector<4x4x32xf32> -> vector<4x4x32xf32>
    "tpu.trace_stop"() : () -> ()
    %66 = vector.extract_strided_slice %5 {offsets = [3, 0], sizes = [1, 32], strides = [1, 1]} : vector<16x64xf32> to vector<1x32xf32>
    %67 = vector.shape_cast %66 : vector<1x32xf32> to vector<1x1x32xf32>
    %68 = vector.broadcast %67 : vector<1x1x32xf32> to vector<4x4x32xf32>
    %69 = arith.addf %65, %68 : vector<4x4x32xf32>
    %70 = arith.addf %9, %69 : vector<4x4x32xf32>
    %71 = vector.extract_strided_slice %5 {offsets = [4, 0], sizes = [1, 32], strides = [1, 1]} : vector<16x64xf32> to vector<1x32xf32>
    %72 = vector.extract_strided_slice %5 {offsets = [5, 0], sizes = [1, 32], strides = [1, 1]} : vector<16x64xf32> to vector<1x32xf32>
    %cst_27 = arith.constant dense<0.000000e+00> : vector<4x4xf32>
    %73 = vector.multi_reduction <add>, %70, %cst_27 [2] : vector<4x4x32xf32> to vector<4x4xf32>
    %74 = vector.shape_cast %73 : vector<4x4xf32> to vector<4x4x1xf32>
    %cst_28 = arith.constant 3.200000e+01 : f32
    %75 = vector.broadcast %cst_28 : f32 to vector<4x4x1xf32>
    %76 = arith.divf %74, %75 : vector<4x4x1xf32>
    %77 = vector.broadcast %76 : vector<4x4x1xf32> to vector<4x4x32xf32>
    %78 = arith.subf %70, %77 : vector<4x4x32xf32>
    %79 = arith.mulf %78, %78 : vector<4x4x32xf32>
    %cst_29 = arith.constant dense<0.000000e+00> : vector<4x4xf32>
    %80 = vector.multi_reduction <add>, %79, %cst_29 [2] : vector<4x4x32xf32> to vector<4x4xf32>
    %81 = vector.shape_cast %80 : vector<4x4xf32> to vector<4x4x1xf32>
    %cst_30 = arith.constant 3.200000e+01 : f32
    %82 = vector.broadcast %cst_30 : f32 to vector<4x4x1xf32>
    %83 = arith.divf %81, %82 : vector<4x4x1xf32>
    %84 = vector.broadcast %76 : vector<4x4x1xf32> to vector<4x4x32xf32>
    %85 = arith.subf %70, %84 : vector<4x4x32xf32>
    %cst_31 = arith.constant 9.99999974E-6 : f32
    %86 = vector.broadcast %cst_31 : f32 to vector<4x4x1xf32>
    %87 = arith.addf %83, %86 : vector<4x4x1xf32>
    %88 = math.rsqrt %87 : vector<4x4x1xf32>
    %89 = vector.broadcast %88 : vector<4x4x1xf32> to vector<4x4x32xf32>
    %90 = arith.mulf %85, %89 : vector<4x4x32xf32>
    %91 = vector.shape_cast %71 : vector<1x32xf32> to vector<1x1x32xf32>
    %92 = vector.broadcast %91 : vector<1x1x32xf32> to vector<4x4x32xf32>
    %93 = arith.mulf %90, %92 : vector<4x4x32xf32>
    %94 = vector.shape_cast %72 : vector<1x32xf32> to vector<1x1x32xf32>
    %95 = vector.broadcast %94 : vector<1x1x32xf32> to vector<4x4x32xf32>
    %96 = arith.addf %93, %95 : vector<4x4x32xf32>
    %c0_32 = arith.constant 0 : index
    %c0_33 = arith.constant 0 : index
    %c0_34 = arith.constant 0 : index
    %97 = vector.load %arg5[%c0_32, %c0_33, %c0_34] : memref<2x32x64xf32, #tpu.memory_space<vmem>>, vector<1x32x64xf32>
    %98 = vector.shape_cast %97 : vector<1x32x64xf32> to vector<32x64xf32>
    "tpu.trace_start"() <{level = 10 : i32, message = "bld,df->blf"}> : () -> ()
    %cst_35 = arith.constant dense<0.000000e+00> : vector<4x4x64xf32>
    %99 = tpu.matmul %96, %98, %cst_35 {dimension_numbers = #tpu.dot_dimension_numbers<[2], [0], [0, 1], [1], [0, 0, 0, 1, 1, 1], [], []>} : vector<4x4x32xf32>, vector<32x64xf32>, vector<4x4x64xf32> -> vector<4x4x64xf32>
    "tpu.trace_stop"() : () -> ()
    %100 = vector.extract_strided_slice %5 {offsets = [6, 0], sizes = [1, 64], strides = [1, 1]} : vector<16x64xf32> to vector<1x64xf32>
    %101 = vector.shape_cast %100 : vector<1x64xf32> to vector<1x1x64xf32>
    %102 = vector.broadcast %101 : vector<1x1x64xf32> to vector<4x4x64xf32>
    %103 = arith.addf %99, %102 : vector<4x4x64xf32>
    %cst_36 = arith.constant 0.000000e+00 : f32
    %104 = vector.broadcast %cst_36 : f32 to vector<4x4x64xf32>
    %105 = arith.maximumf %103, %104 : vector<4x4x64xf32>
    %c0_37 = arith.constant 0 : index
    %c0_38 = arith.constant 0 : index
    %c0_39 = arith.constant 0 : index
    %106 = vector.load %arg6[%c0_37, %c0_38, %c0_39] : memref<2x64x32xf32, #tpu.memory_space<vmem>>, vector<1x64x32xf32>
    %107 = vector.shape_cast %106 : vector<1x64x32xf32> to vector<64x32xf32>
    "tpu.trace_start"() <{level = 10 : i32, message = "blf,fd->bld"}> : () -> ()
    %cst_40 = arith.constant dense<0.000000e+00> : vector<4x4x32xf32>
    %108 = tpu.matmul %105, %107, %cst_40 {dimension_numbers = #tpu.dot_dimension_numbers<[2], [0], [0, 1], [1], [0, 0, 0, 1, 1, 1], [], []>} : vector<4x4x64xf32>, vector<64x32xf32>, vector<4x4x32xf32> -> vector<4x4x32xf32>
    "tpu.trace_stop"() : () -> ()
    %109 = vector.extract_strided_slice %5 {offsets = [7, 0], sizes = [1, 32], strides = [1, 1]} : vector<16x64xf32> to vector<1x32xf32>
    %110 = vector.shape_cast %109 : vector<1x32xf32> to vector<1x1x32xf32>
    %111 = vector.broadcast %110 : vector<1x1x32xf32> to vector<4x4x32xf32>
    %112 = arith.addf %108, %111 : vector<4x4x32xf32>
    %113 = arith.addf %96, %112 : vector<4x4x32xf32>
    %114 = vector.extract_strided_slice %5 {offsets = [8, 0], sizes = [1, 32], strides = [1, 1]} : vector<16x64xf32> to vector<1x32xf32>
    %115 = vector.extract_strided_slice %5 {offsets = [9, 0], sizes = [1, 32], strides = [1, 1]} : vector<16x64xf32> to vector<1x32xf32>
    %cst_41 = arith.constant dense<0.000000e+00> : vector<4x4xf32>
    %116 = vector.multi_reduction <add>, %113, %cst_41 [2] : vector<4x4x32xf32> to vector<4x4xf32>
    %117 = vector.shape_cast %116 : vector<4x4xf32> to vector<4x4x1xf32>
    %cst_42 = arith.constant 3.200000e+01 : f32
    %118 = vector.broadcast %cst_42 : f32 to vector<4x4x1xf32>
    %119 = arith.divf %117, %118 : vector<4x4x1xf32>
    %120 = vector.broadcast %119 : vector<4x4x1xf32> to vector<4x4x32xf32>
    %121 = arith.subf %113, %120 : vector<4x4x32xf32>
    %122 = arith.mulf %121, %121 : vector<4x4x32xf32>
    %cst_43 = arith.constant dense<0.000000e+00> : vector<4x4xf32>
    %123 = vector.multi_reduction <add>, %122, %cst_43 [2] : vector<4x4x32xf32> to vector<4x4xf32>
    %124 = vector.shape_cast %123 : vector<4x4xf32> to vector<4x4x1xf32>
    %cst_44 = arith.constant 3.200000e+01 : f32
    %125 = vector.broadcast %cst_44 : f32 to vector<4x4x1xf32>
    %126 = arith.divf %124, %125 : vector<4x4x1xf32>
    %127 = vector.broadcast %119 : vector<4x4x1xf32> to vector<4x4x32xf32>
    %128 = arith.subf %113, %127 : vector<4x4x32xf32>
    %cst_45 = arith.constant 9.99999974E-6 : f32
    %129 = vector.broadcast %cst_45 : f32 to vector<4x4x1xf32>
    %130 = arith.addf %126, %129 : vector<4x4x1xf32>
    %131 = math.rsqrt %130 : vector<4x4x1xf32>
    %132 = vector.broadcast %131 : vector<4x4x1xf32> to vector<4x4x32xf32>
    %133 = arith.mulf %128, %132 : vector<4x4x32xf32>
    %134 = vector.shape_cast %114 : vector<1x32xf32> to vector<1x1x32xf32>
    %135 = vector.broadcast %134 : vector<1x1x32xf32> to vector<4x4x32xf32>
    %136 = arith.mulf %133, %135 : vector<4x4x32xf32>
    %137 = vector.shape_cast %115 : vector<1x32xf32> to vector<1x1x32xf32>
    %138 = vector.broadcast %137 : vector<1x1x32xf32> to vector<4x4x32xf32>
    %139 = arith.addf %136, %138 : vector<4x4x32xf32>
    %140 = vector.extract_strided_slice %5 {offsets = [10, 0], sizes = [1, 32], strides = [1, 1]} : vector<16x64xf32> to vector<1x32xf32>
    %141 = vector.extract_strided_slice %5 {offsets = [11, 0], sizes = [1, 32], strides = [1, 1]} : vector<16x64xf32> to vector<1x32xf32>
    %cst_46 = arith.constant dense<0.000000e+00> : vector<4x4xf32>
    %142 = vector.multi_reduction <add>, %139, %cst_46 [2] : vector<4x4x32xf32> to vector<4x4xf32>
    %143 = vector.shape_cast %142 : vector<4x4xf32> to vector<4x4x1xf32>
    %cst_47 = arith.constant 3.200000e+01 : f32
    %144 = vector.broadcast %cst_47 : f32 to vector<4x4x1xf32>
    %145 = arith.divf %143, %144 : vector<4x4x1xf32>
    %146 = vector.broadcast %145 : vector<4x4x1xf32> to vector<4x4x32xf32>
    %147 = arith.subf %139, %146 : vector<4x4x32xf32>
    %148 = arith.mulf %147, %147 : vector<4x4x32xf32>
    %cst_48 = arith.constant dense<0.000000e+00> : vector<4x4xf32>
    %149 = vector.multi_reduction <add>, %148, %cst_48 [2] : vector<4x4x32xf32> to vector<4x4xf32>
    %150 = vector.shape_cast %149 : vector<4x4xf32> to vector<4x4x1xf32>
    %cst_49 = arith.constant 3.200000e+01 : f32
    %151 = vector.broadcast %cst_49 : f32 to vector<4x4x1xf32>
    %152 = arith.divf %150, %151 : vector<4x4x1xf32>
    %153 = vector.broadcast %145 : vector<4x4x1xf32> to vector<4x4x32xf32>
    %154 = arith.subf %139, %153 : vector<4x4x32xf32>
    %cst_50 = arith.constant 9.99999974E-6 : f32
    %155 = vector.broadcast %cst_50 : f32 to vector<4x4x1xf32>
    %156 = arith.addf %152, %155 : vector<4x4x1xf32>
    %157 = math.rsqrt %156 : vector<4x4x1xf32>
    %158 = vector.broadcast %157 : vector<4x4x1xf32> to vector<4x4x32xf32>
    %159 = arith.mulf %154, %158 : vector<4x4x32xf32>
    %160 = vector.shape_cast %140 : vector<1x32xf32> to vector<1x1x32xf32>
    %161 = vector.broadcast %160 : vector<1x1x32xf32> to vector<4x4x32xf32>
    %162 = arith.mulf %159, %161 : vector<4x4x32xf32>
    %163 = vector.shape_cast %141 : vector<1x32xf32> to vector<1x1x32xf32>
    %164 = vector.broadcast %163 : vector<1x1x32xf32> to vector<4x4x32xf32>
    %165 = arith.addf %162, %164 : vector<4x4x32xf32>
    %166 = vector.extract_strided_slice %165 {offsets = [0, 0, 0], sizes = [4, 1, 32], strides = [1, 1, 1]} : vector<4x4x32xf32> to vector<4x1x32xf32>
    %167 = vector.shape_cast %166 : vector<4x1x32xf32> to vector<4x32xf32>
    %168 = vector.extract_strided_slice %165 {offsets = [0, 1, 0], sizes = [4, 1, 32], strides = [1, 1, 1]} : vector<4x4x32xf32> to vector<4x1x32xf32>
    %169 = vector.shape_cast %168 : vector<4x1x32xf32> to vector<4x32xf32>
    %170 = vector.extract_strided_slice %165 {offsets = [0, 2, 0], sizes = [4, 1, 32], strides = [1, 1, 1]} : vector<4x4x32xf32> to vector<4x1x32xf32>
    %171 = vector.shape_cast %170 : vector<4x1x32xf32> to vector<4x32xf32>
    %172 = vector.extract_strided_slice %165 {offsets = [0, 3, 0], sizes = [4, 1, 32], strides = [1, 1, 1]} : vector<4x4x32xf32> to vector<4x1x32xf32>
    %173 = vector.shape_cast %172 : vector<4x1x32xf32> to vector<4x32xf32>
    %174 = tpu.concatenate %167, %169, %171, %173 in 1 : vector<4x32xf32>, vector<4x32xf32>, vector<4x32xf32>, vector<4x32xf32> -> vector<4x128xf32>
    %c0_51 = arith.constant 0 : index
    %c0_52 = arith.constant 0 : index
    %c0_53 = arith.constant 0 : index
    %175 = vector.load %arg7[%c0_51, %c0_52, %c0_53] : memref<2x128x32xf32, #tpu.memory_space<vmem>>, vector<1x128x32xf32>
    %176 = vector.shape_cast %175 : vector<1x128x32xf32> to vector<128x32xf32>
    "tpu.trace_start"() <{level = 10 : i32, message = "bf,fo->bo"}> : () -> ()
    %cst_54 = arith.constant dense<0.000000e+00> : vector<4x32xf32>
    %177 = tpu.matmul %174, %176, %cst_54 {dimension_numbers = #tpu.dot_dimension_numbers<[1], [0], [0], [1], [0, 0, 1, 1], [], []>} : vector<4x128xf32>, vector<128x32xf32>, vector<4x32xf32> -> vector<4x32xf32>
    "tpu.trace_stop"() : () -> ()
    %178 = vector.extract_strided_slice %5 {offsets = [12, 0], sizes = [1, 32], strides = [1, 1]} : vector<16x64xf32> to vector<1x32xf32>
    %179 = vector.broadcast %178 : vector<1x32xf32> to vector<4x32xf32>
    %180 = arith.addf %177, %179 : vector<4x32xf32>
    %c0_55 = arith.constant 0 : index
    %c0_56 = arith.constant 0 : index
    %c0_57 = arith.constant 0 : index
    %181 = vector.load %arg9[%c0_55, %c0_56, %c0_57] : memref<2x4x32xf32, #tpu.memory_space<vmem>>, vector<1x4x32xf32>
    %182 = vector.shape_cast %181 : vector<1x4x32xf32> to vector<4x32xf32>
    %183 = vector.shape_cast %180 : vector<4x32xf32> to vector<1x4x32xf32>
    tpu.vector_store %arg9[%c0_55, %c0_56, %c0_57], %183 {strides = array<i32>} : memref<2x4x32xf32, #tpu.memory_space<vmem>>, vector<1x4x32xf32>,
    %c1 = arith.constant 1 : index
    %c0_58 = arith.constant 0 : index
    %c0_59 = arith.constant 0 : index
    %c0_60 = arith.constant 0 : index
    %184 = vector.load %arg0[%c1, %c0_58, %c0_59, %c0_60] : memref<2x4x4x8xf32, #tpu.memory_space<vmem>>, vector<1x4x4x8xf32>
    %185 = vector.shape_cast %184 : vector<1x4x4x8xf32> to vector<4x4x8xf32>
    %c1_61 = arith.constant 1 : index
    %c0_62 = arith.constant 0 : index
    %c0_63 = arith.constant 0 : index
    %c0_64 = arith.constant 0 : index
    %186 = vector.load %arg1[%c1_61, %c0_62, %c0_63, %c0_64] : memref<2x4x4x32xf32, #tpu.memory_space<vmem>>, vector<1x4x4x32xf32>
    %187 = vector.shape_cast %186 : vector<1x4x4x32xf32> to vector<4x4x32xf32>
    %c1_65 = arith.constant 1 : index
    %c0_66 = arith.constant 0 : index
    %c0_67 = arith.constant 0 : index
    %188 = vector.load %arg8[%c1_65, %c0_66, %c0_67] : memref<2x16x64xf32, #tpu.memory_space<vmem>>, vector<1x16x64xf32>
    %189 = vector.shape_cast %188 : vector<1x16x64xf32> to vector<16x64xf32>
    %c1_68 = arith.constant 1 : index
    %c0_69 = arith.constant 0 : index
    %c0_70 = arith.constant 0 : index
    %190 = vector.load %arg2[%c1_68, %c0_69, %c0_70] : memref<2x8x32xf32, #tpu.memory_space<vmem>>, vector<1x8x32xf32>
    %191 = vector.shape_cast %190 : vector<1x8x32xf32> to vector<8x32xf32>
    "tpu.trace_start"() <{level = 10 : i32, message = "blp,pd->bld"}> : () -> ()
    %cst_71 = arith.constant dense<0.000000e+00> : vector<4x4x32xf32>
    %192 = tpu.matmul %185, %191, %cst_71 {dimension_numbers = #tpu.dot_dimension_numbers<[2], [0], [0, 1], [1], [0, 0, 0, 1, 1, 1], [], []>} : vector<4x4x8xf32>, vector<8x32xf32>, vector<4x4x32xf32> -> vector<4x4x32xf32>
    "tpu.trace_stop"() : () -> ()
    %193 = arith.addf %192, %187 : vector<4x4x32xf32>
    %c1_72 = arith.constant 1 : index
    %c0_73 = arith.constant 0 : index
    %c0_74 = arith.constant 0 : index
    %194 = vector.load %arg3[%c1_72, %c0_73, %c0_74] : memref<2x32x96xf32, #tpu.memory_space<vmem>>, vector<1x32x96xf32>
    %195 = vector.shape_cast %194 : vector<1x32x96xf32> to vector<32x96xf32>
    "tpu.trace_start"() <{level = 10 : i32, message = "bld,de->ble"}> : () -> ()
    %cst_75 = arith.constant dense<0.000000e+00> : vector<4x4x96xf32>
    %196 = tpu.matmul %193, %195, %cst_75 {dimension_numbers = #tpu.dot_dimension_numbers<[2], [0], [0, 1], [1], [0, 0, 0, 1, 1, 1], [], []>} : vector<4x4x32xf32>, vector<32x96xf32>, vector<4x4x96xf32> -> vector<4x4x96xf32>
    "tpu.trace_stop"() : () -> ()
    %197 = vector.extract_strided_slice %196 {offsets = [0, 0, 0], sizes = [4, 4, 32], strides = [1, 1, 1]} : vector<4x4x96xf32> to vector<4x4x32xf32>
    %198 = vector.extract_strided_slice %189 {offsets = [0, 0], sizes = [1, 32], strides = [1, 1]} : vector<16x64xf32> to vector<1x32xf32>
    %199 = vector.shape_cast %198 : vector<1x32xf32> to vector<1x1x32xf32>
    %200 = vector.broadcast %199 : vector<1x1x32xf32> to vector<4x4x32xf32>
    %201 = arith.addf %197, %200 : vector<4x4x32xf32>
    %202 = vector.extract_strided_slice %196 {offsets = [0, 0, 32], sizes = [4, 4, 32], strides = [1, 1, 1]} : vector<4x4x96xf32> to vector<4x4x32xf32>
    %203 = vector.extract_strided_slice %189 {offsets = [1, 0], sizes = [1, 32], strides = [1, 1]} : vector<16x64xf32> to vector<1x32xf32>
    %204 = vector.shape_cast %203 : vector<1x32xf32> to vector<1x1x32xf32>
    %205 = vector.broadcast %204 : vector<1x1x32xf32> to vector<4x4x32xf32>
    %206 = arith.addf %202, %205 : vector<4x4x32xf32>
    %207 = vector.extract_strided_slice %196 {offsets = [0, 0, 64], sizes = [4, 4, 32], strides = [1, 1, 1]} : vector<4x4x96xf32> to vector<4x4x32xf32>
    %208 = vector.extract_strided_slice %189 {offsets = [2, 0], sizes = [1, 32], strides = [1, 1]} : vector<16x64xf32> to vector<1x32xf32>
    %209 = vector.shape_cast %208 : vector<1x32xf32> to vector<1x1x32xf32>
    %210 = vector.broadcast %209 : vector<1x1x32xf32> to vector<4x4x32xf32>
    %211 = arith.addf %207, %210 : vector<4x4x32xf32>
    %212 = vector.extract_strided_slice %201 {offsets = [0, 0, 0], sizes = [4, 4, 8], strides = [1, 1, 1]} : vector<4x4x32xf32> to vector<4x4x8xf32>
    %213 = vector.extract_strided_slice %201 {offsets = [0, 0, 8], sizes = [4, 4, 8], strides = [1, 1, 1]} : vector<4x4x32xf32> to vector<4x4x8xf32>
    %214 = vector.extract_strided_slice %201 {offsets = [0, 0, 16], sizes = [4, 4, 8], strides = [1, 1, 1]} : vector<4x4x32xf32> to vector<4x4x8xf32>
    %215 = vector.extract_strided_slice %201 {offsets = [0, 0, 24], sizes = [4, 4, 8], strides = [1, 1, 1]} : vector<4x4x32xf32> to vector<4x4x8xf32>
    %216 = tpu.concatenate %212, %213, %214, %215 in 0 : vector<4x4x8xf32>, vector<4x4x8xf32>, vector<4x4x8xf32>, vector<4x4x8xf32> -> vector<16x4x8xf32>
    %217 = vector.extract_strided_slice %206 {offsets = [0, 0, 0], sizes = [4, 4, 8], strides = [1, 1, 1]} : vector<4x4x32xf32> to vector<4x4x8xf32>
    %218 = vector.extract_strided_slice %206 {offsets = [0, 0, 8], sizes = [4, 4, 8], strides = [1, 1, 1]} : vector<4x4x32xf32> to vector<4x4x8xf32>
    %219 = vector.extract_strided_slice %206 {offsets = [0, 0, 16], sizes = [4, 4, 8], strides = [1, 1, 1]} : vector<4x4x32xf32> to vector<4x4x8xf32>
    %220 = vector.extract_strided_slice %206 {offsets = [0, 0, 24], sizes = [4, 4, 8], strides = [1, 1, 1]} : vector<4x4x32xf32> to vector<4x4x8xf32>
    %221 = tpu.concatenate %217, %218, %219, %220 in 0 : vector<4x4x8xf32>, vector<4x4x8xf32>, vector<4x4x8xf32>, vector<4x4x8xf32> -> vector<16x4x8xf32>
    %222 = vector.extract_strided_slice %211 {offsets = [0, 0, 0], sizes = [4, 4, 8], strides = [1, 1, 1]} : vector<4x4x32xf32> to vector<4x4x8xf32>
    %223 = vector.extract_strided_slice %211 {offsets = [0, 0, 8], sizes = [4, 4, 8], strides = [1, 1, 1]} : vector<4x4x32xf32> to vector<4x4x8xf32>
    %224 = vector.extract_strided_slice %211 {offsets = [0, 0, 16], sizes = [4, 4, 8], strides = [1, 1, 1]} : vector<4x4x32xf32> to vector<4x4x8xf32>
    %225 = vector.extract_strided_slice %211 {offsets = [0, 0, 24], sizes = [4, 4, 8], strides = [1, 1, 1]} : vector<4x4x32xf32> to vector<4x4x8xf32>
    %226 = tpu.concatenate %222, %223, %224, %225 in 0 : vector<4x4x8xf32>, vector<4x4x8xf32>, vector<4x4x8xf32>, vector<4x4x8xf32> -> vector<16x4x8xf32>
    "tpu.trace_start"() <{level = 10 : i32, message = "nld,nsd->nls"}> : () -> ()
    %cst_76 = arith.constant dense<0.000000e+00> : vector<16x4x4xf32>
    %227 = tpu.matmul %216, %221, %cst_76 {dimension_numbers = #tpu.dot_dimension_numbers<[2], [2], [1], [1], [0, 0, 0, 1, 1, 1], [0], [0]>} : vector<16x4x8xf32>, vector<16x4x8xf32>, vector<16x4x4xf32> -> vector<16x4x4xf32>
    "tpu.trace_stop"() : () -> ()
    %cst_77 = arith.constant 0.353553385 : f32
    %228 = vector.broadcast %cst_77 : f32 to vector<16x4x4xf32>
    %229 = arith.mulf %227, %228 : vector<16x4x4xf32>
    %cst_78 = arith.constant dense<0xFF800000> : vector<16x4xf32>
    %230 = vector.multi_reduction <maximumf>, %229, %cst_78 [2] : vector<16x4x4xf32> to vector<16x4xf32>
    %cst_79 = arith.constant 0xFF800000 : f32
    %231 = vector.broadcast %cst_79 : f32 to vector<16x4xf32>
    %232 = arith.maximumf %231, %230 : vector<16x4xf32>
    %233 = vector.shape_cast %232 : vector<16x4xf32> to vector<16x4x1xf32>
    %234 = vector.broadcast %233 : vector<16x4x1xf32> to vector<16x4x4xf32>
    %235 = arith.subf %229, %234 : vector<16x4x4xf32>
    %236 = math.exp %235 : vector<16x4x4xf32>
    %cst_80 = arith.constant dense<0.000000e+00> : vector<16x4xf32>
    %237 = vector.multi_reduction <add>, %236, %cst_80 [2] : vector<16x4x4xf32> to vector<16x4xf32>
    %238 = vector.shape_cast %237 : vector<16x4xf32> to vector<16x4x1xf32>
    %239 = vector.broadcast %238 : vector<16x4x1xf32> to vector<16x4x4xf32>
    %240 = arith.divf %236, %239 : vector<16x4x4xf32>
    "tpu.trace_start"() <{level = 10 : i32, message = "nls,nsd->nld"}> : () -> ()
    %cst_81 = arith.constant dense<0.000000e+00> : vector<16x4x8xf32>
    %241 = tpu.matmul %240, %226, %cst_81 {dimension_numbers = #tpu.dot_dimension_numbers<[2], [1], [1], [2], [0, 0, 0, 1, 1, 2], [0], [0]>} : vector<16x4x4xf32>, vector<16x4x8xf32>, vector<16x4x8xf32> -> vector<16x4x8xf32>
    "tpu.trace_stop"() : () -> ()
    %242 = vector.extract_strided_slice %241 {offsets = [0, 0, 0], sizes = [4, 4, 8], strides = [1, 1, 1]} : vector<16x4x8xf32> to vector<4x4x8xf32>
    %243 = vector.extract_strided_slice %241 {offsets = [4, 0, 0], sizes = [4, 4, 8], strides = [1, 1, 1]} : vector<16x4x8xf32> to vector<4x4x8xf32>
    %244 = vector.extract_strided_slice %241 {offsets = [8, 0, 0], sizes = [4, 4, 8], strides = [1, 1, 1]} : vector<16x4x8xf32> to vector<4x4x8xf32>
    %245 = vector.extract_strided_slice %241 {offsets = [12, 0, 0], sizes = [4, 4, 8], strides = [1, 1, 1]} : vector<16x4x8xf32> to vector<4x4x8xf32>
    %246 = tpu.concatenate %242, %243, %244, %245 in 2 : vector<4x4x8xf32>, vector<4x4x8xf32>, vector<4x4x8xf32>, vector<4x4x8xf32> -> vector<4x4x32xf32>
    %c1_82 = arith.constant 1 : index
    %c0_83 = arith.constant 0 : index
    %c0_84 = arith.constant 0 : index
    %247 = vector.load %arg4[%c1_82, %c0_83, %c0_84] : memref<2x32x32xf32, #tpu.memory_space<vmem>>, vector<1x32x32xf32>
    %248 = vector.shape_cast %247 : vector<1x32x32xf32> to vector<32x32xf32>
    "tpu.trace_start"() <{level = 10 : i32, message = "bld,de->ble"}> : () -> ()
    %cst_85 = arith.constant dense<0.000000e+00> : vector<4x4x32xf32>
    %249 = tpu.matmul %246, %248, %cst_85 {dimension_numbers = #tpu.dot_dimension_numbers<[2], [0], [0, 1], [1], [0, 0, 0, 1, 1, 1], [], []>} : vector<4x4x32xf32>, vector<32x32xf32>, vector<4x4x32xf32> -> vector<4x4x32xf32>
    "tpu.trace_stop"() : () -> ()
    %250 = vector.extract_strided_slice %189 {offsets = [3, 0], sizes = [1, 32], strides = [1, 1]} : vector<16x64xf32> to vector<1x32xf32>
    %251 = vector.shape_cast %250 : vector<1x32xf32> to vector<1x1x32xf32>
    %252 = vector.broadcast %251 : vector<1x1x32xf32> to vector<4x4x32xf32>
    %253 = arith.addf %249, %252 : vector<4x4x32xf32>
    %254 = arith.addf %193, %253 : vector<4x4x32xf32>
    %255 = vector.extract_strided_slice %189 {offsets = [4, 0], sizes = [1, 32], strides = [1, 1]} : vector<16x64xf32> to vector<1x32xf32>
    %256 = vector.extract_strided_slice %189 {offsets = [5, 0], sizes = [1, 32], strides = [1, 1]} : vector<16x64xf32> to vector<1x32xf32>
    %cst_86 = arith.constant dense<0.000000e+00> : vector<4x4xf32>
    %257 = vector.multi_reduction <add>, %254, %cst_86 [2] : vector<4x4x32xf32> to vector<4x4xf32>
    %258 = vector.shape_cast %257 : vector<4x4xf32> to vector<4x4x1xf32>
    %cst_87 = arith.constant 3.200000e+01 : f32
    %259 = vector.broadcast %cst_87 : f32 to vector<4x4x1xf32>
    %260 = arith.divf %258, %259 : vector<4x4x1xf32>
    %261 = vector.broadcast %260 : vector<4x4x1xf32> to vector<4x4x32xf32>
    %262 = arith.subf %254, %261 : vector<4x4x32xf32>
    %263 = arith.mulf %262, %262 : vector<4x4x32xf32>
    %cst_88 = arith.constant dense<0.000000e+00> : vector<4x4xf32>
    %264 = vector.multi_reduction <add>, %263, %cst_88 [2] : vector<4x4x32xf32> to vector<4x4xf32>
    %265 = vector.shape_cast %264 : vector<4x4xf32> to vector<4x4x1xf32>
    %cst_89 = arith.constant 3.200000e+01 : f32
    %266 = vector.broadcast %cst_89 : f32 to vector<4x4x1xf32>
    %267 = arith.divf %265, %266 : vector<4x4x1xf32>
    %268 = vector.broadcast %260 : vector<4x4x1xf32> to vector<4x4x32xf32>
    %269 = arith.subf %254, %268 : vector<4x4x32xf32>
    %cst_90 = arith.constant 9.99999974E-6 : f32
    %270 = vector.broadcast %cst_90 : f32 to vector<4x4x1xf32>
    %271 = arith.addf %267, %270 : vector<4x4x1xf32>
    %272 = math.rsqrt %271 : vector<4x4x1xf32>
    %273 = vector.broadcast %272 : vector<4x4x1xf32> to vector<4x4x32xf32>
    %274 = arith.mulf %269, %273 : vector<4x4x32xf32>
    %275 = vector.shape_cast %255 : vector<1x32xf32> to vector<1x1x32xf32>
    %276 = vector.broadcast %275 : vector<1x1x32xf32> to vector<4x4x32xf32>
    %277 = arith.mulf %274, %276 : vector<4x4x32xf32>
    %278 = vector.shape_cast %256 : vector<1x32xf32> to vector<1x1x32xf32>
    %279 = vector.broadcast %278 : vector<1x1x32xf32> to vector<4x4x32xf32>
    %280 = arith.addf %277, %279 : vector<4x4x32xf32>
    %c1_91 = arith.constant 1 : index
    %c0_92 = arith.constant 0 : index
    %c0_93 = arith.constant 0 : index
    %281 = vector.load %arg5[%c1_91, %c0_92, %c0_93] : memref<2x32x64xf32, #tpu.memory_space<vmem>>, vector<1x32x64xf32>
    %282 = vector.shape_cast %281 : vector<1x32x64xf32> to vector<32x64xf32>
    "tpu.trace_start"() <{level = 10 : i32, message = "bld,df->blf"}> : () -> ()
    %cst_94 = arith.constant dense<0.000000e+00> : vector<4x4x64xf32>
    %283 = tpu.matmul %280, %282, %cst_94 {dimension_numbers = #tpu.dot_dimension_numbers<[2], [0], [0, 1], [1], [0, 0, 0, 1, 1, 1], [], []>} : vector<4x4x32xf32>, vector<32x64xf32>, vector<4x4x64xf32> -> vector<4x4x64xf32>
    "tpu.trace_stop"() : () -> ()
    %284 = vector.extract_strided_slice %189 {offsets = [6, 0], sizes = [1, 64], strides = [1, 1]} : vector<16x64xf32> to vector<1x64xf32>
    %285 = vector.shape_cast %284 : vector<1x64xf32> to vector<1x1x64xf32>
    %286 = vector.broadcast %285 : vector<1x1x64xf32> to vector<4x4x64xf32>
    %287 = arith.addf %283, %286 : vector<4x4x64xf32>
    %cst_95 = arith.constant 0.000000e+00 : f32
    %288 = vector.broadcast %cst_95 : f32 to vector<4x4x64xf32>
    %289 = arith.maximumf %287, %288 : vector<4x4x64xf32>
    %c1_96 = arith.constant 1 : index
    %c0_97 = arith.constant 0 : index
    %c0_98 = arith.constant 0 : index
    %290 = vector.load %arg6[%c1_96, %c0_97, %c0_98] : memref<2x64x32xf32, #tpu.memory_space<vmem>>, vector<1x64x32xf32>
    %291 = vector.shape_cast %290 : vector<1x64x32xf32> to vector<64x32xf32>
    "tpu.trace_start"() <{level = 10 : i32, message = "blf,fd->bld"}> : () -> ()
    %cst_99 = arith.constant dense<0.000000e+00> : vector<4x4x32xf32>
    %292 = tpu.matmul %289, %291, %cst_99 {dimension_numbers = #tpu.dot_dimension_numbers<[2], [0], [0, 1], [1], [0, 0, 0, 1, 1, 1], [], []>} : vector<4x4x64xf32>, vector<64x32xf32>, vector<4x4x32xf32> -> vector<4x4x32xf32>
    "tpu.trace_stop"() : () -> ()
    %293 = vector.extract_strided_slice %189 {offsets = [7, 0], sizes = [1, 32], strides = [1, 1]} : vector<16x64xf32> to vector<1x32xf32>
    %294 = vector.shape_cast %293 : vector<1x32xf32> to vector<1x1x32xf32>
    %295 = vector.broadcast %294 : vector<1x1x32xf32> to vector<4x4x32xf32>
    %296 = arith.addf %292, %295 : vector<4x4x32xf32>
    %297 = arith.addf %280, %296 : vector<4x4x32xf32>
    %298 = vector.extract_strided_slice %189 {offsets = [8, 0], sizes = [1, 32], strides = [1, 1]} : vector<16x64xf32> to vector<1x32xf32>
    %299 = vector.extract_strided_slice %189 {offsets = [9, 0], sizes = [1, 32], strides = [1, 1]} : vector<16x64xf32> to vector<1x32xf32>
    %cst_100 = arith.constant dense<0.000000e+00> : vector<4x4xf32>
    %300 = vector.multi_reduction <add>, %297, %cst_100 [2] : vector<4x4x32xf32> to vector<4x4xf32>
    %301 = vector.shape_cast %300 : vector<4x4xf32> to vector<4x4x1xf32>
    %cst_101 = arith.constant 3.200000e+01 : f32
    %302 = vector.broadcast %cst_101 : f32 to vector<4x4x1xf32>
    %303 = arith.divf %301, %302 : vector<4x4x1xf32>
    %304 = vector.broadcast %303 : vector<4x4x1xf32> to vector<4x4x32xf32>
    %305 = arith.subf %297, %304 : vector<4x4x32xf32>
    %306 = arith.mulf %305, %305 : vector<4x4x32xf32>
    %cst_102 = arith.constant dense<0.000000e+00> : vector<4x4xf32>
    %307 = vector.multi_reduction <add>, %306, %cst_102 [2] : vector<4x4x32xf32> to vector<4x4xf32>
    %308 = vector.shape_cast %307 : vector<4x4xf32> to vector<4x4x1xf32>
    %cst_103 = arith.constant 3.200000e+01 : f32
    %309 = vector.broadcast %cst_103 : f32 to vector<4x4x1xf32>
    %310 = arith.divf %308, %309 : vector<4x4x1xf32>
    %311 = vector.broadcast %303 : vector<4x4x1xf32> to vector<4x4x32xf32>
    %312 = arith.subf %297, %311 : vector<4x4x32xf32>
    %cst_104 = arith.constant 9.99999974E-6 : f32
    %313 = vector.broadcast %cst_104 : f32 to vector<4x4x1xf32>
    %314 = arith.addf %310, %313 : vector<4x4x1xf32>
    %315 = math.rsqrt %314 : vector<4x4x1xf32>
    %316 = vector.broadcast %315 : vector<4x4x1xf32> to vector<4x4x32xf32>
    %317 = arith.mulf %312, %316 : vector<4x4x32xf32>
    %318 = vector.shape_cast %298 : vector<1x32xf32> to vector<1x1x32xf32>
    %319 = vector.broadcast %318 : vector<1x1x32xf32> to vector<4x4x32xf32>
    %320 = arith.mulf %317, %319 : vector<4x4x32xf32>
    %321 = vector.shape_cast %299 : vector<1x32xf32> to vector<1x1x32xf32>
    %322 = vector.broadcast %321 : vector<1x1x32xf32> to vector<4x4x32xf32>
    %323 = arith.addf %320, %322 : vector<4x4x32xf32>
    %324 = vector.extract_strided_slice %189 {offsets = [10, 0], sizes = [1, 32], strides = [1, 1]} : vector<16x64xf32> to vector<1x32xf32>
    %325 = vector.extract_strided_slice %189 {offsets = [11, 0], sizes = [1, 32], strides = [1, 1]} : vector<16x64xf32> to vector<1x32xf32>
    %cst_105 = arith.constant dense<0.000000e+00> : vector<4x4xf32>
    %326 = vector.multi_reduction <add>, %323, %cst_105 [2] : vector<4x4x32xf32> to vector<4x4xf32>
    %327 = vector.shape_cast %326 : vector<4x4xf32> to vector<4x4x1xf32>
    %cst_106 = arith.constant 3.200000e+01 : f32
    %328 = vector.broadcast %cst_106 : f32 to vector<4x4x1xf32>
    %329 = arith.divf %327, %328 : vector<4x4x1xf32>
    %330 = vector.broadcast %329 : vector<4x4x1xf32> to vector<4x4x32xf32>
    %331 = arith.subf %323, %330 : vector<4x4x32xf32>
    %332 = arith.mulf %331, %331 : vector<4x4x32xf32>
    %cst_107 = arith.constant dense<0.000000e+00> : vector<4x4xf32>
    %333 = vector.multi_reduction <add>, %332, %cst_107 [2] : vector<4x4x32xf32> to vector<4x4xf32>
    %334 = vector.shape_cast %333 : vector<4x4xf32> to vector<4x4x1xf32>
    %cst_108 = arith.constant 3.200000e+01 : f32
    %335 = vector.broadcast %cst_108 : f32 to vector<4x4x1xf32>
    %336 = arith.divf %334, %335 : vector<4x4x1xf32>
    %337 = vector.broadcast %329 : vector<4x4x1xf32> to vector<4x4x32xf32>
    %338 = arith.subf %323, %337 : vector<4x4x32xf32>
    %cst_109 = arith.constant 9.99999974E-6 : f32
    %339 = vector.broadcast %cst_109 : f32 to vector<4x4x1xf32>
    %340 = arith.addf %336, %339 : vector<4x4x1xf32>
    %341 = math.rsqrt %340 : vector<4x4x1xf32>
    %342 = vector.broadcast %341 : vector<4x4x1xf32> to vector<4x4x32xf32>
    %343 = arith.mulf %338, %342 : vector<4x4x32xf32>
    %344 = vector.shape_cast %324 : vector<1x32xf32> to vector<1x1x32xf32>
    %345 = vector.broadcast %344 : vector<1x1x32xf32> to vector<4x4x32xf32>
    %346 = arith.mulf %343, %345 : vector<4x4x32xf32>
    %347 = vector.shape_cast %325 : vector<1x32xf32> to vector<1x1x32xf32>
    %348 = vector.broadcast %347 : vector<1x1x32xf32> to vector<4x4x32xf32>
    %349 = arith.addf %346, %348 : vector<4x4x32xf32>
    %350 = vector.extract_strided_slice %349 {offsets = [0, 0, 0], sizes = [4, 1, 32], strides = [1, 1, 1]} : vector<4x4x32xf32> to vector<4x1x32xf32>
    %351 = vector.shape_cast %350 : vector<4x1x32xf32> to vector<4x32xf32>
    %352 = vector.extract_strided_slice %349 {offsets = [0, 1, 0], sizes = [4, 1, 32], strides = [1, 1, 1]} : vector<4x4x32xf32> to vector<4x1x32xf32>
    %353 = vector.shape_cast %352 : vector<4x1x32xf32> to vector<4x32xf32>
    %354 = vector.extract_strided_slice %349 {offsets = [0, 2, 0], sizes = [4, 1, 32], strides = [1, 1, 1]} : vector<4x4x32xf32> to vector<4x1x32xf32>
    %355 = vector.shape_cast %354 : vector<4x1x32xf32> to vector<4x32xf32>
    %356 = vector.extract_strided_slice %349 {offsets = [0, 3, 0], sizes = [4, 1, 32], strides = [1, 1, 1]} : vector<4x4x32xf32> to vector<4x1x32xf32>
    %357 = vector.shape_cast %356 : vector<4x1x32xf32> to vector<4x32xf32>
    %358 = tpu.concatenate %351, %353, %355, %357 in 1 : vector<4x32xf32>, vector<4x32xf32>, vector<4x32xf32>, vector<4x32xf32> -> vector<4x128xf32>
    %c1_110 = arith.constant 1 : index
    %c0_111 = arith.constant 0 : index
    %c0_112 = arith.constant 0 : index
    %359 = vector.load %arg7[%c1_110, %c0_111, %c0_112] : memref<2x128x32xf32, #tpu.memory_space<vmem>>, vector<1x128x32xf32>
    %360 = vector.shape_cast %359 : vector<1x128x32xf32> to vector<128x32xf32>
    "tpu.trace_start"() <{level = 10 : i32, message = "bf,fo->bo"}> : () -> ()
    %cst_113 = arith.constant dense<0.000000e+00> : vector<4x32xf32>
    %361 = tpu.matmul %358, %360, %cst_113 {dimension_numbers = #tpu.dot_dimension_numbers<[1], [0], [0], [1], [0, 0, 1, 1], [], []>} : vector<4x128xf32>, vector<128x32xf32>, vector<4x32xf32> -> vector<4x32xf32>
    "tpu.trace_stop"() : () -> ()
    %362 = vector.extract_strided_slice %189 {offsets = [12, 0], sizes = [1, 32], strides = [1, 1]} : vector<16x64xf32> to vector<1x32xf32>
    %363 = vector.broadcast %362 : vector<1x32xf32> to vector<4x32xf32>
    %364 = arith.addf %361, %363 : vector<4x32xf32>
    %c1_114 = arith.constant 1 : index
    %c0_115 = arith.constant 0 : index
    %c0_116 = arith.constant 0 : index
    %365 = vector.load %arg9[%c1_114, %c0_115, %c0_116] : memref<2x4x32xf32, #tpu.memory_space<vmem>>, vector<1x4x32xf32>
    %366 = vector.shape_cast %365 : vector<1x4x32xf32> to vector<4x32xf32>
    %367 = vector.shape_cast %364 : vector<4x32xf32> to vector<1x4x32xf32>
    tpu.vector_store %arg9[%c1_114, %c0_115, %c0_116], %367 {strides = array<i32>} : memref<2x4x32xf32, #tpu.memory_space<vmem>>, vector<1x4x32xf32>,
    return
  }
}

</mosaic_0001>

<bundles_post_ra>
// kernel: squeeze.6
= control target key start
LH: loop header
LB: loop body
LE: loop exit
PB: predicated region body
PF: predicated region fallthrough
CT: control target
= control target key end

     0   :  { %s67_s8 = smov 116   ;;  %vm8_vm0 = vcmask 31744   ;;  %s68_s11 = smov 120   ;;  %s118_s0 = inlined_call_operand.vmem [shape: f32[1,4,32], index: 0, kind: input, shape index: {}]   ;;  %s119_s1 = inlined_call_operand.vmem [shape: f32[2,2,8,4], index: 1, kind: output, shape index: {}]  }
   0x1   :  { %v5_v0 = vld [vmem:[%s118_s0] sm:$0xf]  ;;  %s66_s0 = smov 124   ;;  %s69_s12 = smov 112  }
   0x2   :  { %6 = vst [vmem:[#allocation0] sm:$0xf] %v5_v0  ;;  %s70_s13 = smov 108   ;;  %s71_s14 = smov 104  }
   0x3   :  { %s72_s15 = smov 100  }
   0x9   :  { %v10_v1 = vld [vmem:[#allocation0] sm:$0xf]  }
   0xa   :  { %v22_v2 = vld [vmem:[#allocation0] sm:$0xf]   ;;  %11 = vrot.lane.b32.xlu0 %v10_v1, %s66_s0 }
   0xb   :  { %23 = vrot.lane.b32.xlu1 %v22_v2, %s67_s8  ;;  %v16_v3 = vld [vmem:[#allocation0] sm:$0xf]  }
   0xc   :  { %v28_v4 = vld [vmem:[#allocation0] sm:$0xf]  }
   0xd   :  { %v7_v5 = vld [vmem:[#allocation0] sm:$0xf]  }
   0xe   :  { %9 = vst.msk [vmem:[%s119_s1] ss:$8 sm:$0xf] %vm8_vm0, %v7_v5   ;;  %17 = vrot.lane.b32.xlu0 %v16_v3, %s68_s11  ;;  %v34_v6 = vld [vmem:[#allocation0] sm:$0xf]  }
   0xf   :  { %29 = vrot.lane.b32.xlu1 %v28_v4, %s69_s12  ;;  %v40_v7 = vld [vmem:[#allocation0] sm:$0xf]  }
  0x10   :  { %v46_v8 = vld [vmem:[#allocation0] sm:$0xf]  }
  0x12   :  { %35 = vrot.lane.b32.xlu0 %v34_v6, %s70_s13 }
  0x13   :  { %41 = vrot.lane.b32.xlu1 %v40_v7, %s71_s14 }
  0x16   :  { %47 = vrot.lane.b32.xlu0 %v46_v8, %s72_s15 }
  0x7c   :  { %v12_v9 = vpop.permute.xlu0 %11  }
  0x7d   :  { %v24_v10 = vpop.permute.xlu1 %23   ;;  %52 = vst.msk [vmem:[%s119_s1 + $0x1] ss:$8 sm:$0xf] %vm8_vm0, %v12_v9  }
  0x7e   :  { %54 = vst.msk [vmem:[%s119_s1 + $0x3] ss:$8 sm:$0xf] %vm8_vm0, %v24_v10  }
  0x80   :  { %v18_v11 = vpop.permute.xlu0 %17  }
  0x81   :  { %v30_v12 = vpop.permute.xlu1 %29   ;;  %53 = vst.msk [vmem:[%s119_s1 + $0x2] ss:$8 sm:$0xf] %vm8_vm0, %v18_v11  }
  0x82   :  { %55 = vst.msk [vmem:[%s119_s1 + $0x4] ss:$8 sm:$0xf] %vm8_vm0, %v30_v12  }
  0x84   :  { %v36_v13 = vpop.permute.xlu0 %35  }
  0x85   :  { %v42_v14 = vpop.permute.xlu1 %41   ;;  %56 = vst.msk [vmem:[%s119_s1 + $0x5] ss:$8 sm:$0xf] %vm8_vm0, %v36_v13  }
  0x86   :  { %57 = vst.msk [vmem:[%s119_s1 + $0x6] ss:$8 sm:$0xf] %vm8_vm0, %v42_v14  }
  0x88   :  { %v48_v15 = vpop.permute.xlu0 %47  }
  0x89   :  { %58 = vst.msk [vmem:[%s119_s1 + $0x7] ss:$8 sm:$0xf] %vm8_vm0, %v48_v15  }

// kernel: squeeze.7
= control target key start
LH: loop header
LB: loop body
LE: loop exit
PB: predicated region body
PF: predicated region fallthrough
CT: control target
= control target key end

     0   :  { %s67_s8 = smov 116   ;;  %vm8_vm0 = vcmask 31744   ;;  %s68_s11 = smov 120   ;;  %s118_s0 = inlined_call_operand.vmem [shape: f32[1,2,32], index: 0, kind: input, shape index: {}]   ;;  %s119_s1 = inlined_call_operand.vmem [shape: f32[2,8,4], index: 1, kind: output, shape index: {}]  }
   0x1   :  { %v5_v0 = vld [vmem:[%s118_s0] sm:$0x3]  ;;  %s66_s0 = smov 124   ;;  %s69_s12 = smov 112  }
   0x2   :  { %6 = vst [vmem:[#allocation0] sm:$0x3] %v5_v0  ;;  %s70_s13 = smov 108   ;;  %s71_s14 = smov 104  }
   0x3   :  { %s72_s15 = smov 100  }
   0x9   :  { %v10_v1 = vld [vmem:[#allocation0] sm:$0x3]  }
   0xa   :  { %v22_v2 = vld [vmem:[#allocation0] sm:$0x3]   ;;  %11 = vrot.lane.b32.xlu0 %v10_v1, %s66_s0 }
   0xb   :  { %23 = vrot.lane.b32.xlu1 %v22_v2, %s67_s8  ;;  %v16_v3 = vld [vmem:[#allocation0] sm:$0x3]  }
   0xc   :  { %v28_v4 = vld [vmem:[#allocation0] sm:$0x3]  }
   0xd   :  { %v7_v5 = vld [vmem:[#allocation0] sm:$0x3]  }
   0xe   :  { %9 = vst.msk [vmem:[%s119_s1] ss:$8 sm:$0x3] %vm8_vm0, %v7_v5   ;;  %17 = vrot.lane.b32.xlu0 %v16_v3, %s68_s11  ;;  %v34_v6 = vld [vmem:[#allocation0] sm:$0x3]  }
   0xf   :  { %29 = vrot.lane.b32.xlu1 %v28_v4, %s69_s12  ;;  %v40_v7 = vld [vmem:[#allocation0] sm:$0x3]  }
  0x10   :  { %v46_v8 = vld [vmem:[#allocation0] sm:$0x3]  }
  0x12   :  { %35 = vrot.lane.b32.xlu0 %v34_v6, %s70_s13 }
  0x13   :  { %41 = vrot.lane.b32.xlu1 %v40_v7, %s71_s14 }
  0x16   :  { %47 = vrot.lane.b32.xlu0 %v46_v8, %s72_s15 }
  0x7c   :  { %v12_v9 = vpop.permute.xlu0 %11  }
  0x7d   :  { %v24_v10 = vpop.permute.xlu1 %23   ;;  %52 = vst.msk [vmem:[%s119_s1 + $0x1] ss:$8 sm:$0x3] %vm8_vm0, %v12_v9  }
  0x7e   :  { %54 = vst.msk [vmem:[%s119_s1 + $0x3] ss:$8 sm:$0x3] %vm8_vm0, %v24_v10  }
  0x80   :  { %v18_v11 = vpop.permute.xlu0 %17  }
  0x81   :  { %v30_v12 = vpop.permute.xlu1 %29   ;;  %53 = vst.msk [vmem:[%s119_s1 + $0x2] ss:$8 sm:$0x3] %vm8_vm0, %v18_v11  }
  0x82   :  { %55 = vst.msk [vmem:[%s119_s1 + $0x4] ss:$8 sm:$0x3] %vm8_vm0, %v30_v12  }
  0x84   :  { %v36_v13 = vpop.permute.xlu0 %35  }
  0x85   :  { %v42_v14 = vpop.permute.xlu1 %41   ;;  %56 = vst.msk [vmem:[%s119_s1 + $0x5] ss:$8 sm:$0x3] %vm8_vm0, %v36_v13  }
  0x86   :  { %57 = vst.msk [vmem:[%s119_s1 + $0x6] ss:$8 sm:$0x3] %vm8_vm0, %v42_v14  }
  0x88   :  { %v48_v15 = vpop.permute.xlu0 %47  }
  0x89   :  { %58 = vst.msk [vmem:[%s119_s1 + $0x7] ss:$8 sm:$0x3] %vm8_vm0, %v48_v15  }

// kernel: model_forward.1
= control target key start
LH: loop header
LB: loop body
LE: loop exit
PB: predicated region body
PF: predicated region fallthrough
CT: control target
= control target key end

     0   :  { %vm57_vm0 = vcmask 64512   ;;  %v233_v7 = vlaneseq  ;;  %s8631_s25 = smov 32   ;;  %vm147_vm1 = vcmask 261120   ;;  %s8632_s30 = smov 120   ;;  %v8634_v27 = vmov 0.0   ;;  %s10348_s2 = inlined_call_operand.vmem [shape: f32[2,8,32], index: 2, kind: input, shape index: {}]   ;;  %s10349_s0 = inlined_call_operand.vmem [shape: f32[2,4,4,8], index: 0, kind: input, shape index: {}]   ;;  %s10350_s3 = inlined_call_operand.vmem [shape: f32[2,32,96], index: 3, kind: input, shape index: {}]   ;;  %s10351_s1 = inlined_call_operand.vmem [shape: f32[2,4,4,32], index: 1, kind: input, shape index: {}]   ;;  %s10352_s8 = inlined_call_operand.vmem [shape: f32[2,16,64], index: 8, kind: input, shape index: {}]   ;;  %s10353_s4 = inlined_call_operand.vmem [shape: f32[2,32,32], index: 4, kind: input, shape index: {}]   ;;  %s10354_s5 = inlined_call_operand.vmem [shape: f32[2,32,64], index: 5, kind: input, shape index: {}]   ;;  %s10355_s6 = inlined_call_operand.vmem [shape: f32[2,64,32], index: 6, kind: input, shape index: {}]   ;;  %s10356_s7 = inlined_call_operand.vmem [shape: f32[2,128,32], index: 7, kind: input, shape index: {}]   ;;  %s10357_s9 = inlined_call_operand.vmem [shape: f32[2,4,32], index: 9, kind: output, shape index: {}]  }
   0x1   :  { %v42_v0 = vld [vmem:[%s10348_s2] sm:$0xff]  ;;  %v8446_v2 = vld [vmem:[%s10349_s0 + $0x8] sm:$0xff]   ;;  %v146_v3 = vld [vmem:[%s10350_s3 + $0x18] sm:$0xff]  ;;  %s8633_s10 = smov 112   ;;  %7956 = vmatprep.subr.mxu1 %v8634_v27  ;;  %vm8635_vm2 = vmmov 0   ;;  %s8636_s11 = smov 104  }
   0x2   :  { %7930 = vmatprep.subr.mxu0 %v42_v0  ;;  %v8445_v1 = vld [vmem:[%s10349_s0] sm:$0xff]   ;;  %v145_v4 = vld [vmem:[%s10350_s3 + $0x10] sm:$0xff]  ;;  %v144_v5 = vld [vmem:[%s10350_s3 + $0x8] sm:$0xff]  ;;  %v8715_v8 = vshrl.u32 %v233_v7, 7  ;;  %7958 = vmatprep.mubr.msk.f32.mxu1 %vm8635_vm2, %v8634_v27  ;;  %s8637_s12 = smov 96   ;;  %s8638_s13 = smov 64  }
   0x3   :  { %7931 = vmatpush3.msra.mxu0 %v42_v0  ;;  %7932 = vmatprep.mubr.msk.f32.mxu0 %vm57_vm0, %v8445_v1  ;;  %v143_v6 = vld [vmem:[%s10350_s3] sm:$0xff]  ;;  %v8447_v13 = vld [vmem:[%s10351_s1 + $0x8] sm:$0xff]   ;;  %vm1581_vm3 = vcmask 27648   ;;  %vm1764_vm4 = vcmask 1043456   ;;  %vm1760_vm5 = vcmask 31744   ;;  %s8639_s14 = smov 8  }
   0x4   :  { %7935 = vmatprep.subr.mxu0 %v146_v3  ;;  %7933 = vmatmul.mubr.msk.f32.vlgmr.msra.gmra.mxu0 %vm57_vm0, %v8446_v2  ;;  %v8720_v9 = vld [vmem:[%s10352_s8] sm:$0xff]  ;;  %v8723_v10 = vsub.s32 1, %v8715_v8  ;;  %v8775_v28 = vsub.s32 0, %v8715_v8  ;;  %v8825_v51 = vsub.s32 2, %v8715_v8  ;;  %s8640_s15 = smov 16   ;;  %s8641_s22 = smov 24  }
   0x5   :  { %7936 = vmatpush3.msra.mxu0 %v146_v3  ;;  %v8448_v12 = vld [vmem:[%s10351_s1] sm:$0xff]   ;;  %vm3044_vm6 = vcmask 130048   ;;  %vm3049_vm7 = vcmask 195584   ;;  %vm3160_vm8 = vcmask 257024   ;;  %vm3357_vm9 = vcmask 523264  }
   0x6   :  { %7937 = vmatprep.subr.mxu0 %v145_v4  ;;  %v244_v11 = vrot.slane %v8720_v9, %v8723_v10  ;;  %v236_v29 = vrot.slane %v8720_v9, %v8775_v28  ;;  %v256_v52 = vrot.slane %v8720_v9, %v8825_v51  ;;  %vm3603_vm10 = vcmask 1041409  }
   0x7   :  { %7938 = vmatpush3.msra.mxu0 %v145_v4  ;;  %vm3605_vm11 = vcmask 1042434   ;;  %vm3607_vm12 = vcmask 1043459   ;;  %vm3678_vm13 = vcmask 785408  }
   0x8   :  { %7939 = vmatprep.subr.mxu0 %v144_v5  ;;  %246 = vrot.lane.b32.xlu0 %v244_v11, %s8631_s25 }
   0x9   :  { %7940 = vmatpush3.msra.mxu0 %v144_v5 }
   0xa   :  { %7941 = vmatprep.subr.mxu0 %v143_v6 }
   0xb   :  { %7942 = vmatpush3.msra.mxu0 %v143_v6 }
   0xc   :  { %7946 = vmatprep.subr.mxu0 %v8634_v27 }
  0x7a   :  { %v247_v19 = vpop.permute.xlu0 %246 }
  0xc4   :  { %v7934_v14 = vpop.f32.mrf.mxu0 }
  0xc5   :  { %v8736_v17 = vadd.f32 %v8447_v13, %v7934_v14 }
  0xc6   :  { %v128_v15 = vpop.f32.mrf.mxu0 }
  0xc7   :  { %v8734_v16 = vadd.f32 %v8448_v12, %v128_v15 }
  0xc9   :  { %7943 = vmatprep.mubr.msk.f32.mxu0 %vm147_vm1, %v8734_v16 }
  0xca   :  { %7944 = vmatmul.mubr.msk.f32.vlgmr.msra.gmra.mxu0 %vm147_vm1, %v8736_v17 }
  0xcb   :  { %7948 = vmatprep.mubr.msk.f32.mxu0 %vm8635_vm2, %v8634_v27 }
 0x18a   :  { %v8742_v18 = vpop.f32.mrf.mxu0 }
 0x18b   :  { %v8748_v21 = vcombine.high %v8742_v18, %v8742_v18  ;;  %v251_v26 = vadd.f32 %v8742_v18, %v247_v19  ;;  %v239_v33 = vadd.f32 %v8742_v18, %v236_v29 }
 0x18c   :  { %v8744_v20 = vpop.f32.mrf.mxu0 }
 0x18d   :  { %v8752_v22 = vcombine.high %v8744_v20, %v8744_v20  ;;  %v249_v23 = vadd.f32 %v247_v19, %v8744_v20  ;;  %v252_v25 = vadd.f32 %v247_v19, %v8748_v21  ;;  %v240_v30 = vadd.f32 %v236_v29, %v8748_v21 }
 0x18e   :  { %v237_v31 = vadd.f32 %v236_v29, %v8744_v20 }
 0x18f   :  { %297 = vrot.lane.b32.xlu0 %v249_v23, %s8632_s30  ;;  %v250_v24 = vadd.f32 %v247_v19, %v8752_v22  ;;  %v238_v32 = vadd.f32 %v236_v29, %v8752_v22 }
 0x191   :  { %299 = vrot.lane.b32.xlu1 %v250_v24, %s8632_s30 }
 0x193   :  { %303 = vrot.lane.b32.xlu0 %v252_v25, %s8632_s30 }
 0x195   :  { %301 = vrot.lane.b32.xlu1 %v251_v26, %s8632_s30 }
 0x197   :  { %307 = vrot.lane.b32.xlu0 %v250_v24, %s8633_s10 }
 0x199   :  { %305 = vrot.lane.b32.xlu1 %v249_v23, %s8633_s10 }
 0x19b   :  { %311 = vrot.lane.b32.xlu0 %v252_v25, %s8633_s10 }
 0x19d   :  { %309 = vrot.lane.b32.xlu1 %v251_v26, %s8633_s10 }
 0x19f   :  { %315 = vrot.lane.b32.xlu0 %v250_v24, %s8636_s11 }
 0x1a1   :  { %313 = vrot.lane.b32.xlu1 %v249_v23, %s8636_s11 }
 0x1a3   :  { %319 = vrot.lane.b32.xlu0 %v252_v25, %s8636_s11 }
 0x1a5   :  { %317 = vrot.lane.b32.xlu1 %v251_v26, %s8636_s11 }
 0x1a7   :  { %577 = vrot.lane.b32.xlu0 %v252_v25, %s8637_s12 }
 0x1a9   :  { %349 = vrot.lane.b32.xlu1 %v249_v23, %s8637_s12 }
 0x1ab   :  { %275 = vrot.lane.b32.xlu0 %v240_v30, %s8632_s30 }
 0x1ad   :  { %501 = vrot.lane.b32.xlu1 %v251_v26, %s8637_s12 }
 0x1af   :  { %425 = vrot.lane.b32.xlu0 %v250_v24, %s8637_s12 }
 0x1b1   :  { %269 = vrot.lane.b32.xlu1 %v237_v31, %s8632_s30 }
 0x1b3   :  { %271 = vrot.lane.b32.xlu0 %v238_v32, %s8632_s30 }
 0x1b5   :  { %273 = vrot.lane.b32.xlu1 %v239_v33, %s8632_s30 }
 0x1b7   :  { %279 = vrot.lane.b32.xlu0 %v238_v32, %s8633_s10 }
 0x1b9   :  { %277 = vrot.lane.b32.xlu1 %v237_v31, %s8633_s10 }
 0x201   :  { %v298_v34 = vpop.permute.xlu0 %297 }
 0x203   :  { %v300_v35 = vpop.permute.xlu1 %299 }
 0x205   :  { %v304_v36 = vpop.permute.xlu0 %303 }
 0x206   :  { %881 = vrot.lane.b32.xlu0 %v304_v36, %s8637_s12 }
 0x207   :  { %v302_v37 = vpop.permute.xlu1 %301 }
 0x208   :  { %805 = vrot.lane.b32.xlu1 %v302_v37, %s8637_s12 }
 0x209   :  { %v308_v38 = vpop.permute.xlu0 %307 }
 0x20b   :  { %v306_v39 = vpop.permute.xlu1 %305 }
 0x20d   :  { %v312_v40 = vpop.permute.xlu0 %311 }
 0x20e   :  { %1185 = vrot.lane.b32.xlu0 %v312_v40, %s8637_s12 }
 0x20f   :  { %v310_v41 = vpop.permute.xlu1 %309 }
 0x210   :  { %1109 = vrot.lane.b32.xlu1 %v310_v41, %s8637_s12 }
 0x211   :  { %v316_v42 = vpop.permute.xlu0 %315 }
 0x212   :  { %729 = vrot.lane.b32.xlu0 %v300_v35, %s8637_s12 }
 0x213   :  { %v314_v43 = vpop.permute.xlu1 %313 }
 0x214   :  { %653 = vrot.lane.b32.xlu1 %v298_v34, %s8637_s12 }
 0x215   :  { %v320_v44 = vpop.permute.xlu0 %319 }
 0x216   :  { %283 = vrot.lane.b32.xlu0 %v240_v30, %s8633_s10 }
 0x217   :  { %v318_v45 = vpop.permute.xlu1 %317 }
 0x218   :  { %281 = vrot.lane.b32.xlu1 %v239_v33, %s8633_s10 }
 0x219   :  { %v578_v46 = vpop.permute.xlu0 %577 }
 0x21a   :  { %1033 = vrot.lane.b32.xlu0 %v308_v38, %s8637_s12 }
 0x21b   :  { %v350_v47 = vpop.permute.xlu1 %349 }
 0x21c   :  { %957 = vrot.lane.b32.xlu1 %v306_v39, %s8637_s12  ;;  %7947 = vmatpush3.xpose.msk.msra.mxu0 %vm57_vm0, %v350_v47 }
 0x21d   :  { %v276_v48 = vpop.permute.xlu0 %275  ;;  %7951 = vmatprep.subr.mxu0 %v8634_v27 }
 0x21e   :  { %287 = vrot.lane.b32.xlu0 %v238_v32, %s8636_s11 }
 0x21f   :  { %7949 = vmatmul.mubr.msk.f32.vlgmr.msra.gmra.mxu0 %vm57_vm0, %v237_v31  ;;  %v502_v49 = vpop.permute.xlu1 %501 }
 0x220   :  { %1261 = vrot.lane.b32.xlu1 %v314_v43, %s8637_s12  ;;  %7957 = vmatpush3.xpose.msk.msra.mxu1 %vm57_vm0, %v502_v49 }
 0x221   :  { %v426_v50 = vpop.permute.xlu0 %425  ;;  %7953 = vmatprep.mubr.msk.f32.mxu0 %vm8635_vm2, %v8634_v27  ;;  %7966 = vmatprep.subr.mxu1 %v8634_v27 }
 0x222   :  { %7952 = vmatpush3.xpose.msk.msra.mxu0 %vm57_vm0, %v426_v50  ;;  %1337 = vrot.lane.b32.xlu0 %v316_v42, %s8637_s12 }
 0x223   :  { %7959 = vmatmul.mubr.msk.f32.vlgmr.msra.gmra.mxu1 %vm57_vm0, %v239_v33  ;;  %7961 = vmatprep.subr.mxu0 %v8634_v27  ;;  %v270_v53 = vpop.permute.xlu1 %269 }
 0x224   :  { %285 = vrot.lane.b32.xlu1 %v237_v31, %s8636_s11  ;;  %7968 = vmatprep.mubr.msk.f32.mxu1 %vm8635_vm2, %v8634_v27 }
 0x225   :  { %7954 = vmatmul.mubr.msk.f32.vlgmr.msra.gmra.mxu0 %vm57_vm0, %v238_v32  ;;  %v272_v54 = vpop.permute.xlu0 %271 }
 0x226   :  { %1489 = vrot.lane.b32.xlu0 %v320_v44, %s8637_s12  ;;  %7962 = vmatpush3.xpose.msk.msra.mxu0 %vm57_vm0, %v578_v46 }
 0x227   :  { %7963 = vmatprep.mubr.msk.f32.mxu0 %vm8635_vm2, %v8634_v27  ;;  %7971 = vmatprep.subr.mxu0 %v8634_v27  ;;  %v274_v55 = vpop.permute.xlu1 %273 }
 0x228   :  { %1413 = vrot.lane.b32.xlu1 %v318_v45, %s8637_s12 }
 0x229   :  { %7964 = vmatmul.mubr.msk.f32.vlgmr.msra.gmra.mxu0 %vm57_vm0, %v240_v30  ;;  %v280_v56 = vpop.permute.xlu0 %279 }
 0x22a   :  { %291 = vrot.lane.b32.xlu0 %v240_v30, %s8636_s11  ;;  %7973 = vmatprep.mubr.msk.f32.mxu0 %vm8635_vm2, %v8634_v27 }
 0x22b   :  { %v278_v57 = vpop.permute.xlu1 %277 }
 0x22c   :  { %289 = vrot.lane.b32.xlu1 %v239_v33, %s8636_s11 }
 0x22e   :  { %258 = vrot.lane.b32.xlu0 %v256_v52, %s8638_s13 }
 0x278   :  { %v882_v58 = vpop.permute.xlu0 %881 }
 0x27a   :  { %v806_v59 = vpop.permute.xlu1 %805 }
 0x280   :  { %v1186_v60 = vpop.permute.xlu0 %1185 }
 0x282   :  { %v1110_v61 = vpop.permute.xlu1 %1109 }
 0x284   :  { %v730_v62 = vpop.permute.xlu0 %729 }
 0x285   :  { %7972 = vmatpush3.xpose.msk.msra.mxu0 %vm57_vm0, %v730_v62 }
 0x286   :  { %v654_v63 = vpop.permute.xlu1 %653  ;;  %7981 = vmatprep.subr.mxu0 %v8634_v27 }
 0x287   :  { %7967 = vmatpush3.xpose.msk.msra.mxu1 %vm57_vm0, %v654_v63 }
 0x288   :  { %v284_v0 = vpop.permute.xlu0 %283  ;;  %7974 = vmatmul.mubr.msk.f32.vlgmr.msra.gmra.mxu0 %vm57_vm0, %v272_v54  ;;  %7976 = vmatprep.subr.mxu1 %v8634_v27 }
 0x289   :  { %7982 = vmatpush3.xpose.msk.msra.mxu0 %vm57_vm0, %v882_v58  ;;  %7983 = vmatprep.mubr.msk.f32.mxu0 %vm8635_vm2, %v8634_v27 }
 0x28a   :  { %7969 = vmatmul.mubr.msk.f32.vlgmr.msra.gmra.mxu1 %vm57_vm0, %v270_v53  ;;  %v282_v1 = vpop.permute.xlu1 %281  ;;  %7991 = vmatprep.subr.mxu0 %v8634_v27 }
 0x28b   :  { %7977 = vmatpush3.xpose.msk.msra.mxu1 %vm57_vm0, %v806_v59  ;;  %7978 = vmatprep.mubr.msk.f32.mxu1 %vm8635_vm2, %v8634_v27 }
 0x28c   :  { %v1034_v2 = vpop.permute.xlu0 %1033  ;;  %7984 = vmatmul.mubr.msk.f32.vlgmr.msra.gmra.mxu0 %vm57_vm0, %v276_v48  ;;  %7986 = vmatprep.subr.mxu1 %v8634_v27 }
 0x28d   :  { %7992 = vmatpush3.xpose.msk.msra.mxu0 %vm57_vm0, %v1034_v2  ;;  %7993 = vmatprep.mubr.msk.f32.mxu0 %vm8635_vm2, %v8634_v27 }
 0x28e   :  { %7979 = vmatmul.mubr.msk.f32.vlgmr.msra.gmra.mxu1 %vm57_vm0, %v274_v55  ;;  %v958_v3 = vpop.permute.xlu1 %957  ;;  %8001 = vmatprep.subr.mxu0 %v8634_v27 }
 0x28f   :  { %7987 = vmatpush3.xpose.msk.msra.mxu1 %vm57_vm0, %v958_v3  ;;  %7988 = vmatprep.mubr.msk.f32.mxu1 %vm8635_vm2, %v8634_v27 }
 0x290   :  { %v288_v4 = vpop.permute.xlu0 %287  ;;  %7994 = vmatmul.mubr.msk.f32.vlgmr.msra.gmra.mxu0 %vm57_vm0, %v280_v56  ;;  %7996 = vmatprep.subr.mxu1 %v8634_v27 }
 0x291   :  { %8002 = vmatpush3.xpose.msk.msra.mxu0 %vm57_vm0, %v1186_v60  ;;  %8003 = vmatprep.mubr.msk.f32.mxu0 %vm8635_vm2, %v8634_v27 }
 0x292   :  { %7989 = vmatmul.mubr.msk.f32.vlgmr.msra.gmra.mxu1 %vm57_vm0, %v278_v57  ;;  %v1262_v5 = vpop.permute.xlu1 %1261  ;;  %8011 = vmatprep.subr.mxu0 %v8634_v27 }
 0x293   :  { %7997 = vmatpush3.xpose.msk.msra.mxu1 %vm57_vm0, %v1110_v61  ;;  %7998 = vmatprep.mubr.msk.f32.mxu1 %vm8635_vm2, %v8634_v27 }
 0x294   :  { %v1338_v6 = vpop.permute.xlu0 %1337  ;;  %8004 = vmatmul.mubr.msk.f32.vlgmr.msra.gmra.mxu0 %vm57_vm0, %v284_v0  ;;  %8006 = vmatprep.subr.mxu1 %v8634_v27 }
 0x295   :  { %8012 = vmatpush3.xpose.msk.msra.mxu0 %vm57_vm0, %v1338_v6  ;;  %8013 = vmatprep.mubr.msk.f32.mxu0 %vm8635_vm2, %v8634_v27 }
 0x296   :  { %7999 = vmatmul.mubr.msk.f32.vlgmr.msra.gmra.mxu1 %vm57_vm0, %v282_v1  ;;  %v286_v7 = vpop.permute.xlu1 %285  ;;  %8021 = vmatprep.subr.mxu0 %v8634_v27 }
 0x297   :  { %8007 = vmatpush3.xpose.msk.msra.mxu1 %vm57_vm0, %v1262_v5  ;;  %8008 = vmatprep.mubr.msk.f32.mxu1 %vm8635_vm2, %v8634_v27 }
 0x298   :  { %v1490_v9 = vpop.permute.xlu0 %1489  ;;  %8014 = vmatmul.mubr.msk.f32.vlgmr.msra.gmra.mxu0 %vm57_vm0, %v288_v4  ;;  %8016 = vmatprep.subr.mxu1 %v8634_v27 }
 0x299   :  { %8022 = vmatpush3.xpose.msk.msra.mxu0 %vm57_vm0, %v1490_v9  ;;  %8023 = vmatprep.mubr.msk.f32.mxu0 %vm8635_vm2, %v8634_v27 }
 0x29a   :  { %8009 = vmatmul.mubr.msk.f32.vlgmr.msra.gmra.mxu1 %vm57_vm0, %v286_v7  ;;  %v1414_v11 = vpop.permute.xlu1 %1413  ;;  %8031 = vmatprep.subr.mxu0 %v8634_v27 }
 0x29b   :  { %8017 = vmatpush3.xpose.msk.msra.mxu1 %vm57_vm0, %v1414_v11  ;;  %8018 = vmatprep.mubr.msk.f32.mxu1 %vm8635_vm2, %v8634_v27 }
 0x29c   :  { %v292_v12 = vpop.permute.xlu0 %291  ;;  %8026 = vmatprep.subr.mxu1 %v8634_v27 }
 0x29d   :  { %8024 = vmatmul.mubr.msk.f32.vlgmr.msra.gmra.mxu0 %vm57_vm0, %v292_v12 }
 0x29e   :  { %v290_v13 = vpop.permute.xlu1 %289  ;;  %8033 = vmatprep.mubr.msk.f32.mxu0 %vm8635_vm2, %v8634_v27 }
 0x29f   :  { %8019 = vmatmul.mubr.msk.f32.vlgmr.msra.gmra.mxu1 %vm57_vm0, %v290_v13 }
 0x2a0   :  { %v259_v14 = vpop.permute.xlu0 %258  ;;  %8028 = vmatprep.mubr.msk.f32.mxu1 %vm8635_vm2, %v8634_v27 }
 0x2a1   :  { %v262_v15 = vadd.f32 %v259_v14, %v8752_v22  ;;  %v261_v19 = vadd.f32 %v259_v14, %v8744_v20  ;;  %v263_v23 = vadd.f32 %v8742_v18, %v259_v14  ;;  %v264_v24 = vadd.f32 %v259_v14, %v8748_v21 }
 0x2a3   :  { %327 = vrot.lane.b32.xlu0 %v262_v15, %s8632_s30  ;;  %325 = vrot.lane.b32.xlu1 %v261_v19, %s8632_s30 }
 0x2a7   :  { %337 = vrot.lane.b32.xlu0 %v263_v23, %s8633_s10  ;;  %329 = vrot.lane.b32.xlu1 %v263_v23, %s8632_s30 }
 0x2ab   :  { %341 = vrot.lane.b32.xlu0 %v261_v19, %s8636_s11  ;;  %331 = vrot.lane.b32.xlu1 %v264_v24, %s8632_s30 }
 0x2af   :  { %345 = vrot.lane.b32.xlu0 %v263_v23, %s8636_s11  ;;  %333 = vrot.lane.b32.xlu1 %v261_v19, %s8633_s10 }
 0x2b3   :  { %1758 = vrot.lane.b32.xlu0 %v261_v19, %s8638_s13  ;;  %335 = vrot.lane.b32.xlu1 %v262_v15, %s8633_s10 }
 0x2b7   :  { %1914 = vrot.lane.b32.xlu0 %v263_v23, %s8638_s13  ;;  %339 = vrot.lane.b32.xlu1 %v264_v24, %s8633_s10 }
 0x2bb   :  { %343 = vrot.lane.b32.xlu1 %v262_v15, %s8636_s11 }
 0x2bf   :  { %347 = vrot.lane.b32.xlu1 %v264_v24, %s8636_s11 }
 0x2c3   :  { %1837 = vrot.lane.b32.xlu1 %v262_v15, %s8638_s13 }
 0x2c7   :  { %1991 = vrot.lane.b32.xlu1 %v264_v24, %s8638_s13 }
 0x2df   :  { %v421_v18 = vpop.f32.mrf.mxu0 }
 0x2e0   :  { %v8944_v49 = vmul.f32 0.35355338, %v421_v18 }
 0x2e1   :  { %v7950_v20 = vpop.f32.mrf.mxu0 }
 0x2e2   :  { %v1582_v50 = vsel %vm1581_vm3, %v8944_v49, -inf }
 0x2e3   :  { %v573_v21 = vpop.f32.mrf.mxu1 }
 0x2e4   :  { %v8919_v22 = vmul.f32 0.35355338, %v573_v21 }
 0x2e5   :  { %v497_v25 = vpop.f32.mrf.mxu0  ;;  %v7960_v26 = vpop.f32.mrf.mxu1 }
 0x2e6   :  { %v8921_v29 = vmul.f32 0.35355338, %v497_v25  ;;  %v1588_v30 = vsel %vm1581_vm3, %v8919_v22, -inf }
 0x2e7   :  { %1589 = vmax.xlane.f32.xlu0 %v1588_v30  ;;  %v7955_v31 = vpop.f32.mrf.mxu0 }
 0x2e8   :  { %v1585_v33 = vsel %vm1581_vm3, %v8921_v29, -inf }
 0x2e9   :  { %v649_v32 = vpop.f32.mrf.mxu0 }
 0x2ea   :  { %v8953_v19 = vmul.f32 0.35355338, %v649_v32 }
 0x2eb   :  { %1586 = vmax.xlane.f32.xlu0 %v1585_v33  ;;  %v7965_v34 = vpop.f32.mrf.mxu0 }
 0x2ec   :  { %v1591_v24 = vsel %vm1581_vm3, %v8953_v19, -inf }
 0x315   :  { %v328_v35 = vpop.permute.xlu0 %327  ;;  %v326_v36 = vpop.permute.xlu1 %325 }
 0x316   :  { %2068 = vrot.lane.b32.xlu1 %v326_v36, %s8638_s13 }
 0x319   :  { %v338_v37 = vpop.permute.xlu0 %337  ;;  %v330_v38 = vpop.permute.xlu1 %329 }
 0x31a   :  { %2145 = vrot.lane.b32.xlu1 %v328_v35, %s8638_s13  ;;  %2222 = vrot.lane.b32.xlu0 %v330_v38, %s8638_s13 }
 0x31d   :  { %v342_v39 = vpop.permute.xlu0 %341  ;;  %v332_v40 = vpop.permute.xlu1 %331 }
 0x321   :  { %v8930_v41 = vpop.permute.xlu0 %345  ;;  %v334_v42 = vpop.permute.xlu1 %333 }
 0x325   :  { %v1759_v43 = vpop.permute.xlu0 %1758  ;;  %v8932_v44 = vpop.permute.xlu1 %335 }
 0x326   :  { %8027 = vmatpush3.msk.msra.mxu1 %vm1764_vm4, %v1759_v43 }
 0x327   :  { %8036 = vmatprep.subr.mxu1 %v8634_v27 }
 0x329   :  { %v8936_v45 = vpop.permute.xlu1 %339  ;;  %v8965_v21 = vpop.permute.xlu0 %1914 }
 0x32d   :  { %v8938_v46 = vpop.permute.xlu1 %343 }
 0x331   :  { %v8940_v47 = vpop.permute.xlu1 %347 }
 0x335   :  { %v1838_v48 = vpop.permute.xlu1 %1837 }
 0x336   :  { %8032 = vmatpush3.msk.msra.mxu0 %vm1764_vm4, %v1838_v48 }
 0x337   :  { %8041 = vmatprep.subr.mxu0 %v8634_v27 }
 0x33e   :  { %1583 = vmax.xlane.f32.xlu1 %v1582_v50 }
 0x348   :  { %v801_v52 = vpop.f32.mrf.mxu0 }
 0x349   :  { %v8961_v18 = vmul.f32 0.35355338, %v801_v52 }
 0x34a   :  { %v725_v53 = vpop.f32.mrf.mxu1  ;;  %v7975_v54 = vpop.f32.mrf.mxu0 }
 0x34b   :  { %v8956_v23 = vmul.f32 0.35355338, %v725_v53  ;;  %v1597_v26 = vsel %vm1581_vm3, %v8961_v18, -inf }
 0x34c   :  { %v7970_v55 = vpop.f32.mrf.mxu1  ;;  %v953_v56 = vpop.f32.mrf.mxu0 }
 0x34d   :  { %v1594_v20 = vsel %vm1581_vm3, %v8956_v23, -inf  ;;  %v8972_v31 = vmul.f32 0.35355338, %v953_v56 }
 0x34e   :  { %v877_v57 = vpop.f32.mrf.mxu1  ;;  %v7985_v58 = vpop.f32.mrf.mxu0 }
 0x34f   :  { %2299 = vrot.lane.b32.xlu1 %v332_v40, %s8638_s13  ;;  %v8968_v25 = vmul.f32 0.35355338, %v877_v57  ;;  %v1603_v36 = vsel %vm1581_vm3, %v8972_v31, -inf }
 0x350   :  { %v7980_v59 = vpop.f32.mrf.mxu1  ;;  %v1105_v60 = vpop.f32.mrf.mxu0 }
 0x351   :  { %v1600_v33 = vsel %vm1581_vm3, %v8968_v25, -inf }
 0x352   :  { %v1029_v61 = vpop.f32.mrf.mxu1  ;;  %v7995_v62 = vpop.f32.mrf.mxu0 }
 0x353   :  { %v8977_v34 = vmul.f32 0.35355338, %v1029_v61 }
 0x354   :  { %v7990_v63 = vpop.f32.mrf.mxu1  ;;  %v1257_v0 = vpop.f32.mrf.mxu0 }
 0x355   :  { %v1606_v38 = vsel %vm1581_vm3, %v8977_v34, -inf  ;;  %v8995_v43 = vmul.f32 0.35355338, %v1257_v0 }
 0x356   :  { %v1181_v1 = vpop.f32.mrf.mxu1  ;;  %v8005_v2 = vpop.f32.mrf.mxu0 }
 0x357   :  { %v8949_v3 = vmul.f32 0.35355338, %v1181_v1  ;;  %v1615_v52 = vsel %vm1581_vm3, %v8995_v43, -inf }
 0x358   :  { %v8000_v4 = vpop.f32.mrf.mxu1  ;;  %v1409_v5 = vpop.f32.mrf.mxu0 }
 0x359   :  { %v1612_v6 = vsel %vm1581_vm3, %v8949_v3, -inf  ;;  %v9003_v53 = vmul.f32 0.35355338, %v1409_v5 }
 0x35a   :  { %v1333_v7 = vpop.f32.mrf.mxu1  ;;  %1613 = vmax.xlane.f32.xlu0 %v1612_v6  ;;  %v8015_v9 = vpop.f32.mrf.mxu0 }
 0x35b   :  { %v8999_v50 = vmul.f32 0.35355338, %v1333_v7  ;;  %v1621_v57 = vsel %vm1581_vm3, %v9003_v53, -inf }
 0x35c   :  { %v8010_v11 = vpop.f32.mrf.mxu1 }
 0x35d   :  { %v1561_v12 = vpop.f32.mrf.mxu0  ;;  %v1618_v55 = vsel %vm1581_vm3, %v8999_v50, -inf }
 0x35f   :  { %v1485_v13 = vpop.f32.mrf.mxu1  ;;  %v8025_v14 = vpop.f32.mrf.mxu0 }
 0x361   :  { %v8020_v15 = vpop.f32.mrf.mxu1 }
 0x370   :  { %2376 = vrot.lane.b32.xlu0 %v334_v42, %s8638_s13  ;;  %v1590_v30 = vpop.xlane.xlu0 %1589  ;;  %v8993_v42 = vpop.permute.xlu1 %1991 }
 0x371   :  { %v1632_v32 = vsub.f32 %v8919_v22, %v1590_v30 }
 0x373   :  { %1592 = vmax.xlane.f32.xlu1 %v1591_v24  ;;  %v1650_v35 = vmul.f32 1.442695, %v1632_v32 }
 0x374   :  { %2530 = vrot.lane.b32.xlu0 %v338_v37, %s8638_s13  ;;  %v8981_v37 = vmul.f32 0.35355338, %v1105_v60  ;;  %v9014_v60 = vmul.f32 0.35355338, %v1561_v12 }
 0x375   :  { %8453 = vpow2.f32 %v1650_v35 }
 0x376   :  { %v1609_v22 = vsel %vm1581_vm3, %v8981_v37, -inf  ;;  %v1627_v62 = vsel %vm1581_vm3, %v9014_v60, -inf }
 0x377   :  { %1595 = vmax.xlane.f32.xlu1 %v1594_v20 }
 0x378   :  { %2684 = vrot.lane.b32.xlu0 %v342_v39, %s8638_s13 }
 0x37b   :  { %1598 = vmax.xlane.f32.xlu1 %v1597_v26 }
 0x37f   :  { %1601 = vmax.xlane.f32.xlu1 %v1600_v33 }
 0x382   :  { %v8987_v39 = vpop.eup %8453 }
 0x383   :  { %1604 = vmax.xlane.f32.xlu1 %v1603_v36  ;;  %v1684_v40 = vsel %vm1581_vm3, %v8987_v39, 0.0 }
 0x387   :  { %1607 = vmax.xlane.f32.xlu1 %v1606_v38 }
 0x388   :  { %v8997_v48 = vpop.permute.xlu1 %2068 }
 0x38b   :  { %1610 = vmax.xlane.f32.xlu1 %v1609_v22 }
 0x38c   :  { %v9005_v54 = vpop.permute.xlu1 %2145 }
 0x397   :  { %1685 = vadd.xlane.f32.xlu0 %v1684_v40 }
 0x39c   :  { %2453 = vrot.lane.b32.xlu1 %v8932_v44, %s8638_s13  ;;  %v9009_v44 = vmul.f32 0.35355338, %v1485_v13 }
 0x39e   :  { %v1624_v61 = vsel %vm1581_vm3, %v9009_v44, -inf }
 0x3c0   :  { %1616 = vmax.xlane.f32.xlu1 %v1615_v52 }
 0x3c4   :  { %1619 = vmax.xlane.f32.xlu1 %v1618_v55 }
 0x3c7   :  { %v1584_v56 = vpop.xlane.xlu1 %1583 }
 0x3c8   :  { %v1630_v58 = vsub.f32 %v8944_v49, %v1584_v56  ;;  %1622 = vmax.xlane.f32.xlu1 %v1621_v57  ;;  %v1587_v49 = vpop.xlane.xlu0 %1586 }
 0x3c9   :  { %v1631_v1 = vsub.f32 %v8921_v29, %v1587_v49 }
 0x3ca   :  { %v1646_v59 = vmul.f32 1.442695, %v1630_v58 }
 0x3cb   :  { %v1648_v2 = vmul.f32 1.442695, %v1631_v1  ;;  %v9029_v4 = vpop.permute.xlu1 %2299 }
 0x3cc   :  { %8455 = vpow2.f32 %v1646_v59  ;;  %1625 = vmax.xlane.f32.xlu1 %v1624_v61  ;;  %v9036_v14 = vpop.permute.xlu0 %2222 }
 0x3cd   :  { %8457 = vpow2.f32 %v1648_v2 }
 0x3d0   :  { %1628 = vmax.xlane.f32.xlu1 %v1627_v62 }
 0x3d9   :  { %v9020_v63 = vpop.eup %8455 }
 0x3da   :  { %v1678_v0 = vsel %vm1581_vm3, %v9020_v63, 0.0  ;;  %v9033_v13 = vpop.eup %8457 }
 0x3db   :  { %1679 = vadd.xlane.f32.xlu0 %v1678_v0  ;;  %v1681_v24 = vsel %vm1581_vm3, %v9033_v13, 0.0 }
 0x3e1   :  { %2607 = vrot.lane.b32.xlu1 %v8936_v45, %s8638_s13 }
 0x3e5   :  { %2761 = vrot.lane.b32.xlu1 %v8938_v46, %s8638_s13 }
 0x3fc   :  { %v1593_v5 = vpop.xlane.xlu1 %1592 }
 0x3fd   :  { %v1633_v6 = vsub.f32 %v8953_v19, %v1593_v5 }
 0x3ff   :  { %v1652_v7 = vmul.f32 1.442695, %v1633_v6 }
 0x400   :  { %v1596_v9 = vpop.xlane.xlu1 %1595 }
 0x401   :  { %8459 = vpow2.f32 %v1652_v7  ;;  %v1634_v11 = vsub.f32 %v8956_v23, %v1596_v9  ;;  %v1614_v23 = vpop.xlane.xlu0 %1613 }
 0x403   :  { %v1654_v12 = vmul.f32 1.442695, %v1634_v11 }
 0x404   :  { %v1599_v45 = vpop.xlane.xlu1 %1598 }
 0x405   :  { %8461 = vpow2.f32 %v1654_v12  ;;  %v1635_v46 = vsub.f32 %v8961_v18, %v1599_v45  ;;  %v1640_v18 = vsub.f32 %v8949_v3, %v1614_v23  ;;  %v9081_v45 = vpop.permute.xlu0 %2376 }
 0x407   :  { %v1656_v29 = vmul.f32 1.442695, %v1635_v46  ;;  %v1666_v22 = vmul.f32 1.442695, %v1640_v18 }
 0x408   :  { %v1602_v15 = vpop.xlane.xlu1 %1601 }
 0x409   :  { %8463 = vpow2.f32 %v1656_v29  ;;  %v1636_v19 = vsub.f32 %v8968_v25, %v1602_v15  ;;  %1682 = vadd.xlane.f32.xlu1 %v1681_v24 }
 0x40b   :  { %v1658_v20 = vmul.f32 1.442695, %v1636_v19 }
 0x40c   :  { %v1605_v26 = vpop.xlane.xlu1 %1604 }
 0x40d   :  { %8465 = vpow2.f32 %v1658_v20  ;;  %v1637_v30 = vsub.f32 %v8972_v31, %v1605_v26  ;;  %v9084_v20 = vpop.permute.xlu0 %2530 }
 0x40e   :  { %v9042_v32 = vpop.eup %8459 }
 0x40f   :  { %v1660_v33 = vmul.f32 1.442695, %v1637_v30  ;;  %v1687_v35 = vsel %vm1581_vm3, %v9042_v32, 0.0 }
 0x410   :  { %1688 = vadd.xlane.f32.xlu0 %v1687_v35  ;;  %v1608_v36 = vpop.xlane.xlu1 %1607 }
 0x411   :  { %8467 = vpow2.f32 %v1660_v33  ;;  %v1638_v25 = vsub.f32 %v8977_v34, %v1608_v36  ;;  %v9090_v18 = vpop.permute.xlu0 %2684 }
 0x412   :  { %v9048_v38 = vpop.eup %8461 }
 0x413   :  { %v1662_v40 = vmul.f32 1.442695, %v1638_v25  ;;  %v1690_v31 = vsel %vm1581_vm3, %v9048_v38, 0.0 }
 0x414   :  { %1691 = vadd.xlane.f32.xlu0 %v1690_v31  ;;  %v1611_v52 = vpop.xlane.xlu1 %1610 }
 0x415   :  { %8469 = vpow2.f32 %v1662_v40  ;;  %v1639_v3 = vsub.f32 %v8981_v37, %v1611_v52 }
 0x416   :  { %v9053_v55 = vpop.eup %8463  ;;  %8471 = vpow2.f32 %v1666_v22 }
 0x417   :  { %v1664_v56 = vmul.f32 1.442695, %v1639_v3  ;;  %v1693_v57 = vsel %vm1581_vm3, %v9053_v55, 0.0 }
 0x418   :  { %1694 = vadd.xlane.f32.xlu1 %v1693_v57  ;;  %v9077_v5 = vpop.permute.xlu1 %2453 }
 0x419   :  { %8473 = vpow2.f32 %v1664_v56 }
 0x41a   :  { %v9057_v34 = vpop.eup %8465 }
 0x41b   :  { %v1696_v58 = vsel %vm1581_vm3, %v9057_v34, 0.0 }
 0x41c   :  { %1697 = vadd.xlane.f32.xlu0 %v1696_v58 }
 0x41e   :  { %v9061_v59 = vpop.eup %8467 }
 0x41f   :  { %v1699_v37 = vsel %vm1581_vm3, %v9061_v59, 0.0 }
 0x420   :  { %1700 = vadd.xlane.f32.xlu1 %v1699_v37  ;;  %v1686_v36 = vpop.xlane.xlu0 %1685 }
 0x422   :  { %v9065_v61 = vpop.eup %8469 }
 0x423   :  { %v1702_v62 = vsel %vm1581_vm3, %v9065_v61, 0.0  ;;  %v9069_v0 = vpop.eup %8471 }
 0x424   :  { %1703 = vadd.xlane.f32.xlu0 %v1702_v62  ;;  %v1708_v1 = vsel %vm1581_vm3, %v9069_v0, 0.0 }
 0x426   :  { %v9071_v49 = vpop.eup %8473 }
 0x427   :  { %v1705_v2 = vsel %vm1581_vm3, %v9071_v49, 0.0 }
 0x428   :  { %1709 = vadd.xlane.f32.xlu0 %v1708_v1  ;;  %1706 = vadd.xlane.f32.xlu1 %v1705_v2 }
 0x449   :  { %v1617_v6 = vpop.xlane.xlu1 %1616 }
 0x44a   :  { %v1641_v7 = vsub.f32 %v8995_v43, %v1617_v6 }
 0x44c   :  { %v1668_v9 = vmul.f32 1.442695, %v1641_v7 }
 0x44d   :  { %v1620_v11 = vpop.xlane.xlu1 %1619 }
 0x44e   :  { %8475 = vpow2.f32 %v1668_v9  ;;  %v1642_v12 = vsub.f32 %v8999_v50, %v1620_v11 }
 0x450   :  { %v1670_v46 = vmul.f32 1.442695, %v1642_v12 }
 0x451   :  { %v1623_v29 = vpop.xlane.xlu1 %1622 }
 0x452   :  { %8477 = vpow2.f32 %v1670_v46  ;;  %v1643_v15 = vsub.f32 %v9003_v53, %v1623_v29 }
 0x454   :  { %v1672_v24 = vmul.f32 1.442695, %v1643_v15 }
 0x455   :  { %v1626_v19 = vpop.xlane.xlu1 %1625 }
 0x456   :  { %8479 = vpow2.f32 %v1672_v24  ;;  %v1644_v23 = vsub.f32 %v9009_v44, %v1626_v19 }
 0x458   :  { %v1674_v43 = vmul.f32 1.442695, %v1644_v23 }
 0x459   :  { %v1629_v26 = vpop.xlane.xlu1 %1628 }
 0x45a   :  { %8481 = vpow2.f32 %v1674_v43  ;;  %v1645_v30 = vsub.f32 %v9014_v60, %v1629_v26 }
 0x45b   :  { %v9088_v50 = vpop.eup %8475 }
 0x45c   :  { %v1676_v33 = vmul.f32 1.442695, %v1645_v30  ;;  %v1711_v53 = vsel %vm1581_vm3, %v9088_v50, 0.0 }
 0x45d   :  { %1712 = vadd.xlane.f32.xlu1 %v1711_v53 }
 0x45e   :  { %8483 = vpow2.f32 %v1676_v33 }
 0x45f   :  { %v9094_v35 = vpop.eup %8477 }
 0x460   :  { %v1714_v44 = vsel %vm1581_vm3, %v9094_v35, 0.0 }
 0x461   :  { %1715 = vadd.xlane.f32.xlu0 %v1714_v44 }
 0x463   :  { %v9098_v25 = vpop.eup %8479 }
 0x464   :  { %v1680_v60 = vpop.xlane.xlu0 %1679  ;;  %v1717_v22 = vsel %vm1581_vm3, %v9098_v25, 0.0 }
 0x465   :  { %8485 = vrcp.f32 %v1680_v60  ;;  %1718 = vadd.xlane.f32.xlu1 %v1717_v22 }
 0x466   :  { %8487 = vrcp.f32 %v1686_v36 }
 0x467   :  { %v9102_v40 = vpop.eup %8481 }
 0x468   :  { %v1720_v31 = vsel %vm1581_vm3, %v9102_v40, 0.0 }
 0x469   :  { %1721 = vadd.xlane.f32.xlu1 %v1720_v31 }
 0x46b   :  { %v9106_v52 = vpop.eup %8483 }
 0x46c   :  { %v1723_v3 = vsel %vm1581_vm3, %v9106_v52, 0.0 }
 0x46d   :  { %1724 = vadd.xlane.f32.xlu0 %v1723_v3 }
 0x472   :  { %v8486_v56 = vpop.eup %8485 }
 0x473   :  { %v1727_v57 = vmul.f32 %v8486_v56, %v9020_v63  ;;  %v8488_v58 = vpop.eup %8487 }
 0x474   :  { %v1731_v37 = vmul.f32 %v8488_v58, %v8987_v39 }
 0x475   :  { %8029 = vmatmul.mubr.msk.f32.vlgmr.msra.gmra.mxu1 %vm1760_vm5, %v1727_v57 }
 0x476   :  { %8037 = vmatpush3.msk.msra.mxu1 %vm1764_vm4, %v8965_v21  ;;  %8038 = vmatprep.mubr.msk.f32.mxu1 %vm8635_vm2, %v8634_v27  ;;  %v9128_v21 = vpop.permute.xlu1 %2607 }
 0x477   :  { %8046 = vmatprep.subr.mxu1 %v8634_v27 }
 0x479   :  { %8039 = vmatmul.mubr.msk.f32.vlgmr.msra.gmra.mxu1 %vm1760_vm5, %v1731_v37 }
 0x47a   :  { %8047 = vmatpush3.msk.msra.mxu1 %vm1764_vm4, %v8997_v48  ;;  %2915 = vrot.lane.b32.xlu1 %v8940_v47, %s8638_s13  ;;  %v9130_v63 = vpop.permute.xlu1 %2761 }
 0x47b   :  { %8048 = vmatprep.mubr.msk.f32.mxu1 %vm8635_vm2, %v8634_v27  ;;  %8056 = vmatprep.subr.mxu1 %v8634_v27 }
 0x483   :  { %2838 = vrot.lane.b32.xlu0 %v8930_v41, %s8638_s13 }
 0x492   :  { %v1683_v39 = vpop.xlane.xlu1 %1682 }
 0x493   :  { %8489 = vrcp.f32 %v1683_v39 }
 0x499   :  { %v1689_v62 = vpop.xlane.xlu0 %1688 }
 0x49a   :  { %8491 = vrcp.f32 %v1689_v62 }
 0x49d   :  { %v1692_v48 = vpop.xlane.xlu0 %1691 }
 0x49e   :  { %8493 = vrcp.f32 %v1692_v48 }
 0x4a0   :  { %v8490_v1 = vpop.eup %8489 }
 0x4a1   :  { %v1695_v47 = vpop.xlane.xlu1 %1694  ;;  %v1729_v2 = vmul.f32 %v8490_v1, %v9033_v13 }
 0x4a2   :  { %8495 = vrcp.f32 %v1695_v47 }
 0x4a3   :  { %8034 = vmatmul.mubr.msk.f32.vlgmr.msra.gmra.mxu0 %vm1760_vm5, %v1729_v2 }
 0x4a4   :  { %8042 = vmatpush3.msk.msra.mxu0 %vm1764_vm4, %v8993_v42  ;;  %8043 = vmatprep.mubr.msk.f32.mxu0 %vm8635_vm2, %v8634_v27 }
 0x4a5   :  { %v1698_v41 = vpop.xlane.xlu0 %1697  ;;  %8051 = vmatprep.subr.mxu0 %v8634_v27 }
 0x4a6   :  { %8497 = vrcp.f32 %v1698_v41 }
 0x4a7   :  { %v8492_v6 = vpop.eup %8491 }
 0x4a8   :  { %v1733_v7 = vmul.f32 %v8492_v6, %v9042_v32 }
 0x4a9   :  { %v1701_v9 = vpop.xlane.xlu1 %1700 }
 0x4aa   :  { %8499 = vrcp.f32 %v1701_v9  ;;  %8044 = vmatmul.mubr.msk.f32.vlgmr.msra.gmra.mxu0 %vm1760_vm5, %v1733_v7  ;;  %v3057_v9 = vld [vmem:[%s10353_s4 + $0x18] sm:$0xff] }
 0x4ab   :  { %v8494_v13 = vpop.eup %8493  ;;  %8052 = vmatpush3.msk.msra.mxu0 %vm1764_vm4, %v9005_v54  ;;  %8053 = vmatprep.mubr.msk.f32.mxu0 %vm8635_vm2, %v8634_v27 }
 0x4ac   :  { %v1735_v42 = vmul.f32 %v8494_v13, %v9048_v38  ;;  %8061 = vmatprep.subr.mxu0 %v8634_v27 }
 0x4ad   :  { %v1704_v11 = vpop.xlane.xlu0 %1703 }
 0x4ae   :  { %8501 = vrcp.f32 %v1704_v11  ;;  %8049 = vmatmul.mubr.msk.f32.vlgmr.msra.gmra.mxu1 %vm1760_vm5, %v1735_v42  ;;  %v3056_v42 = vld [vmem:[%s10353_s4 + $0x10] sm:$0xff]  ;;  %v3055_v11 = vld [vmem:[%s10353_s4 + $0x8] sm:$0xff] }
 0x4af   :  { %v8496_v32 = vpop.eup %8495  ;;  %8057 = vmatpush3.msk.msra.mxu1 %vm1764_vm4, %v9036_v14  ;;  %8058 = vmatprep.mubr.msk.f32.mxu1 %vm8635_vm2, %v8634_v27 }
 0x4b0   :  { %v1737_v54 = vmul.f32 %v8496_v32, %v9053_v55  ;;  %8066 = vmatprep.subr.mxu1 %v8634_v27 }
 0x4b1   :  { %v1710_v12 = vpop.xlane.xlu0 %1709  ;;  %v1707_v46 = vpop.xlane.xlu1 %1706 }
 0x4b2   :  { %8503 = vrcp.f32 %v1710_v12  ;;  %8054 = vmatmul.mubr.msk.f32.vlgmr.msra.gmra.mxu0 %vm1760_vm5, %v1737_v54  ;;  %v3054_v12 = vld [vmem:[%s10353_s4] sm:$0xff] }
 0x4b3   :  { %v8498_v38 = vpop.eup %8497  ;;  %8505 = vrcp.f32 %v1707_v46  ;;  %8062 = vmatpush3.msk.msra.mxu0 %vm1764_vm4, %v9029_v4  ;;  %8063 = vmatprep.mubr.msk.f32.mxu0 %vm8635_vm2, %v8634_v27 }
 0x4b4   :  { %v1739_v14 = vmul.f32 %v8498_v38, %v9057_v34  ;;  %8071 = vmatprep.subr.mxu0 %v8634_v27 }
 0x4b6   :  { %8059 = vmatmul.mubr.msk.f32.vlgmr.msra.gmra.mxu1 %vm1760_vm5, %v1739_v14 }
 0x4b7   :  { %v8500_v55 = vpop.eup %8499  ;;  %8067 = vmatpush3.msk.msra.mxu1 %vm1764_vm4, %v9081_v45  ;;  %8068 = vmatprep.mubr.msk.f32.mxu1 %vm8635_vm2, %v8634_v27 }
 0x4b8   :  { %v1741_v29 = vmul.f32 %v8500_v55, %v9061_v59  ;;  %8076 = vmatprep.subr.mxu1 %v8634_v27 }
 0x4ba   :  { %8064 = vmatmul.mubr.msk.f32.vlgmr.msra.gmra.mxu0 %vm1760_vm5, %v1741_v29 }
 0x4bb   :  { %v8502_v4 = vpop.eup %8501  ;;  %8072 = vmatpush3.msk.msra.mxu0 %vm1764_vm4, %v9077_v5  ;;  %8073 = vmatprep.mubr.msk.f32.mxu0 %vm8635_vm2, %v8634_v27 }
 0x4bc   :  { %v1743_v34 = vmul.f32 %v8502_v4, %v9065_v61  ;;  %8081 = vmatprep.subr.mxu0 %v8634_v27 }
 0x4be   :  { %8069 = vmatmul.mubr.msk.f32.vlgmr.msra.gmra.mxu1 %vm1760_vm5, %v1743_v34 }
 0x4bf   :  { %v8504_v45 = vpop.eup %8503  ;;  %8077 = vmatpush3.msk.msra.mxu1 %vm1764_vm4, %v9084_v20  ;;  %8078 = vmatprep.mubr.msk.f32.mxu1 %vm8635_vm2, %v8634_v27 }
 0x4c0   :  { %v8506_v59 = vpop.eup %8505  ;;  %8086 = vmatprep.subr.mxu1 %v8634_v27  ;;  %v1747_v5 = vmul.f32 %v8504_v45, %v9069_v0 }
 0x4c1   :  { %v1745_v15 = vmul.f32 %v8506_v59, %v9071_v49 }
 0x4c2   :  { %8079 = vmatmul.mubr.msk.f32.vlgmr.msra.gmra.mxu1 %vm1760_vm5, %v1747_v5 }
 0x4c3   :  { %8074 = vmatmul.mubr.msk.f32.vlgmr.msra.gmra.mxu0 %vm1760_vm5, %v1745_v15  ;;  %8087 = vmatpush3.msk.msra.mxu1 %vm1764_vm4, %v9090_v18 }
 0x4c4   :  { %8082 = vmatpush3.msk.msra.mxu0 %vm1764_vm4, %v9128_v21  ;;  %8083 = vmatprep.mubr.msk.f32.mxu0 %vm8635_vm2, %v8634_v27 }
 0x4c5   :  { %8091 = vmatprep.subr.mxu0 %v8634_v27  ;;  %8088 = vmatprep.mubr.msk.f32.mxu1 %vm8635_vm2, %v8634_v27 }
 0x4c6   :  { %8096 = vmatprep.subr.mxu1 %v8634_v27 }
 0x4e6   :  { %v1713_v61 = vpop.xlane.xlu1 %1712 }
 0x4e7   :  { %8507 = vrcp.f32 %v1713_v61 }
 0x4ea   :  { %v1716_v0 = vpop.xlane.xlu0 %1715 }
 0x4eb   :  { %8509 = vrcp.f32 %v1716_v0 }
 0x4ee   :  { %v1719_v49 = vpop.xlane.xlu1 %1718 }
 0x4ef   :  { %8511 = vrcp.f32 %v1719_v49 }
 0x4f2   :  { %v1722_v24 = vpop.xlane.xlu1 %1721 }
 0x4f3   :  { %8513 = vrcp.f32 %v1722_v24 }
 0x4f4   :  { %v8508_v19 = vpop.eup %8507 }
 0x4f5   :  { %v1749_v20 = vmul.f32 %v8508_v19, %v9088_v50 }
 0x4f6   :  { %v1725_v23 = vpop.xlane.xlu0 %1724  ;;  %v2916_v33 = vpop.permute.xlu1 %2915 }
 0x4f7   :  { %8515 = vrcp.f32 %v1725_v23  ;;  %8084 = vmatmul.mubr.msk.f32.vlgmr.msra.gmra.mxu0 %vm1760_vm5, %v1749_v20 }
 0x4f8   :  { %v8510_v43 = vpop.eup %8509  ;;  %8092 = vmatpush3.msk.msra.mxu0 %vm1764_vm4, %v9130_v63  ;;  %8093 = vmatprep.mubr.msk.f32.mxu0 %vm8635_vm2, %v8634_v27 }
 0x4f9   :  { %v1751_v26 = vmul.f32 %v8510_v43, %v9094_v35  ;;  %8101 = vmatprep.subr.mxu0 %v8634_v27 }
 0x4fa   :  { %v2839_v30 = vpop.permute.xlu0 %2838 }
 0x4fb   :  { %8089 = vmatmul.mubr.msk.f32.vlgmr.msra.gmra.mxu1 %vm1760_vm5, %v1751_v26 }
 0x4fc   :  { %v8512_v18 = vpop.eup %8511  ;;  %8097 = vmatpush3.msk.msra.mxu1 %vm1764_vm4, %v2839_v30  ;;  %8098 = vmatprep.mubr.msk.f32.mxu1 %vm8635_vm2, %v8634_v27 }
 0x4fd   :  { %v1753_v50 = vmul.f32 %v8512_v18, %v9098_v25  ;;  %8106 = vmatprep.subr.mxu1 %v3057_v9 }
 0x4ff   :  { %8094 = vmatmul.mubr.msk.f32.vlgmr.msra.gmra.mxu0 %vm1760_vm5, %v1753_v50 }
 0x500   :  { %v8514_v53 = vpop.eup %8513  ;;  %8102 = vmatpush3.msk.msra.mxu0 %vm1764_vm4, %v2916_v33  ;;  %8103 = vmatprep.mubr.msk.f32.mxu0 %vm8635_vm2, %v8634_v27 }
 0x501   :  { %v1755_v35 = vmul.f32 %v8514_v53, %v9102_v40 }
 0x503   :  { %8099 = vmatmul.mubr.msk.f32.vlgmr.msra.gmra.mxu1 %vm1760_vm5, %v1755_v35 }
 0x504   :  { %v8516_v36 = vpop.eup %8515  ;;  %8107 = vmatpush3.msra.mxu1 %v3057_v9 }
 0x505   :  { %v1757_v44 = vmul.f32 %v8516_v36, %v9106_v52  ;;  %8108 = vmatprep.subr.mxu1 %v3056_v42 }
 0x506   :  { %8109 = vmatpush3.msra.mxu1 %v3056_v42 }
 0x507   :  { %8104 = vmatmul.mubr.msk.f32.vlgmr.msra.gmra.mxu0 %vm1760_vm5, %v1757_v44  ;;  %8110 = vmatprep.subr.mxu1 %v3055_v11 }
 0x508   :  { %8111 = vmatpush3.msra.mxu1 %v3055_v11 }
 0x509   :  { %8112 = vmatprep.subr.mxu1 %v3054_v12 }
 0x50a   :  { %8113 = vmatpush3.msra.mxu1 %v3054_v12 }
 0x535   :  { %v9216_v60 = vpop.f32.mrf.mxu1 }
 0x537   :  { %v8030_v25 = vpop.f32.mrf.mxu1 }
 0x539   :  { %v9218_v22 = vpop.f32.mrf.mxu1 }
 0x53b   :  { %v8040_v31 = vpop.f32.mrf.mxu1 }
 0x563   :  { %v9220_v3 = vpop.f32.mrf.mxu0 }
 0x565   :  { %v8035_v56 = vpop.f32.mrf.mxu0 }
 0x56a   :  { %v9222_v57 = vpop.f32.mrf.mxu0 }
 0x56c   :  { %v8045_v58 = vpop.f32.mrf.mxu0 }
 0x56d   :  { %v9267_v58 = vsub.s32 3, %v8715_v8 }
 0x56e   :  { %v2141_v40 = vpop.f32.mrf.mxu1 }
 0x56f   :  { %2996 = vrot.lane.b32.xlu0 %v2141_v40, %s8639_s14 }
 0x570   :  { %v8050_v37 = vpop.f32.mrf.mxu1 }
 0x572   :  { %v2218_v52 = vpop.f32.mrf.mxu0 }
 0x573   :  { %2998 = vrot.lane.b32.xlu1 %v2218_v52, %s8639_s14 }
 0x574   :  { %v8055_v21 = vpop.f32.mrf.mxu0 }
 0x576   :  { %v2295_v63 = vpop.f32.mrf.mxu1 }
 0x577   :  { %3000 = vrot.lane.b32.xlu0 %v2295_v63, %s8639_s14 }
 0x578   :  { %v8060_v39 = vpop.f32.mrf.mxu1 }
 0x579   :  { %v139_v39 = vcombine.high %v8734_v16, %v8734_v16 }
 0x57a   :  { %v2372_v62 = vpop.f32.mrf.mxu0 }
 0x57b   :  { %3002 = vrot.lane.b32.xlu1 %v2372_v62, %s8639_s14 }
 0x57c   :  { %v8065_v48 = vpop.f32.mrf.mxu0 }
 0x57e   :  { %v2449_v1 = vpop.f32.mrf.mxu1 }
 0x57f   :  { %3012 = vrot.lane.b32.xlu0 %v2449_v1, %s8640_s15 }
 0x580   :  { %v8070_v47 = vpop.f32.mrf.mxu1 }
 0x582   :  { %v2603_v2 = vpop.f32.mrf.mxu1 }
 0x583   :  { %v2526_v41 = vpop.f32.mrf.mxu0  ;;  %3016 = vrot.lane.b32.xlu0 %v2603_v2, %s8640_s15 }
 0x584   :  { %3014 = vrot.lane.b32.xlu1 %v2526_v41, %s8640_s15  ;;  %v8080_v6 = vpop.f32.mrf.mxu1 }
 0x585   :  { %v8075_v7 = vpop.f32.mrf.mxu0  ;;  %v140_v6 = vcombine.high %v8736_v17, %v8736_v17 }
 0x5b7   :  { %v2680_v13 = vpop.f32.mrf.mxu0 }
 0x5b8   :  { %3018 = vrot.lane.b32.xlu1 %v2680_v13, %s8640_s15 }
 0x5b9   :  { %v8085_v32 = vpop.f32.mrf.mxu0 }
 0x5bb   :  { %v2757_v54 = vpop.f32.mrf.mxu1 }
 0x5bc   :  { %3028 = vrot.lane.b32.xlu0 %v2757_v54, %s8641_s22 }
 0x5bd   :  { %v8090_v46 = vpop.f32.mrf.mxu1 }
 0x5bf   :  { %v2834_v38 = vpop.f32.mrf.mxu0 }
 0x5c0   :  { %3030 = vrot.lane.b32.xlu1 %v2834_v38, %s8641_s22 }
 0x5c1   :  { %v8095_v14 = vpop.f32.mrf.mxu0 }
 0x5c3   :  { %v2911_v55 = vpop.f32.mrf.mxu1 }
 0x5c4   :  { %3032 = vrot.lane.b32.xlu0 %v2911_v55, %s8641_s22 }
 0x5c5   :  { %v8100_v29 = vpop.f32.mrf.mxu1 }
 0x5c7   :  { %v2988_v4 = vpop.f32.mrf.mxu0 }
 0x5c8   :  { %3034 = vrot.lane.b32.xlu1 %v2988_v4, %s8641_s22 }
 0x5c9   :  { %v8105_v34 = vpop.f32.mrf.mxu0 }
 0x5e1   :  { %v2997_v45 = vpop.permute.xlu0 %2996 }
 0x5e2   :  { %v3040_v20 = vsel %vm57_vm0, %v9216_v60, %v2997_v45 }
 0x5e5   :  { %v2999_v59 = vpop.permute.xlu1 %2998 }
 0x5e6   :  { %v3041_v23 = vsel %vm57_vm0, %v9220_v3, %v2999_v59 }
 0x5e9   :  { %v3001_v5 = vpop.permute.xlu0 %3000 }
 0x5ea   :  { %v3042_v35 = vsel %vm57_vm0, %v9218_v22, %v3001_v5  ;;  %v9272_v22 = vld [vmem:[%s10352_s8] sm:$0xff] }
 0x5ed   :  { %v3003_v15 = vpop.permute.xlu1 %3002 }
 0x5ee   :  { %v3043_v36 = vsel %vm57_vm0, %v9222_v57, %v3003_v15  ;;  %v3061_v57 = vrot.slane %v9272_v22, %v9267_v58 }
 0x5f0   :  { %v3069_v40 = vcombine.low %v3061_v57, %v3061_v57 }
 0x5f1   :  { %v3013_v61 = vpop.permute.xlu0 %3012 }
 0x5f2   :  { %v3045_v43 = vsel %vm3044_vm6, %v3040_v20, %v3013_v61  ;;  %v3231_v20 = vld [vmem:[%s10354_s5 + $0x8] sm:$0xff] }
 0x5f5   :  { %v3017_v49 = vpop.permute.xlu0 %3016 }
 0x5f6   :  { %v3015_v0 = vpop.permute.xlu1 %3014  ;;  %v3047_v44 = vsel %vm3044_vm6, %v3042_v35, %v3017_v49 }
 0x5f7   :  { %v3046_v26 = vsel %vm3044_vm6, %v3041_v23, %v3015_v0  ;;  %v3230_v23 = vld [vmem:[%s10354_s5] sm:$0xff] }
 0x62a   :  { %v3019_v24 = vpop.permute.xlu1 %3018 }
 0x62b   :  { %v3048_v60 = vsel %vm3044_vm6, %v3043_v36, %v3019_v24  ;;  %v3233_v24 = vld [vmem:[%s10354_s5 + $0x18] sm:$0xff] }
 0x62c   :  { %8117 = vmatprep.subr.mxu0 %v3233_v24 }
 0x62d   :  { %8118 = vmatpush3.msra.mxu0 %v3233_v24 }
 0x62e   :  { %v3029_v19 = vpop.permute.xlu0 %3028 }
 0x62f   :  { %v3050_v18 = vsel %vm3049_vm7, %v3045_v43, %v3029_v19  ;;  %v3232_v19 = vld [vmem:[%s10354_s5 + $0x10] sm:$0xff]  ;;  %v3343_v43 = vld [vmem:[%s10355_s6 + $0x38] sm:$0xff] }
 0x630   :  { %8119 = vmatprep.subr.mxu0 %v3232_v19  ;;  %8128 = vmatprep.subr.mxu1 %v3343_v43 }
 0x631   :  { %8120 = vmatpush3.msra.mxu0 %v3232_v19 }
 0x632   :  { %v3031_v30 = vpop.permute.xlu1 %3030  ;;  %8121 = vmatprep.subr.mxu0 %v3231_v20 }
 0x633   :  { %v3051_v50 = vsel %vm3049_vm7, %v3046_v26, %v3031_v30  ;;  %8122 = vmatpush3.msra.mxu0 %v3231_v20  ;;  %v3342_v26 = vld [vmem:[%s10355_s6 + $0x30] sm:$0xff] }
 0x634   :  { %v3066_v33 = vcombine.low %v3050_v18, %v3051_v50  ;;  %8123 = vmatprep.subr.mxu0 %v3230_v23 }
 0x635   :  { %8124 = vmatpush3.msra.mxu0 %v3230_v23 }
 0x636   :  { %8114 = vmatprep.mubr.msk.f32.mxu1 %vm147_vm1, %v3066_v33  ;;  %v3033_v53 = vpop.permute.xlu0 %3032  ;;  %8147 = vmatprep.subr.mxu0 %v8634_v27 }
 0x637   :  { %v3052_v31 = vsel %vm3049_vm7, %v3047_v44, %v3033_v53 }
 0x63a   :  { %v3035_v25 = vpop.permute.xlu1 %3034 }
 0x63b   :  { %v3053_v3 = vsel %vm3049_vm7, %v3048_v60, %v3035_v25 }
 0x63c   :  { %v3067_v56 = vcombine.low %v3052_v31, %v3053_v3 }
 0x63e   :  { %8115 = vmatmul.mubr.msk.f32.vlgmr.msra.gmra.mxu1 %vm147_vm1, %v3067_v56  ;;  %v9310_v56 = vsub.s32 4, %v8715_v8 }
 0x63f   :  { %8129 = vmatpush3.msra.mxu1 %v3343_v43  ;;  %v7594_v43 = vld [vmem:[%s10348_s2 + $0x8] sm:$0xff] }
 0x640   :  { %8130 = vmatprep.subr.mxu1 %v3342_v26  ;;  %v3217_v57 = vrot.slane %v9272_v22, %v9310_v56 }
 0x641   :  { %8131 = vmatpush3.msra.mxu1 %v3342_v26  ;;  %v8449_v26 = vld [vmem:[%s10349_s0 + $0x10] sm:$0xff]  }
 0x6fe   :  { %v8116_v37 = vpop.f32.mrf.mxu1 }
 0x6ff   :  { %v3147_v21 = vadd.f32 %v8116_v37, %v3069_v40 }
 0x700   :  { %v3141_v52 = vpop.f32.mrf.mxu1 }
 0x701   :  { %v3142_v63 = vadd.f32 %v3141_v52, %v3069_v40  ;;  %v3153_v1 = vcombine.high %v3147_v21, %v3147_v21  ;;  %v3158_v47 = vadd.f32 %v3147_v21, %v8736_v17  ;;  %v3224_v40 = vsub.s32 5, %v8715_v8 }
 0x703   :  { %v3152_v62 = vcombine.high %v3142_v63, %v3142_v63  ;;  %v3156_v48 = vadd.f32 %v3142_v63, %v8734_v16  ;;  %v3167_v9 = vsel %vm3160_vm8, %v3158_v47, 0.0  ;;  %v3159_v13 = vadd.f32 %v3153_v1, %v140_v6 }
 0x705   :  { %v3161_v2 = vsel %vm3160_vm8, %v3156_v48, 0.0  ;;  %v3157_v41 = vadd.f32 %v3152_v62, %v139_v39  ;;  %v3170_v16 = vsel %vm3160_vm8, %v3159_v13, 0.0  ;;  %v3225_v62 = vrot.slane %v9272_v22, %v3224_v40 }
 0x706   :  { %3162 = vadd.xlane.f32.xlu0 %v3161_v2 }
 0x707   :  { %v3164_v7 = vsel %vm3160_vm8, %v3157_v41, 0.0 }
 0x708   :  { %3165 = vadd.xlane.f32.xlu1 %v3164_v7 }
 0x70a   :  { %3168 = vadd.xlane.f32.xlu0 %v3167_v9 }
 0x70e   :  { %3171 = vadd.xlane.f32.xlu0 %v3170_v16 }
 0x78f   :  { %v3163_v42 = vpop.xlane.xlu0 %3162 }
 0x790   :  { %v3174_v11 = vmul.f32 0.03125, %v3163_v42 }
 0x791   :  { %v3166_v32 = vpop.xlane.xlu1 %3165 }
 0x792   :  { %v3178_v54 = vsub.f32 %v3156_v48, %v3174_v11  ;;  %v3175_v12 = vmul.f32 0.03125, %v3166_v32 }
 0x793   :  { %v3169_v46 = vpop.xlane.xlu0 %3168 }
 0x794   :  { %v3179_v38 = vsub.f32 %v3157_v41, %v3175_v12  ;;  %v3176_v14 = vmul.f32 0.03125, %v3169_v46  ;;  %v3182_v55 = vmul.f32 %v3178_v54, %v3178_v54  ;;  %v3340_v12 = vld [vmem:[%s10355_s6 + $0x20] sm:$0xff]  ;;  %v3339_v46 = vld [vmem:[%s10355_s6 + $0x18] sm:$0xff] }
 0x796   :  { %v3180_v17 = vsub.f32 %v3158_v47, %v3176_v14  ;;  %v3186_v29 = vsel %vm3160_vm8, %v3182_v55, 0.0  ;;  %v3183_v4 = vmul.f32 %v3179_v38, %v3179_v38  ;;  %v3337_v14 = vld [vmem:[%s10355_s6 + $0x8] sm:$0xff]  ;;  %v3336_v55 = vld [vmem:[%s10355_s6] sm:$0xff] }
 0x797   :  { %3187 = vadd.xlane.f32.xlu0 %v3186_v29  ;;  %v3172_v34 = vpop.xlane.xlu0 %3171 }
 0x798   :  { %v3177_v45 = vmul.f32 0.03125, %v3172_v34  ;;  %v3189_v59 = vsel %vm3160_vm8, %v3183_v4, 0.0  ;;  %v3184_v5 = vmul.f32 %v3180_v17, %v3180_v17 }
 0x799   :  { %3190 = vadd.xlane.f32.xlu1 %v3189_v59 }
 0x79a   :  { %v3181_v15 = vsub.f32 %v3159_v13, %v3177_v45  ;;  %v3192_v61 = vsel %vm3160_vm8, %v3184_v5, 0.0 }
 0x79b   :  { %3193 = vadd.xlane.f32.xlu0 %v3192_v61 }
 0x79c   :  { %v3185_v0 = vmul.f32 %v3181_v15, %v3181_v15 }
 0x79e   :  { %v3195_v49 = vsel %vm3160_vm8, %v3185_v0, 0.0 }
 0x79f   :  { %3196 = vadd.xlane.f32.xlu1 %v3195_v49 }
 0x820   :  { %v3188_v30 = vpop.xlane.xlu0 %3187 }
 0x821   :  { %v3198_v18 = vmul.f32 0.03125, %v3188_v30  ;;  %v8450_v30 = vld [vmem:[%s10349_s0 + $0x18] sm:$0xff]  }
 0x822   :  { %v3191_v50 = vpop.xlane.xlu1 %3190 }
 0x823   :  { %v3202_v33 = vadd.f32 1e-05, %v3198_v18  ;;  %v3199_v53 = vmul.f32 0.03125, %v3191_v50  ;;  %v3346_v18 = vsub.s32 7, %v8715_v8 }
 0x824   :  { %v3194_v35 = vpop.xlane.xlu0 %3193 }
 0x825   :  { %8517 = vrsqrt.f32 %v3202_v33  ;;  %v3203_v36 = vadd.f32 1e-05, %v3199_v53  ;;  %v3200_v44 = vmul.f32 0.03125, %v3194_v35  ;;  %v3347_v50 = vrot.slane %v9272_v22, %v3346_v18 }
 0x827   :  { %8519 = vrsqrt.f32 %v3203_v36  ;;  %v3204_v60 = vadd.f32 1e-05, %v3200_v44  ;;  %v3355_v33 = vcombine.low %v3347_v50, %v3347_v50 }
 0x828   :  { %v3197_v25 = vpop.xlane.xlu1 %3196 }
 0x829   :  { %8521 = vrsqrt.f32 %v3204_v60  ;;  %v3201_v31 = vmul.f32 0.03125, %v3197_v25 }
 0x82b   :  { %v3205_v3 = vadd.f32 1e-05, %v3201_v31 }
 0x82d   :  { %8523 = vrsqrt.f32 %v3205_v3 }
 0x832   :  { %v8518_v37 = vpop.eup %8517 }
 0x833   :  { %v3210_v52 = vmul.f32 %v8518_v37, %v3178_v54  ;;  %v3341_v54 = vld [vmem:[%s10355_s6 + $0x28] sm:$0xff] }
 0x834   :  { %v8520_v21 = vpop.eup %8519  ;;  %8132 = vmatprep.subr.mxu1 %v3341_v54 }
 0x835   :  { %v3211_v63 = vmul.f32 %v8520_v21, %v3179_v38  ;;  %v3218_v39 = vmul.f32 %v3217_v57, %v3210_v52  ;;  %8133 = vmatpush3.msra.mxu1 %v3341_v54  ;;  %v3338_v38 = vld [vmem:[%s10355_s6 + $0x10] sm:$0xff] }
 0x836   :  { %v8522_v48 = vpop.eup %8521  ;;  %8134 = vmatprep.subr.mxu1 %v3340_v12 }
 0x837   :  { %v3212_v1 = vmul.f32 %v8522_v48, %v3180_v17  ;;  %v3219_v47 = vmul.f32 %v3217_v57, %v3211_v63  ;;  %v9318_v2 = vadd.f32 %v3225_v62, %v3218_v39  ;;  %8135 = vmatpush3.msra.mxu1 %v3340_v12  ;;  %v3236_v17 = vsub.s32 6, %v8715_v8  ;;  %v7600_v39 = vld [vmem:[%s10350_s3 + $0x38] sm:$0xff]  ;;  %v7598_v48 = vld [vmem:[%s10350_s3 + $0x28] sm:$0xff] }
 0x838   :  { %8136 = vmatprep.subr.mxu1 %v3339_v46 }
 0x839   :  { %v9320_v41 = vadd.f32 %v3225_v62, %v3219_v47  ;;  %v3220_v13 = vmul.f32 %v3217_v57, %v3212_v1  ;;  %8137 = vmatpush3.msra.mxu1 %v3339_v46  ;;  %v3237_v29 = vrot.slane %v9272_v22, %v3236_v17  ;;  %v7597_v1 = vld [vmem:[%s10350_s3 + $0x20] sm:$0xff]  ;;  %v8451_v47 = vld [vmem:[%s10351_s1 + $0x18] sm:$0xff]  }
 0x83a   :  { %v8524_v6 = vpop.eup %8523  ;;  %8138 = vmatprep.subr.mxu1 %v3338_v38 }
 0x83b   :  { %v3213_v7 = vmul.f32 %v8524_v6, %v3181_v15  ;;  %v3242_v9 = vcombine.low %v9318_v2, %v9320_v41  ;;  %v3228_v42 = vadd.f32 %v3225_v62, %v3220_v13  ;;  %8139 = vmatpush3.msra.mxu1 %v3338_v38  ;;  %v3245_v4 = vcombine.low %v3237_v29, %v3237_v29 }
 0x83c   :  { %8140 = vmatprep.subr.mxu1 %v3337_v14 }
 0x83d   :  { %8125 = vmatprep.mubr.msk.f32.mxu0 %vm147_vm1, %v3242_v9  ;;  %v3221_v16 = vmul.f32 %v3217_v57, %v3213_v7  ;;  %8141 = vmatpush3.msra.mxu1 %v3337_v14 }
 0x83e   :  { %8142 = vmatprep.subr.mxu1 %v3336_v55 }
 0x83f   :  { %v3229_v11 = vadd.f32 %v3225_v62, %v3221_v16  ;;  %8143 = vmatpush3.msra.mxu1 %v3336_v55  ;;  %v7599_v62 = vld [vmem:[%s10350_s3 + $0x30] sm:$0xff] }
 0x840   :  { %8182 = vmatprep.subr.mxu1 %v7594_v43 }
 0x841   :  { %v3243_v32 = vcombine.low %v3228_v42, %v3229_v11 }
 0x843   :  { %8126 = vmatmul.mubr.msk.f32.vlgmr.msra.gmra.mxu0 %vm147_vm1, %v3243_v32 }
 0x844   :  { %8179 = vmatprep.mubr.msk.f32.mxu0 %vm8635_vm2, %v8634_v27 }
 0x903   :  { %v8127_v34 = vpop.f32.mrf.mxu0 }
 0x904   :  { %v3323_v45 = vadd.f32 %v8127_v34, %v3245_v4 }
 0x905   :  { %v3317_v59 = vpop.f32.mrf.mxu0 }
 0x906   :  { %v3329_v5 = vcombine.high %v3323_v45, %v3323_v45  ;;  %v3318_v15 = vadd.f32 %v3317_v59, %v3245_v4  ;;  %v3334_v19 = vmax.f32 %v3323_v45, 0.0 }
 0x908   :  { %v3328_v61 = vcombine.high %v3318_v15, %v3318_v15  ;;  %v3335_v0 = vmax.f32 %v3329_v5, 0.0  ;;  %v3332_v49 = vmax.f32 %v3318_v15, 0.0 }
 0x90a   :  { %v3333_v24 = vmax.f32 %v3328_v61, 0.0  ;;  %v3353_v23 = vcombine.low %v3334_v19, %v3335_v0 }
 0x90c   :  { %v3352_v20 = vcombine.low %v3332_v49, %v3333_v24 }
 0x90e   :  { %8144 = vmatprep.mubr.msk.f32.mxu1 %vm3357_vm9, %v3352_v20 }
 0x90f   :  { %8145 = vmatmul.mubr.msk.f32.vlgmr.msra.gmra.mxu1 %vm3357_vm9, %v3353_v23 }
 0x910   :  { %8183 = vmatpush3.msra.mxu1 %v7594_v43  ;;  %8184 = vmatprep.mubr.msk.f32.mxu1 %vm57_vm0, %v8449_v26 }
 0x911   :  { %8187 = vmatprep.subr.mxu1 %v7600_v39 }
 0x913   :  { %8185 = vmatmul.mubr.msk.f32.vlgmr.msra.gmra.mxu1 %vm57_vm0, %v8450_v30 }
 0x914   :  { %8188 = vmatpush3.msra.mxu1 %v7600_v39 }
 0x915   :  { %8189 = vmatprep.subr.mxu1 %v7599_v62 }
 0x916   :  { %8190 = vmatpush3.msra.mxu1 %v7599_v62 }
 0x917   :  { %8191 = vmatprep.subr.mxu1 %v7598_v48 }
 0x918   :  { %8192 = vmatpush3.msra.mxu1 %v7598_v48 }
 0x919   :  { %8193 = vmatprep.subr.mxu1 %v7597_v1 }
 0x91a   :  { %8194 = vmatpush3.msra.mxu1 %v7597_v1 }
 0x91b   :  { %8198 = vmatprep.subr.mxu1 %v8634_v27 }
 0x9cf   :  { %v8146_v53 = vpop.f32.mrf.mxu1 }
 0x9d0   :  { %v3434_v35 = vadd.f32 %v8146_v53, %v3355_v33 }
 0x9d1   :  { %v3428_v36 = vpop.f32.mrf.mxu1 }
 0x9d2   :  { %v3429_v44 = vadd.f32 %v3428_v36, %v3355_v33  ;;  %v3440_v60 = vcombine.high %v3434_v35, %v3434_v35  ;;  %v3445_v3 = vadd.f32 %v3434_v35, %v3228_v42  ;;  %v9409_v36 = vld [vmem:[%s10352_s8 + $0x8] sm:$0xff] }
 0x9d4   :  { %v3439_v25 = vcombine.high %v3429_v44, %v3429_v44  ;;  %v3443_v31 = vadd.f32 %v3429_v44, %v9318_v2  ;;  %v3446_v21 = vadd.f32 %v3440_v60, %v3229_v11  ;;  %v3453_v22 = vsel %vm3160_vm8, %v3445_v3, 0.0  ;;  %v8452_v2 = vld [vmem:[%s10351_s1 + $0x10] sm:$0xff]  }
 0x9d5   :  { %v3502_v44 = vrot.slane %v9409_v36, %v8775_v28 }
 0x9d6   :  { %v3447_v57 = vsel %vm3160_vm8, %v3443_v31, 0.0  ;;  %v3444_v37 = vadd.f32 %v3439_v25, %v9320_v41  ;;  %v3456_v63 = vsel %vm3160_vm8, %v3446_v21, 0.0  ;;  %v8186_v41 = vpop.f32.mrf.mxu1 }
 0x9d7   :  { %3448 = vadd.xlane.f32.xlu0 %v3447_v57  ;;  %v9392_v6 = vadd.f32 %v8451_v47, %v8186_v41 }
 0x9d8   :  { %v3450_v52 = vsel %vm3160_vm8, %v3444_v37, 0.0  ;;  %v3870_v7 = vpop.f32.mrf.mxu1 }
 0x9d9   :  { %3451 = vadd.xlane.f32.xlu1 %v3450_v52  ;;  %v9394_v9 = vadd.f32 %v8452_v2, %v3870_v7 }
 0x9db   :  { %3454 = vadd.xlane.f32.xlu0 %v3453_v22  ;;  %8195 = vmatprep.mubr.msk.f32.mxu1 %vm147_vm1, %v9394_v9 }
 0x9dc   :  { %8196 = vmatmul.mubr.msk.f32.vlgmr.msra.gmra.mxu1 %vm147_vm1, %v9392_v6 }
 0x9dd   :  { %3457 = vadd.xlane.f32.xlu1 %v3456_v63  ;;  %8200 = vmatprep.mubr.msk.f32.mxu1 %vm8635_vm2, %v8634_v27 }
 0xa60   :  { %v3449_v13 = vpop.xlane.xlu0 %3448 }
 0xa61   :  { %v3459_v16 = vmul.f32 0.03125, %v3449_v13 }
 0xa62   :  { %v3452_v42 = vpop.xlane.xlu1 %3451 }
 0xa63   :  { %v3463_v11 = vsub.f32 %v3443_v31, %v3459_v16  ;;  %v3460_v32 = vmul.f32 0.03125, %v3452_v42  ;;  %v3510_v31 = vrot.slane %v9409_v36, %v8723_v10 }
 0xa64   :  { %v3455_v54 = vpop.xlane.xlu0 %3454 }
 0xa65   :  { %v3464_v12 = vsub.f32 %v3444_v37, %v3460_v32  ;;  %v3461_v46 = vmul.f32 0.03125, %v3455_v54  ;;  %v3467_v38 = vmul.f32 %v3463_v11, %v3463_v11 }
 0xa66   :  { %v3458_v14 = vpop.xlane.xlu1 %3457 }
 0xa67   :  { %v3465_v55 = vsub.f32 %v3445_v3, %v3461_v46  ;;  %v3462_v29 = vmul.f32 0.03125, %v3458_v14  ;;  %v3471_v4 = vsel %vm3160_vm8, %v3467_v38, 0.0  ;;  %v3468_v34 = vmul.f32 %v3464_v12, %v3464_v12 }
 0xa68   :  { %3472 = vadd.xlane.f32.xlu0 %v3471_v4 }
 0xa69   :  { %v3466_v45 = vsub.f32 %v3446_v21, %v3462_v29  ;;  %v3474_v59 = vsel %vm3160_vm8, %v3468_v34, 0.0  ;;  %v3469_v5 = vmul.f32 %v3465_v55, %v3465_v55 }
 0xa6a   :  { %3475 = vadd.xlane.f32.xlu1 %v3474_v59 }
 0xa6b   :  { %v3477_v15 = vsel %vm3160_vm8, %v3469_v5, 0.0  ;;  %v3470_v61 = vmul.f32 %v3466_v45, %v3466_v45 }
 0xa6c   :  { %3478 = vadd.xlane.f32.xlu0 %v3477_v15 }
 0xa6d   :  { %v3480_v0 = vsel %vm3160_vm8, %v3470_v61, 0.0 }
 0xa6e   :  { %3481 = vadd.xlane.f32.xlu1 %v3480_v0 }
 0xa9c   :  { %v9427_v54 = vpop.f32.mrf.mxu1 }
 0xa9e   :  { %v9429_v38 = vpop.f32.mrf.mxu1 }
 0xa9f   :  { %v9433_v4 = vcombine.high %v9429_v38, %v9429_v38 }
 0xaf1   :  { %v3473_v49 = vpop.xlane.xlu0 %3472 }
 0xaf2   :  { %v3483_v24 = vmul.f32 0.03125, %v3473_v49 }
 0xaf3   :  { %v3476_v19 = vpop.xlane.xlu1 %3475 }
 0xaf4   :  { %v3487_v20 = vadd.f32 1e-05, %v3483_v24  ;;  %v3484_v23 = vmul.f32 0.03125, %v3476_v19  ;;  %v9446_v24 = vcombine.high %v9427_v54, %v9427_v54 }
 0xaf5   :  { %v3479_v43 = vpop.xlane.xlu0 %3478 }
 0xaf6   :  { %8525 = vrsqrt.f32 %v3487_v20  ;;  %v3488_v26 = vadd.f32 1e-05, %v3484_v23  ;;  %v3485_v30 = vmul.f32 0.03125, %v3479_v43 }
 0xaf7   :  { %v3482_v50 = vpop.xlane.xlu1 %3481 }
 0xaf8   :  { %8527 = vrsqrt.f32 %v3488_v26  ;;  %v3489_v33 = vadd.f32 1e-05, %v3485_v30  ;;  %v3486_v53 = vmul.f32 0.03125, %v3482_v50 }
 0xafa   :  { %8529 = vrsqrt.f32 %v3489_v33  ;;  %v3490_v35 = vadd.f32 1e-05, %v3486_v53 }
 0xafc   :  { %8531 = vrsqrt.f32 %v3490_v35 }
 0xb03   :  { %v8526_v60 = vpop.eup %8525 }
 0xb04   :  { %v3495_v25 = vmul.f32 %v8526_v60, %v3463_v11  ;;  %v9422_v11 = vld [vmem:[%s10352_s8 + $0x10] sm:$0xff] }
 0xb05   :  { %v8528_v3 = vpop.eup %8527  ;;  %v3986_v32 = vrot.slane %v9422_v11, %v8723_v10 }
 0xb06   :  { %v3503_v57 = vmul.f32 %v3502_v44, %v3495_v25  ;;  %v3496_v37 = vmul.f32 %v8528_v3, %v3464_v12  ;;  %v3695_v3 = vld [vmem:[%s10356_s7 + $0x78] sm:$0xff] }
 0xb07   :  { %v8530_v52 = vpop.eup %8529  ;;  %8148 = vmatpush3.msra.mxu0 %v3695_v3 }
 0xb08   :  { %v3511_v21 = vadd.f32 %v3510_v31, %v3503_v57  ;;  %v3504_v22 = vmul.f32 %v3502_v44, %v3496_v37  ;;  %v3497_v63 = vmul.f32 %v8530_v52, %v3465_v55  ;;  %v3694_v57 = vld [vmem:[%s10356_s7 + $0x70] sm:$0xff]  ;;  %8149 = vmatprep.subr.mxu0 %v8634_v27 }
 0xb09   :  { %v8532_v39 = vpop.eup %8531  ;;  %8150 = vmatpush3.msra.mxu0 %v3694_v57  ;;  %v3682_v57 = vld [vmem:[%s10356_s7 + $0x10] sm:$0xff] }
 0xb0a   :  { %v3515_v62 = vsel %vm3160_vm8, %v3511_v21, 0.0  ;;  %v3512_v48 = vadd.f32 %v3510_v31, %v3504_v22  ;;  %v3505_v1 = vmul.f32 %v3502_v44, %v3497_v63  ;;  %v3498_v47 = vmul.f32 %v8532_v39, %v3466_v45  ;;  %8151 = vmatprep.subr.mxu0 %v8634_v27 }
 0xb0b   :  { %3516 = vadd.xlane.f32.xlu0 %v3515_v62 }
 0xb0c   :  { %v3518_v2 = vsel %vm3160_vm8, %v3512_v48, 0.0  ;;  %v3513_v41 = vadd.f32 %v3510_v31, %v3505_v1  ;;  %v3506_v7 = vmul.f32 %v3502_v44, %v3498_v47  ;;  %v3692_v1 = vld [vmem:[%s10356_s7 + $0x60] sm:$0xff] }
 0xb0d   :  { %3519 = vadd.xlane.f32.xlu1 %v3518_v2 }
 0xb0e   :  { %v3521_v13 = vsel %vm3160_vm8, %v3513_v41, 0.0  ;;  %v3514_v16 = vadd.f32 %v3510_v31, %v3506_v7  ;;  %v9481_v31 = vrot.slane %v9422_v11, %v8775_v28  ;;  %v3691_v7 = vld [vmem:[%s10356_s7 + $0x58] sm:$0xff] }
 0xb0f   :  { %3522 = vadd.xlane.f32.xlu0 %v3521_v13  ;;  %v3690_v13 = vld [vmem:[%s10356_s7 + $0x50] sm:$0xff] }
 0xb10   :  { %v3524_v42 = vsel %vm3160_vm8, %v3514_v16, 0.0  ;;  %v9492_v37 = vadd.f32 %v9481_v31, %v9433_v4  ;;  %v9503_v22 = vadd.f32 %v9481_v31, %v9446_v24 }
 0xb11   :  { %3525 = vadd.xlane.f32.xlu1 %v3524_v42 }
 0xb25   :  { %3988 = vrot.lane.b32.xlu0 %v3986_v32, %s8631_s25 }
 0xb94   :  { %v3517_v12 = vpop.xlane.xlu0 %3516 }
 0xb95   :  { %v3527_v14 = vmul.f32 0.03125, %v3517_v12  ;;  %v3689_v12 = vld [vmem:[%s10356_s7 + $0x48] sm:$0xff] }
 0xb96   :  { %v3520_v46 = vpop.xlane.xlu1 %3519 }
 0xb97   :  { %v3528_v34 = vmul.f32 0.03125, %v3520_v46  ;;  %v9435_v45 = vsub.f32 %v3511_v21, %v3527_v14  ;;  %v3688_v46 = vld [vmem:[%s10356_s7 + $0x40] sm:$0xff] }
 0xb98   :  { %v3523_v55 = vpop.xlane.xlu0 %3522 }
 0xb99   :  { %v3529_v29 = vmul.f32 0.03125, %v3523_v55  ;;  %v9442_v49 = vsub.f32 %v3512_v48, %v3528_v34  ;;  %v3535_v43 = vmul.f32 %v9435_v45, %v9435_v45  ;;  %v3693_v48 = vld [vmem:[%s10356_s7 + $0x68] sm:$0xff]  ;;  %v3687_v34 = vld [vmem:[%s10356_s7 + $0x38] sm:$0xff] }
 0xb9a   :  { %v3526_v5 = vpop.xlane.xlu1 %3525  ;;  %8152 = vmatpush3.msra.mxu0 %v3693_v48 }
 0xb9b   :  { %v9437_v59 = vsub.f32 %v3513_v41, %v3529_v29  ;;  %v3530_v19 = vmul.f32 0.03125, %v3526_v5  ;;  %v3539_v30 = vsel %vm3160_vm8, %v3535_v43, 0.0  ;;  %v3536_v33 = vmul.f32 %v9442_v49, %v9442_v49  ;;  %8153 = vmatprep.subr.mxu0 %v8634_v27  ;;  %v3686_v5 = vld [vmem:[%s10356_s7 + $0x30] sm:$0xff]  ;;  %v3683_v43 = vld [vmem:[%s10356_s7 + $0x18] sm:$0xff] }
 0xb9c   :  { %v3989_v15 = vpop.permute.xlu0 %3988  ;;  %8154 = vmatpush3.msra.mxu0 %v3692_v1  ;;  %v3680_v1 = vld [vmem:[%s10356_s7] sm:$0xff] }
 0xb9d   :  { %v3992_v61 = vadd.f32 %v3989_v15, %v9433_v4  ;;  %v3537_v0 = vmul.f32 %v9437_v59, %v9437_v59  ;;  %v3993_v23 = vadd.f32 %v9427_v54, %v3989_v15  ;;  %v9453_v26 = vsub.f32 %v3514_v16, %v3530_v19  ;;  %8155 = vmatprep.subr.mxu0 %v8634_v27  ;;  %v3684_v19 = vld [vmem:[%s10356_s7 + $0x20] sm:$0xff] }
 0xb9e   :  { %v3994_v50 = vadd.f32 %v3989_v15, %v9446_v24  ;;  %v3542_v53 = vsel %vm3160_vm8, %v3536_v33, 0.0  ;;  %v3991_v60 = vadd.f32 %v3989_v15, %v9429_v38  ;;  %8156 = vmatpush3.msra.mxu0 %v3691_v7 }
 0xb9f   :  { %4041 = vrot.lane.b32.xlu0 %v3992_v61, %s8632_s30  ;;  %v3545_v20 = vsel %vm3160_vm8, %v3537_v0, 0.0  ;;  %v3538_v35 = vmul.f32 %v9453_v26, %v9453_v26  ;;  %8157 = vmatprep.subr.mxu0 %v8634_v27  ;;  %v9544_v0 = vadd.f32 %v9481_v31, %v9429_v38 }
 0xba0   :  { %3546 = vadd.xlane.f32.xlu1 %v3545_v20  ;;  %8158 = vmatpush3.msra.mxu0 %v3690_v13 }
 0xba1   :  { %v3548_v44 = vsel %vm3160_vm8, %v3538_v35, 0.0  ;;  %8159 = vmatprep.subr.mxu0 %v8634_v27 }
 0xba2   :  { %8160 = vmatpush3.msra.mxu0 %v3689_v12 }
 0xba3   :  { %4043 = vrot.lane.b32.xlu0 %v3993_v23, %s8632_s30  ;;  %8161 = vmatprep.subr.mxu0 %v8634_v27 }
 0xba4   :  { %3540 = vadd.xlane.f32.xlu1 %v3539_v30  ;;  %8162 = vmatpush3.msra.mxu0 %v3688_v46 }
 0xba5   :  { %8163 = vmatprep.subr.mxu0 %v8634_v27 }
 0xba6   :  { %8164 = vmatpush3.msra.mxu0 %v3687_v34 }
 0xba7   :  { %4045 = vrot.lane.b32.xlu0 %v3994_v50, %s8632_s30  ;;  %8165 = vmatprep.subr.mxu0 %v8634_v27 }
 0xba8   :  { %3543 = vadd.xlane.f32.xlu1 %v3542_v53  ;;  %8166 = vmatpush3.msra.mxu0 %v3686_v5 }
 0xba9   :  { %8167 = vmatprep.subr.mxu0 %v8634_v27 }
 0xbab   :  { %4049 = vrot.lane.b32.xlu0 %v3992_v61, %s8633_s10 }
 0xbac   :  { %3549 = vadd.xlane.f32.xlu1 %v3548_v44 }
 0xbaf   :  { %4053 = vrot.lane.b32.xlu0 %v3994_v50, %s8633_s10 }
 0xbb3   :  { %4057 = vrot.lane.b32.xlu0 %v3992_v61, %s8636_s11 }
 0xbb7   :  { %4061 = vrot.lane.b32.xlu0 %v3994_v50, %s8636_s11 }
 0xbbb   :  { %4243 = vrot.lane.b32.xlu0 %v3993_v23, %s8637_s12 }
 0xbbd   :  { %4039 = vrot.lane.b32.xlu1 %v3991_v60, %s8632_s30 }
 0xbc1   :  { %4047 = vrot.lane.b32.xlu1 %v3991_v60, %s8633_s10 }
 0xbc5   :  { %4051 = vrot.lane.b32.xlu1 %v3993_v23, %s8633_s10 }
 0xbc9   :  { %4055 = vrot.lane.b32.xlu1 %v3991_v60, %s8636_s11 }
 0xbcd   :  { %4059 = vrot.lane.b32.xlu1 %v3993_v23, %s8636_s11 }
 0xbd1   :  { %4091 = vrot.lane.b32.xlu1 %v3991_v60, %s8637_s12 }
 0xbd5   :  { %4167 = vrot.lane.b32.xlu1 %v3992_v61, %s8637_s12  ;;  %v3685_v61 = vld [vmem:[%s10356_s7 + $0x28] sm:$0xff] }
 0xbd6   :  { %8168 = vmatpush3.msra.mxu0 %v3685_v61 }
 0xbd7   :  { %8169 = vmatprep.subr.mxu0 %v8634_v27 }
 0xbd8   :  { %8170 = vmatpush3.msra.mxu0 %v3684_v19 }
 0xbd9   :  { %4319 = vrot.lane.b32.xlu1 %v3994_v50, %s8637_s12  ;;  %v3570_v50 = vrot.slane %v9409_v36, %v8825_v51  ;;  %8171 = vmatprep.subr.mxu0 %v8634_v27 }
 0xbda   :  { %8172 = vmatpush3.msra.mxu0 %v3683_v43 }
 0xbdb   :  { %8173 = vmatprep.subr.mxu0 %v8634_v27 }
 0xbdc   :  { %8174 = vmatpush3.msra.mxu0 %v3682_v57 }
 0xbdd   :  { %8175 = vmatprep.subr.mxu0 %v8634_v27 }
 0xc11   :  { %v4042_v25 = vpop.permute.xlu0 %4041 }
 0xc12   :  { %4471 = vrot.lane.b32.xlu1 %v4042_v25, %s8637_s12  ;;  %v3578_v25 = vrot.slane %v9409_v36, %v9267_v58 }
 0xc15   :  { %v9495_v52 = vpop.permute.xlu0 %4043 }
 0xc16   :  { %4013 = vrot.lane.b32.xlu1 %v9492_v37, %s8632_s30 }
 0xc19   :  { %v4046_v21 = vpop.permute.xlu0 %4045 }
 0xc1a   :  { %4623 = vrot.lane.b32.xlu1 %v4046_v21, %s8637_s12 }
 0xc1e   :  { %4017 = vrot.lane.b32.xlu1 %v9503_v22, %s8632_s30 }
 0xc29   :  { %v3547_v63 = vpop.xlane.xlu1 %3546 }
 0xc2a   :  { %v3553_v39 = vmul.f32 0.03125, %v3547_v63  ;;  %v3681_v63 = vld [vmem:[%s10356_s7 + $0x8] sm:$0xff] }
 0xc2b   :  { %8176 = vmatpush3.msra.mxu0 %v3681_v63  ;;  %v4050_v63 = vpop.permute.xlu0 %4049 }
 0xc2c   :  { %v3557_v62 = vadd.f32 1e-05, %v3553_v39  ;;  %8177 = vmatprep.subr.mxu0 %v8634_v27 }
 0xc2d   :  { %v3541_v47 = vpop.xlane.xlu1 %3540  ;;  %8178 = vmatpush3.msra.mxu0 %v3680_v1 }
 0xc2e   :  { %v3551_v2 = vmul.f32 0.03125, %v3541_v47  ;;  %8533 = vrsqrt.f32 %v3557_v62  ;;  %8208 = vmatprep.subr.mxu0 %v8634_v27 }
 0xc30   :  { %v3555_v41 = vadd.f32 1e-05, %v3551_v2 }
 0xc31   :  { %v3544_v16 = vpop.xlane.xlu1 %3543 }
 0xc32   :  { %8535 = vrsqrt.f32 %v3555_v41  ;;  %v3552_v42 = vmul.f32 0.03125, %v3544_v16 }
 0xc34   :  { %v3556_v32 = vadd.f32 1e-05, %v3552_v42 }
 0xc35   :  { %v3550_v14 = vpop.xlane.xlu1 %3549 }
 0xc36   :  { %8537 = vrsqrt.f32 %v3556_v32  ;;  %v3554_v55 = vmul.f32 0.03125, %v3550_v14 }
 0xc38   :  { %v3558_v29 = vadd.f32 1e-05, %v3554_v55 }
 0xc39   :  { %v4040_v15 = vpop.permute.xlu1 %4039 }
 0xc3a   :  { %8539 = vrsqrt.f32 %v3558_v29  ;;  %4395 = vrot.lane.b32.xlu0 %v4040_v15, %s8637_s12 }
 0xc3b   :  { %v8534_v20 = vpop.eup %8533 }
 0xc3c   :  { %v3565_v33 = vmul.f32 %v8534_v20, %v9437_v59  ;;  %v9572_v59 = vadd.f32 %v9427_v54, %v9481_v31 }
 0xc3d   :  { %v9550_v23 = vpop.permute.xlu1 %4047 }
 0xc3e   :  { %4011 = vrot.lane.b32.xlu0 %v9544_v0, %s8632_s30 }
 0xc3f   :  { %v8536_v30 = vpop.eup %8535 }
 0xc40   :  { %v3563_v53 = vmul.f32 %v8536_v30, %v9435_v45  ;;  %v3573_v45 = vmul.f32 %v3570_v50, %v3565_v33 }
 0xc41   :  { %v9563_v35 = vpop.permute.xlu1 %4051 }
 0xc42   :  { %v3571_v44 = vmul.f32 %v3570_v50, %v3563_v53  ;;  %4547 = vrot.lane.b32.xlu0 %v9495_v52, %s8637_s12  ;;  %v3581_v48 = vadd.f32 %v3578_v25, %v3573_v45 }
 0xc43   :  { %v8538_v60 = vpop.eup %8537 }
 0xc44   :  { %v3564_v3 = vmul.f32 %v8538_v60, %v9442_v49  ;;  %v3579_v52 = vadd.f32 %v3578_v25, %v3571_v44  ;;  %v3665_v46 = vrot.slane %v3581_v48, %v9267_v58  ;;  %v3621_v34 = vrot.slane %v3581_v48, %v8723_v10 }
 0xc45   :  { %v9578_v21 = vpop.permute.xlu1 %4055  ;;  %v3598_v15 = vrot.slane %v3581_v48, %v8775_v28  ;;  %v3643_v57 = vrot.slane %v3581_v48, %v8825_v51 }
 0xc46   :  { %v3572_v39 = vmul.f32 %v3570_v50, %v3564_v3  ;;  %4015 = vrot.lane.b32.xlu0 %v9572_v59, %s8632_s30  ;;  %v3657_v2 = vrot.slane %v3579_v52, %v9267_v58  ;;  %v3590_v42 = vrot.slane %v3579_v52, %v8775_v28  ;;  %v3635_v5 = vrot.slane %v3579_v52, %v8825_v51 }
 0xc47   :  { %v8540_v31 = vpop.eup %8539 }
 0xc48   :  { %v3566_v49 = vmul.f32 %v8540_v31, %v9453_v26  ;;  %v3580_v62 = vadd.f32 %v3578_v25, %v3572_v39  ;;  %v3613_v26 = vrot.slane %v3579_v52, %v8723_v10 }
 0xc49   :  { %v9590_v47 = vpop.permute.xlu1 %4059 }
 0xc4a   :  { %v3574_v41 = vmul.f32 %v3570_v50, %v3566_v49  ;;  %v3661_v7 = vrot.slane %v3580_v62, %v9267_v58  ;;  %v3617_v13 = vrot.slane %v3580_v62, %v8723_v10  ;;  %v3639_v16 = vrot.slane %v3580_v62, %v8825_v51  ;;  %v4054_v49 = vpop.permute.xlu0 %4053 }
 0xc4b   :  { %v3594_v32 = vrot.slane %v3580_v62, %v8775_v28 }
 0xc4c   :  { %v3582_v12 = vadd.f32 %v3578_v25, %v3574_v41  ;;  %v3670_v14 = vsel %vm3603_vm10, %v3661_v7, %v3657_v2  ;;  %v3626_v55 = vsel %vm3603_vm10, %v3617_v13, %v3613_v26  ;;  %v3648_v33 = vsel %vm3603_vm10, %v3639_v16, %v3635_v5 }
 0xc4d   :  { %v4092_v29 = vpop.permute.xlu1 %4091  ;;  %v3604_v61 = vsel %vm3603_vm10, %v3594_v32, %v3590_v42  ;;  %v3671_v30 = vsel %vm3605_vm11, %v3665_v46, %v3670_v14  ;;  %v3627_v50 = vsel %vm3605_vm11, %v3621_v34, %v3626_v55  ;;  %v3649_v52 = vsel %vm3605_vm11, %v3643_v57, %v3648_v33 }
 0xc4e   :  { %8199 = vmatpush3.xpose.msk.msra.mxu1 %vm57_vm0, %v4092_v29  ;;  %v3669_v19 = vrot.slane %v3582_v12, %v9267_v58  ;;  %v3625_v20 = vrot.slane %v3582_v12, %v8723_v10  ;;  %v3602_v43 = vrot.slane %v3582_v12, %v8775_v28  ;;  %v3606_v53 = vsel %vm3605_vm11, %v3598_v15, %v3604_v61  ;;  %v4058_v62 = vpop.permute.xlu0 %4057 }
 0xc4f   :  { %8203 = vmatprep.subr.mxu1 %v8634_v27  ;;  %v3647_v25 = vrot.slane %v3582_v12, %v8825_v51 }
 0xc50   :  { %v3672_v44 = vsel %vm3607_vm12, %v3669_v19, %v3671_v30  ;;  %v3628_v60 = vsel %vm3607_vm12, %v3625_v20, %v3627_v50  ;;  %v3608_v45 = vsel %vm3607_vm12, %v3602_v43, %v3606_v53 }
 0xc51   :  { %3673 = vrot.lane.b32.xlu1 %v3672_v44, %s8637_s12  ;;  %3629 = vrot.lane.b32.xlu0 %v3628_v60, %s8631_s25  ;;  %v4168_v3 = vpop.permute.xlu1 %4167  ;;  %v3650_v39 = vsel %vm3607_vm12, %v3647_v25, %v3649_v52 }
 0xc52   :  { %8201 = vmatmul.mubr.msk.f32.vlgmr.msra.gmra.mxu1 %vm57_vm0, %v9544_v0 }
 0xc53   :  { %8204 = vmatpush3.xpose.msk.msra.mxu1 %vm57_vm0, %v4168_v3  ;;  %8205 = vmatprep.mubr.msk.f32.mxu1 %vm8635_vm2, %v8634_v27 }
 0xc54   :  { %8213 = vmatprep.subr.mxu1 %v8634_v27 }
 0xc55   :  { %4775 = vrot.lane.b32.xlu1 %v4050_v63, %s8637_s12  ;;  %3651 = vrot.lane.b32.xlu0 %v3650_v39, %s8638_s13  ;;  %v4320_v31 = vpop.permute.xlu1 %4319 }
 0xc56   :  { %8206 = vmatmul.mubr.msk.f32.vlgmr.msra.gmra.mxu1 %vm57_vm0, %v9492_v37 }
 0xc57   :  { %8214 = vmatpush3.xpose.msk.msra.mxu1 %vm57_vm0, %v4320_v31  ;;  %8215 = vmatprep.mubr.msk.f32.mxu1 %vm8635_vm2, %v8634_v27 }
 0xc58   :  { %8223 = vmatprep.subr.mxu1 %v8634_v27 }
 0xc59   :  { %4021 = vrot.lane.b32.xlu1 %v9492_v37, %s8633_s10  ;;  %4699 = vrot.lane.b32.xlu0 %v9550_v23, %s8637_s12  ;;  %v4062_v23 = vpop.permute.xlu0 %4061 }
 0xc5a   :  { %8216 = vmatmul.mubr.msk.f32.vlgmr.msra.gmra.mxu1 %vm57_vm0, %v9503_v22 }
 0xc5b   :  { %8225 = vmatprep.mubr.msk.f32.mxu1 %vm8635_vm2, %v8634_v27 }
 0xc5d   :  { %4927 = vrot.lane.b32.xlu1 %v4054_v49, %s8637_s12  ;;  %4019 = vrot.lane.b32.xlu0 %v9544_v0, %s8633_s10  ;;  %v3998_v49 = vrot.slane %v9422_v11, %v8825_v51 }
 0xc61   :  { %4025 = vrot.lane.b32.xlu1 %v9503_v22, %s8633_s10  ;;  %4851 = vrot.lane.b32.xlu0 %v9563_v35, %s8637_s12 }
 0xc65   :  { %5079 = vrot.lane.b32.xlu1 %v4058_v62, %s8637_s12  ;;  %4023 = vrot.lane.b32.xlu0 %v9572_v59, %s8633_s10 }
 0xc69   :  { %4029 = vrot.lane.b32.xlu1 %v9492_v37, %s8636_s11  ;;  %5003 = vrot.lane.b32.xlu0 %v9578_v21, %s8637_s12  ;;  %v4244_v21 = vpop.permute.xlu0 %4243 }
 0xc6d   :  { %5231 = vrot.lane.b32.xlu1 %v4062_v23, %s8637_s12  ;;  %4027 = vrot.lane.b32.xlu0 %v9544_v0, %s8636_s11 }
 0xc71   :  { %4033 = vrot.lane.b32.xlu1 %v9503_v22, %s8636_s11  ;;  %5155 = vrot.lane.b32.xlu0 %v9590_v47, %s8637_s12 }
 0xc75   :  { %4031 = vrot.lane.b32.xlu0 %v9572_v59, %s8636_s11 }
 0xc84   :  { %v4472_v35 = vpop.permute.xlu1 %4471 }
 0xc85   :  { %8224 = vmatpush3.xpose.msk.msra.mxu1 %vm57_vm0, %v4472_v35 }
 0xc86   :  { %8233 = vmatprep.subr.mxu1 %v8634_v27 }
 0xc88   :  { %v4014_v37 = vpop.permute.xlu1 %4013 }
 0xc89   :  { %8226 = vmatmul.mubr.msk.f32.vlgmr.msra.gmra.mxu1 %vm57_vm0, %v4014_v37 }
 0xc8a   :  { %8235 = vmatprep.mubr.msk.f32.mxu1 %vm8635_vm2, %v8634_v27 }
 0xc8c   :  { %v4624_v0 = vpop.permute.xlu1 %4623 }
 0xc8d   :  { %8234 = vmatpush3.xpose.msk.msra.mxu1 %vm57_vm0, %v4624_v0  ;;  %v3699_v0 = vrot.slane %v9409_v36, %v9310_v56 }
 0xc8e   :  { %8243 = vmatprep.subr.mxu1 %v8634_v27 }
 0xc90   :  { %v4018_v22 = vpop.permute.xlu1 %4017 }
 0xc91   :  { %8236 = vmatmul.mubr.msk.f32.vlgmr.msra.gmra.mxu1 %vm57_vm0, %v4018_v22 }
 0xc92   :  { %8245 = vmatprep.mubr.msk.f32.mxu1 %vm8635_vm2, %v8634_v27 }
 0xcac   :  { %v4396_v48 = vpop.permute.xlu0 %4395 }
 0xcb0   :  { %v4012_v1 = vpop.permute.xlu0 %4011 }
 0xcb4   :  { %v4548_v47 = vpop.permute.xlu0 %4547 }
 0xcb8   :  { %v4016_v2 = vpop.permute.xlu0 %4015 }
 0xcc3   :  { %v3630_v41 = vpop.permute.xlu0 %3629  ;;  %v3674_v7 = vpop.permute.xlu1 %3673 }
 0xcc4   :  { %v3676_v26 = vsel %vm147_vm1, %v3608_v45, %v3630_v41 }
 0xcc7   :  { %v3652_v13 = vpop.permute.xlu0 %3651  ;;  %v4776_v16 = vpop.permute.xlu1 %4775 }
 0xcc8   :  { %v3677_v42 = vsel %vm3357_vm9, %v3676_v26, %v3652_v13  ;;  %8244 = vmatpush3.xpose.msk.msra.mxu1 %vm57_vm0, %v4776_v16 }
 0xcc9   :  { %v3679_v32 = vsel %vm3678_vm13, %v3677_v42, %v3674_v7  ;;  %8253 = vmatprep.subr.mxu1 %v8634_v27 }
 0xcca   :  { %8180 = vmatmul.mubr.f32.vlgmr.msra.gmra.mxu0 %v3679_v32 }
 0xccb   :  { %8209 = vmatpush3.xpose.msk.msra.mxu0 %vm57_vm0, %v4244_v21  ;;  %v4700_v12 = vpop.permute.xlu0 %4699  ;;  %v4022_v46 = vpop.permute.xlu1 %4021  ;;  %8210 = vmatprep.mubr.msk.f32.mxu0 %vm8635_vm2, %v8634_v27 }
 0xccc   :  { %8246 = vmatmul.mubr.msk.f32.vlgmr.msra.gmra.mxu1 %vm57_vm0, %v4022_v46  ;;  %8218 = vmatprep.subr.mxu0 %v8634_v27 }
 0xccd   :  { %8255 = vmatprep.mubr.msk.f32.mxu1 %vm8635_vm2, %v8634_v27 }
 0xcce   :  { %8211 = vmatmul.mubr.msk.f32.vlgmr.msra.gmra.mxu0 %vm57_vm0, %v9572_v59 }
 0xccf   :  { %8219 = vmatpush3.xpose.msk.msra.mxu0 %vm57_vm0, %v4396_v48  ;;  %v4020_v14 = vpop.permute.xlu0 %4019  ;;  %v4928_v55 = vpop.permute.xlu1 %4927  ;;  %8220 = vmatprep.mubr.msk.f32.mxu0 %vm8635_vm2, %v8634_v27 }
 0xcd0   :  { %8254 = vmatpush3.xpose.msk.msra.mxu1 %vm57_vm0, %v4928_v55  ;;  %8228 = vmatprep.subr.mxu0 %v8634_v27 }
 0xcd1   :  { %8263 = vmatprep.subr.mxu1 %v8634_v27 }
 0xcd2   :  { %8221 = vmatmul.mubr.msk.f32.vlgmr.msra.gmra.mxu0 %vm57_vm0, %v4012_v1 }
 0xcd3   :  { %8229 = vmatpush3.xpose.msk.msra.mxu0 %vm57_vm0, %v4548_v47  ;;  %v4852_v29 = vpop.permute.xlu0 %4851  ;;  %v4026_v34 = vpop.permute.xlu1 %4025  ;;  %8230 = vmatprep.mubr.msk.f32.mxu0 %vm8635_vm2, %v8634_v27 }
 0xcd4   :  { %8256 = vmatmul.mubr.msk.f32.vlgmr.msra.gmra.mxu1 %vm57_vm0, %v4026_v34  ;;  %8238 = vmatprep.subr.mxu0 %v8634_v27 }
 0xcd5   :  { %8265 = vmatprep.mubr.msk.f32.mxu1 %vm8635_vm2, %v8634_v27 }
 0xcd6   :  { %8231 = vmatmul.mubr.msk.f32.vlgmr.msra.gmra.mxu0 %vm57_vm0, %v4016_v2 }
 0xcd7   :  { %8239 = vmatpush3.xpose.msk.msra.mxu0 %vm57_vm0, %v4700_v12  ;;  %v4024_v59 = vpop.permute.xlu0 %4023  ;;  %v5080_v5 = vpop.permute.xlu1 %5079  ;;  %8240 = vmatprep.mubr.msk.f32.mxu0 %vm8635_vm2, %v8634_v27 }
 0xcd8   :  { %8264 = vmatpush3.xpose.msk.msra.mxu1 %vm57_vm0, %v5080_v5  ;;  %8248 = vmatprep.subr.mxu0 %v8634_v27 }
 0xcd9   :  { %8273 = vmatprep.subr.mxu1 %v8634_v27 }
 0xcda   :  { %8241 = vmatmul.mubr.msk.f32.vlgmr.msra.gmra.mxu0 %vm57_vm0, %v4020_v14 }
 0xcdb   :  { %8249 = vmatpush3.xpose.msk.msra.mxu0 %vm57_vm0, %v4852_v29  ;;  %v5004_v15 = vpop.permute.xlu0 %5003  ;;  %v4030_v61 = vpop.permute.xlu1 %4029  ;;  %8250 = vmatprep.mubr.msk.f32.mxu0 %vm8635_vm2, %v8634_v27 }
 0xcdc   :  { %8266 = vmatmul.mubr.msk.f32.vlgmr.msra.gmra.mxu1 %vm57_vm0, %v4030_v61  ;;  %8258 = vmatprep.subr.mxu0 %v8634_v27 }
 0xcdd   :  { %8275 = vmatprep.mubr.msk.f32.mxu1 %vm8635_vm2, %v8634_v27 }
 0xcde   :  { %8251 = vmatmul.mubr.msk.f32.vlgmr.msra.gmra.mxu0 %vm57_vm0, %v4024_v59 }
 0xcdf   :  { %8259 = vmatpush3.xpose.msk.msra.mxu0 %vm57_vm0, %v5004_v15  ;;  %v4028_v19 = vpop.permute.xlu0 %4027  ;;  %v5232_v20 = vpop.permute.xlu1 %5231  ;;  %8260 = vmatprep.mubr.msk.f32.mxu0 %vm8635_vm2, %v8634_v27 }
 0xce0   :  { %8274 = vmatpush3.xpose.msk.msra.mxu1 %vm57_vm0, %v5232_v20  ;;  %8268 = vmatprep.subr.mxu0 %v8634_v27 }
 0xce1   :  { %8283 = vmatprep.subr.mxu1 %v8634_v27 }
 0xce2   :  { %8261 = vmatmul.mubr.msk.f32.vlgmr.msra.gmra.mxu0 %vm57_vm0, %v4028_v19 }
 0xce3   :  { %v5156_v43 = vpop.permute.xlu0 %5155  ;;  %v4034_v30 = vpop.permute.xlu1 %4033  ;;  %8270 = vmatprep.mubr.msk.f32.mxu0 %vm8635_vm2, %v8634_v27 }
 0xce4   :  { %8269 = vmatpush3.xpose.msk.msra.mxu0 %vm57_vm0, %v5156_v43  ;;  %8276 = vmatmul.mubr.msk.f32.vlgmr.msra.gmra.mxu1 %vm57_vm0, %v4034_v30 }
 0xce5   :  { %8278 = vmatprep.subr.mxu0 %v8634_v27  ;;  %8285 = vmatprep.mubr.msk.f32.mxu1 %vm8635_vm2, %v8634_v27 }
 0xce7   :  { %v4032_v50 = vpop.permute.xlu0 %4031 }
 0xce8   :  { %8271 = vmatmul.mubr.msk.f32.vlgmr.msra.gmra.mxu0 %vm57_vm0, %v4032_v50 }
 0xce9   :  { %8280 = vmatprep.mubr.msk.f32.mxu0 %vm8635_vm2, %v8634_v27 }
 0xd12   :  { %v4163_v33 = vpop.f32.mrf.mxu1 }
 0xd13   :  { %v9742_v53 = vmul.f32 0.35355338, %v4163_v33 }
 0xd14   :  { %v8202_v44 = vpop.f32.mrf.mxu1 }
 0xd15   :  { %v5323_v60 = vsel %vm1581_vm3, %v9742_v53, -inf }
 0xd16   :  { %5324 = vmax.xlane.f32.xlu0 %v5323_v60  ;;  %v4239_v25 = vpop.f32.mrf.mxu1 }
 0xd17   :  { %v9746_v45 = vmul.f32 0.35355338, %v4239_v25 }
 0xd18   :  { %v8207_v3 = vpop.f32.mrf.mxu1 }
 0xd19   :  { %v5326_v57 = vsel %vm1581_vm3, %v9746_v45, -inf }
 0xd1a   :  { %5327 = vmax.xlane.f32.xlu1 %v5326_v57  ;;  %v4391_v52 = vpop.f32.mrf.mxu1 }
 0xd1b   :  { %v5310_v63 = vmul.f32 0.35355338, %v4391_v52 }
 0xd1c   :  { %v8217_v39 = vpop.f32.mrf.mxu1 }
 0xd1d   :  { %v5332_v31 = vsel %vm1581_vm3, %v5310_v63, -inf }
 0xd1e   :  { %5333 = vmax.xlane.f32.xlu0 %v5332_v31 }
 0xd34   :  { %4000 = vrot.lane.b32.xlu0 %v3998_v49, %s8638_s13 }
 0xd49   :  { %v9754_v62 = vpop.f32.mrf.mxu1 }
 0xd4b   :  { %v8227_v23 = vpop.f32.mrf.mxu1 }
 0xd51   :  { %v9756_v35 = vpop.f32.mrf.mxu1 }
 0xd52   :  { %v5314_v31 = vmul.f32 0.35355338, %v9756_v35 }
 0xd53   :  { %v8237_v37 = vpop.f32.mrf.mxu1 }
 0xd8a   :  { %v3766_v22 = vpop.f32.mrf.mxu0 }
 0xd8b   :  { %v3767_v21 = vadd.f32 %v3766_v22, %v3699_v0  ;;  %v5344_v22 = vsel %vm1581_vm3, %v5314_v31, -inf }
 0xd8c   :  { %v8181_v48 = vpop.f32.mrf.mxu0  ;;  %v4847_v1 = vpop.f32.mrf.mxu1 }
 0xd8d   :  { %3770 = vst.msk [vmem:[%s10357_s9] sm:$0xf] %vm3160_vm8, %v3767_v21  ;;  %v9824_v37 = vmul.f32 0.35355338, %v4847_v1 }
 0xd8e   :  { %v4315_v11 = vpop.f32.mrf.mxu0  ;;  %v8247_v47 = vpop.f32.mrf.mxu1 }
 0xd8f   :  { %v9810_v25 = vmul.f32 0.35355338, %v4315_v11 }
 0xd90   :  { %v8212_v2 = vpop.f32.mrf.mxu0 }
 0xd91   :  { %v5329_v3 = vsel %vm1581_vm3, %v9810_v25, -inf }
 0xd92   :  { %v9764_v41 = vpop.f32.mrf.mxu0 }
 0xd93   :  { %v9844_v2 = vmul.f32 0.35355338, %v9764_v41 }
 0xd94   :  { %v8222_v7 = vpop.f32.mrf.mxu0  ;;  %v4999_v26 = vpop.f32.mrf.mxu1 }
 0xd95   :  { %v9827_v21 = vmul.f32 0.35355338, %v4999_v26 }
 0xd96   :  { %v9766_v13 = vpop.f32.mrf.mxu0  ;;  %v8257_v16 = vpop.f32.mrf.mxu1 }
 0xd97   :  { %v9849_v26 = vmul.f32 0.35355338, %v9766_v13  ;;  %v5335_v16 = vsel %vm1581_vm3, %v9844_v2, -inf }
 0xd98   :  { %v8232_v36 = vpop.f32.mrf.mxu0 }
 0xd9a   :  { %v9768_v42 = vpop.f32.mrf.mxu0 }
 0xd9b   :  { %v9854_v36 = vmul.f32 0.35355338, %v9768_v42 }
 0xd9c   :  { %v8242_v32 = vpop.f32.mrf.mxu0  ;;  %v5151_v12 = vpop.f32.mrf.mxu1 }
 0xd9d   :  { %v9831_v48 = vmul.f32 0.35355338, %v5151_v12  ;;  %v5341_v32 = vsel %vm1581_vm3, %v9849_v26, -inf  ;;  %v5347_v41 = vsel %vm1581_vm3, %v9854_v36, -inf }
 0xd9e   :  { %v9770_v46 = vpop.f32.mrf.mxu0  ;;  %v8267_v14 = vpop.f32.mrf.mxu1 }
 0xd9f   :  { %v5325_v34 = vpop.xlane.xlu0 %5324  ;;  %v5362_v1 = vsel %vm1581_vm3, %v9831_v48, -inf }
 0xda0   :  { %v8252_v55 = vpop.f32.mrf.mxu0 }
 0xda2   :  { %v9772_v29 = vpop.f32.mrf.mxu0 }
 0xda3   :  { %v5328_v39 = vpop.xlane.xlu1 %5327  ;;  %v9864_v13 = vmul.f32 0.35355338, %v9772_v29 }
 0xda4   :  { %v8262_v59 = vpop.f32.mrf.mxu0  ;;  %v5303_v5 = vpop.f32.mrf.mxu1  ;;  %v5372_v49 = vsub.f32 %v9746_v45, %v5328_v39  ;;  %v5356_v45 = vsel %vm1581_vm3, %v9827_v21, -inf }
 0xda5   :  { %v9835_v35 = vmul.f32 0.35355338, %v5303_v5  ;;  %v5359_v14 = vsel %vm1581_vm3, %v9864_v13, -inf }
 0xda6   :  { %v8277_v15 = vpop.f32.mrf.mxu1  ;;  %v5389_v0 = vmul.f32 1.442695, %v5372_v49 }
 0xda7   :  { %v5334_v61 = vpop.xlane.xlu0 %5333  ;;  %v5368_v11 = vsel %vm1581_vm3, %v9835_v35, -inf }
 0xda8   :  { %v9774_v19 = vpop.f32.mrf.mxu0 }
 0xda9   :  { %v9867_v42 = vmul.f32 0.35355338, %v9774_v19 }
 0xdaa   :  { %v8272_v20 = vpop.f32.mrf.mxu0 }
 0xdab   :  { %v4001_v43 = vpop.permute.xlu0 %4000  ;;  %v5365_v55 = vsel %vm1581_vm3, %v9867_v42, -inf }
 0xdac   :  { %v9777_v30 = vadd.f32 %v4001_v43, %v9429_v38  ;;  %v9780_v50 = vadd.f32 %v4001_v43, %v9433_v4  ;;  %v4005_v33 = vadd.f32 %v9427_v54, %v4001_v43  ;;  %v9790_v44 = vadd.f32 %v4001_v43, %v9446_v24 }
 0xdad   :  { %v5371_v54 = vsub.f32 %v9742_v53, %v5325_v34  ;;  %v5374_v4 = vsub.f32 %v5310_v63, %v5334_v61  ;;  %v5312_v63 = vmul.f32 0.35355338, %v9754_v62  ;;  %v5350_v62 = vsel %vm1581_vm3, %v9824_v37, -inf }
 0xdae   :  { %4069 = vrot.lane.b32.xlu0 %v9780_v50, %s8632_s30  ;;  %4067 = vrot.lane.b32.xlu1 %v9777_v30, %s8632_s30 }
 0xdaf   :  { %v5387_v38 = vmul.f32 1.442695, %v5371_v54  ;;  %v5393_v24 = vmul.f32 1.442695, %v5374_v4  ;;  %v5338_v23 = vsel %vm1581_vm3, %v5312_v63, -inf }
 0xdb1   :  { %8541 = vpow2.f32 %v5387_v38 }
 0xdb2   :  { %4079 = vrot.lane.b32.xlu0 %v4005_v33, %s8633_s10  ;;  %4071 = vrot.lane.b32.xlu1 %v4005_v33, %s8632_s30  ;;  %8543 = vpow2.f32 %v5393_v24 }
 0xdb3   :  { %8545 = vpow2.f32 %v5389_v0 }
 0xdb6   :  { %4083 = vrot.lane.b32.xlu0 %v9777_v30, %s8636_s11  ;;  %4073 = vrot.lane.b32.xlu1 %v9790_v44, %s8632_s30 }
 0xdba   :  { %4087 = vrot.lane.b32.xlu0 %v4005_v33, %s8636_s11  ;;  %4075 = vrot.lane.b32.xlu1 %v9777_v30, %s8633_s10 }
 0xdbe   :  { %4077 = vrot.lane.b32.xlu1 %v9780_v50, %s8633_s10  ;;  %v9808_v60 = vpop.eup %8541 }
 0xdbf   :  { %v5419_v53 = vsel %vm1581_vm3, %v9808_v60, 0.0  ;;  %v9816_v57 = vpop.eup %8543 }
 0xdc0   :  { %v5428_v52 = vsel %vm1581_vm3, %v9816_v57, 0.0  ;;  %v9841_v47 = vpop.eup %8545 }
 0xdc1   :  { %v5422_v7 = vsel %vm1581_vm3, %v9841_v47, 0.0 }
 0xdc2   :  { %4081 = vrot.lane.b32.xlu1 %v9790_v44, %s8633_s10 }
 0xdc6   :  { %4085 = vrot.lane.b32.xlu1 %v9780_v50, %s8636_s11 }
 0xdca   :  { %4089 = vrot.lane.b32.xlu1 %v9790_v44, %s8636_s11 }
 0xdd9   :  { %5420 = vadd.xlane.f32.xlu0 %v5419_v53 }
 0xddd   :  { %5330 = vmax.xlane.f32.xlu0 %v5329_v3 }
 0xde1   :  { %5429 = vadd.xlane.f32.xlu0 %v5428_v52 }
 0xdee   :  { %5339 = vmax.xlane.f32.xlu1 %v5338_v23 }
 0xdf2   :  { %5345 = vmax.xlane.f32.xlu1 %v5344_v22 }
 0xdf6   :  { %5351 = vmax.xlane.f32.xlu1 %v5350_v62 }
 0xdfa   :  { %5357 = vmax.xlane.f32.xlu1 %v5356_v45 }
 0xdfe   :  { %5363 = vmax.xlane.f32.xlu1 %v5362_v1 }
 0xe02   :  { %5369 = vmax.xlane.f32.xlu1 %v5368_v11 }
 0xe06   :  { %5423 = vadd.xlane.f32.xlu1 %v5422_v7 }
 0xe0a   :  { %5336 = vmax.xlane.f32.xlu1 %v5335_v16 }
 0xe0e   :  { %5342 = vmax.xlane.f32.xlu1 %v5341_v32 }
 0xe12   :  { %5348 = vmax.xlane.f32.xlu1 %v5347_v41 }
 0xe20   :  { %v4068_v12 = vpop.permute.xlu1 %4067  ;;  %v4070_v15 = vpop.permute.xlu0 %4069 }
 0xe23   :  { %5499 = vrot.lane.b32.xlu1 %v9777_v30, %s8638_s13 }
 0xe24   :  { %v9873_v34 = vpop.permute.xlu1 %4071  ;;  %v9885_v38 = vpop.permute.xlu0 %4079 }
 0xe27   :  { %5653 = vrot.lane.b32.xlu1 %v4005_v33, %s8638_s13 }
 0xe28   :  { %v4074_v59 = vpop.permute.xlu1 %4073  ;;  %v9888_v52 = vpop.permute.xlu0 %4083 }
 0xe2c   :  { %v9875_v5 = vpop.permute.xlu1 %4075  ;;  %v9891_v22 = vpop.permute.xlu0 %4087 }
 0xe30   :  { %v4078_v29 = vpop.permute.xlu1 %4077 }
 0xe34   :  { %v4082_v61 = vpop.permute.xlu1 %4081 }
 0xe38   :  { %v4086_v19 = vpop.permute.xlu1 %4085 }
 0xe3c   :  { %v9882_v20 = vpop.permute.xlu1 %4089 }
 0xe4b   :  { %5360 = vmax.xlane.f32.xlu1 %v5359_v14 }
 0xe4f   :  { %5366 = vmax.xlane.f32.xlu1 %v5365_v55 }
 0xe60   :  { %5807 = vrot.lane.b32.xlu1 %v4068_v12, %s8638_s13 }
 0xe62   :  { %v5421_v11 = vpop.xlane.xlu0 %5420 }
 0xe64   :  { %5884 = vrot.lane.b32.xlu1 %v4070_v15, %s8638_s13 }
 0xe68   :  { %6038 = vrot.lane.b32.xlu1 %v4074_v59, %s8638_s13 }
 0xe6c   :  { %6192 = vrot.lane.b32.xlu1 %v4078_v29, %s8638_s13 }
 0xe70   :  { %6346 = vrot.lane.b32.xlu1 %v4082_v61, %s8638_s13 }
 0xe74   :  { %6500 = vrot.lane.b32.xlu1 %v4086_v19, %s8638_s13 }
 0xe77   :  { %v5340_v43 = vpop.xlane.xlu1 %5339 }
 0xe78   :  { %v5376_v30 = vsub.f32 %v5312_v63, %v5340_v43 }
 0xe7a   :  { %v5397_v33 = vmul.f32 1.442695, %v5376_v30 }
 0xe7b   :  { %v5346_v54 = vpop.xlane.xlu1 %5345 }
 0xe7c   :  { %8547 = vpow2.f32 %v5397_v33  ;;  %v5378_v4 = vsub.f32 %v5314_v31, %v5346_v54 }
 0xe7e   :  { %v5401_v24 = vmul.f32 1.442695, %v5378_v4 }
 0xe7f   :  { %v5352_v53 = vpop.xlane.xlu1 %5351 }
 0xe80   :  { %8549 = vpow2.f32 %v5401_v24  ;;  %v5380_v3 = vsub.f32 %v9824_v37, %v5352_v53 }
 0xe82   :  { %v5405_v39 = vmul.f32 1.442695, %v5380_v3 }
 0xe83   :  { %v5358_v49 = vpop.xlane.xlu1 %5357 }
 0xe84   :  { %v5382_v23 = vsub.f32 %v9827_v21, %v5358_v49  ;;  %8551 = vpow2.f32 %v5405_v39  ;;  %v9901_v21 = vmul.f32 0.35355338, %v9770_v46 }
 0xe86   :  { %v5409_v0 = vmul.f32 1.442695, %v5382_v23  ;;  %v5353_v32 = vsel %vm1581_vm3, %v9901_v21, -inf }
 0xe87   :  { %v5364_v63 = vpop.xlane.xlu1 %5363 }
 0xe88   :  { %v5384_v62 = vsub.f32 %v9831_v48, %v5364_v63  ;;  %8553 = vpow2.f32 %v5409_v0  ;;  %v5331_v63 = vpop.xlane.xlu0 %5330 }
 0xe89   :  { %v9894_v45 = vpop.eup %8547 }
 0xe8a   :  { %v5413_v31 = vmul.f32 1.442695, %v5384_v62  ;;  %v5434_v37 = vsel %vm1581_vm3, %v9894_v45, 0.0  ;;  %v5373_v62 = vsub.f32 %v9810_v25, %v5331_v63 }
 0xe8b   :  { %5435 = vadd.xlane.f32.xlu0 %v5434_v37  ;;  %v5370_v1 = vpop.xlane.xlu1 %5369 }
 0xe8c   :  { %8555 = vpow2.f32 %v5413_v31  ;;  %v5386_v0 = vsub.f32 %v9835_v35, %v5370_v1  ;;  %v5391_v37 = vmul.f32 1.442695, %v5373_v62  ;;  %v5430_v25 = vpop.xlane.xlu0 %5429 }
 0xe8d   :  { %v9898_v7 = vpop.eup %8549  ;;  %8557 = vrcp.f32 %v5421_v11 }
 0xe8e   :  { %v5440_v16 = vsel %vm1581_vm3, %v9898_v7, 0.0  ;;  %v5417_v31 = vmul.f32 1.442695, %v5386_v0 }
 0xe8f   :  { %5441 = vadd.xlane.f32.xlu0 %v5440_v16  ;;  %v9905_v48 = vpop.xlane.xlu1 %5423 }
 0xe91   :  { %v9909_v41 = vpop.eup %8551 }
 0xe92   :  { %v5446_v46 = vsel %vm1581_vm3, %v9909_v41, 0.0 }
 0xe93   :  { %5354 = vmax.xlane.f32.xlu0 %v5353_v32  ;;  %v5337_v12 = vpop.xlane.xlu1 %5336 }
 0xe94   :  { %v5375_v14 = vsub.f32 %v9844_v2, %v5337_v12 }
 0xe95   :  { %v9914_v59 = vpop.eup %8553 }
 0xe96   :  { %v5395_v55 = vmul.f32 1.442695, %v5375_v14  ;;  %v5452_v19 = vsel %vm1581_vm3, %v9914_v59, 0.0 }
 0xe97   :  { %5447 = vadd.xlane.f32.xlu0 %v5446_v46  ;;  %v5343_v29 = vpop.xlane.xlu1 %5342 }
 0xe98   :  { %8559 = vpow2.f32 %v5395_v55  ;;  %v5377_v15 = vsub.f32 %v9849_v26, %v5343_v29 }
 0xe99   :  { %v9919_v43 = vpop.eup %8555 }
 0xe9a   :  { %v5399_v61 = vmul.f32 1.442695, %v5377_v15  ;;  %v8558_v2 = vpop.eup %8557  ;;  %v5458_v4 = vsel %vm1581_vm3, %v9919_v43, 0.0 }
 0xe9b   :  { %5453 = vadd.xlane.f32.xlu0 %v5452_v19  ;;  %v5349_v30 = vpop.xlane.xlu1 %5348  ;;  %v5468_v26 = vmul.f32 %v8558_v2, %v9808_v60 }
 0xe9c   :  { %8561 = vpow2.f32 %v5399_v61  ;;  %v5379_v33 = vsub.f32 %v9854_v36, %v5349_v30 }
 0xe9e   :  { %v5403_v54 = vmul.f32 1.442695, %v5379_v33 }
 0xe9f   :  { %5459 = vadd.xlane.f32.xlu0 %v5458_v4  ;;  %v5500_v24 = vpop.permute.xlu1 %5499 }
 0xea0   :  { %8563 = vpow2.f32 %v5403_v54  ;;  %8279 = vmatpush3.msk.msra.mxu0 %vm1764_vm4, %v5500_v24 }
 0xea1   :  { %8281 = vmatmul.mubr.msk.f32.vlgmr.msra.gmra.mxu0 %vm1760_vm5, %v5468_v26  ;;  %8288 = vmatprep.subr.mxu0 %v8634_v27  ;;  %8565 = vpow2.f32 %v5417_v31 }
 0xea2   :  { %8290 = vmatprep.mubr.msk.f32.mxu0 %vm8635_vm2, %v8634_v27  ;;  %8567 = vpow2.f32 %v5391_v37 }
 0xea3   :  { %v5654_v53 = vpop.permute.xlu1 %5653  ;;  %8569 = vrcp.f32 %v9905_v48 }
 0xea4   :  { %8289 = vmatpush3.msk.msra.mxu0 %vm1764_vm4, %v5654_v53 }
 0xea5   :  { %v9931_v36 = vpop.eup %8559  ;;  %8298 = vmatprep.subr.mxu0 %v8634_v27 }
 0xea6   :  { %v5431_v60 = vsel %vm1581_vm3, %v9931_v36, 0.0 }
 0xea7   :  { %5432 = vadd.xlane.f32.xlu1 %v5431_v60 }
 0xea9   :  { %v9936_v3 = vpop.eup %8561 }
 0xeaa   :  { %v5437_v39 = vsel %vm1581_vm3, %v9936_v3, 0.0 }
 0xeab   :  { %5438 = vadd.xlane.f32.xlu1 %v5437_v39 }
 0xead   :  { %v9940_v49 = vpop.eup %8563 }
 0xeae   :  { %v5443_v23 = vsel %vm1581_vm3, %v9940_v49, 0.0  ;;  %v9948_v11 = vpop.eup %8565 }
 0xeaf   :  { %5444 = vadd.xlane.f32.xlu1 %v5443_v23  ;;  %v5464_v16 = vsel %vm1581_vm3, %v9948_v11, 0.0  ;;  %v9952_v32 = vpop.eup %8567 }
 0xeb0   :  { %v8570_v61 = vpop.eup %8569 }
 0xeb5   :  { %5576 = vrot.lane.b32.xlu0 %v9780_v50, %s8638_s13  ;;  %v5425_v50 = vsel %vm1581_vm3, %v9952_v32, 0.0 }
 0xed4   :  { %5465 = vadd.xlane.f32.xlu0 %v5464_v16  ;;  %v5361_v1 = vpop.xlane.xlu1 %5360 }
 0xed8   :  { %5426 = vadd.xlane.f32.xlu0 %v5425_v50 }
 0xeee   :  { %5730 = vrot.lane.b32.xlu0 %v9790_v44, %s8638_s13  ;;  %v5383_v44 = vsub.f32 %v9864_v13, %v5361_v1  ;;  %v5470_v13 = vmul.f32 %v8570_v61, %v9841_v47 }
 0xef0   :  { %v5411_v55 = vmul.f32 1.442695, %v5383_v44 }
 0xef2   :  { %5961 = vrot.lane.b32.xlu0 %v9873_v34, %s8638_s13  ;;  %v5367_v34 = vpop.xlane.xlu1 %5366 }
 0xef6   :  { %6115 = vrot.lane.b32.xlu0 %v9875_v5, %s8638_s13  ;;  %v5808_v33 = vpop.permute.xlu1 %5807 }
 0xefa   :  { %6269 = vrot.lane.b32.xlu0 %v9885_v38, %s8638_s13  ;;  %v5385_v38 = vsub.f32 %v9867_v42, %v5367_v34  ;;  %v5885_v54 = vpop.permute.xlu1 %5884 }
 0xefe   :  { %6423 = vrot.lane.b32.xlu0 %v9888_v52, %s8638_s13  ;;  %v6039_v4 = vpop.permute.xlu1 %6038 }
 0xf02   :  { %6577 = vrot.lane.b32.xlu0 %v9891_v22, %s8638_s13  ;;  %v5415_v22 = vmul.f32 1.442695, %v5385_v38  ;;  %v6193_v24 = vpop.permute.xlu1 %6192 }
 0xf06   :  { %v6347_v26 = vpop.permute.xlu1 %6346 }
 0xf0a   :  { %v6501_v53 = vpop.permute.xlu1 %6500 }
 0xf14   :  { %v5436_v35 = vpop.xlane.xlu0 %5435 }
 0xf18   :  { %v5442_v12 = vpop.xlane.xlu0 %5441 }
 0xf1c   :  { %v5355_v14 = vpop.xlane.xlu0 %5354 }
 0xf1d   :  { %v5381_v5 = vsub.f32 %v9901_v21, %v5355_v14 }
 0xf1f   :  { %v5407_v46 = vmul.f32 1.442695, %v5381_v5 }
 0xf20   :  { %v5448_v52 = vpop.xlane.xlu0 %5447 }
 0xf21   :  { %8571 = vpow2.f32 %v5407_v46 }
 0xf22   :  { %8573 = vpow2.f32 %v5411_v55 }
 0xf23   :  { %8575 = vpow2.f32 %v5415_v22 }
 0xf24   :  { %v5454_v29 = vpop.xlane.xlu0 %5453  ;;  %8577 = vrcp.f32 %v5430_v25 }
 0xf25   :  { %8579 = vrcp.f32 %v5436_v35 }
 0xf26   :  { %8581 = vrcp.f32 %v5442_v12 }
 0xf27   :  { %8583 = vrcp.f32 %v5448_v52 }
 0xf28   :  { %v5460_v15 = vpop.xlane.xlu0 %5459 }
 0xf2c   :  { %v5577_v19 = vpop.permute.xlu0 %5576 }
 0xf2d   :  { %8284 = vmatpush3.msk.msra.mxu1 %vm1764_vm4, %v5577_v19 }
 0xf2e   :  { %v9974_v48 = vpop.eup %8571  ;;  %8286 = vmatmul.mubr.msk.f32.vlgmr.msra.gmra.mxu1 %vm1760_vm5, %v5470_v13  ;;  %8293 = vmatprep.subr.mxu1 %v8634_v27 }
 0xf2f   :  { %v5449_v42 = vsel %vm1581_vm3, %v9974_v48, 0.0  ;;  %8295 = vmatprep.mubr.msk.f32.mxu1 %vm8635_vm2, %v8634_v27  ;;  %v9982_v21 = vpop.eup %8573 }
 0xf30   :  { %5450 = vadd.xlane.f32.xlu1 %v5449_v42  ;;  %v5455_v47 = vsel %vm1581_vm3, %v9982_v21, 0.0  ;;  %v9986_v30 = vpop.eup %8575  ;;  %v5433_v60 = vpop.xlane.xlu1 %5432 }
 0xf31   :  { %v5461_v2 = vsel %vm1581_vm3, %v9986_v30, 0.0  ;;  %v8578_v63 = vpop.eup %8577 }
 0xf32   :  { %v5474_v37 = vmul.f32 %v8578_v63, %v9816_v57  ;;  %v8580_v16 = vpop.eup %8579 }
 0xf33   :  { %v5478_v25 = vmul.f32 %v8580_v16, %v9894_v45  ;;  %v8582_v57 = vpop.eup %8581 }
 0xf34   :  { %5456 = vadd.xlane.f32.xlu1 %v5455_v47  ;;  %v5439_v62 = vpop.xlane.xlu1 %5438  ;;  %v5482_v35 = vmul.f32 %v8582_v57, %v9898_v7  ;;  %v8584_v1 = vpop.eup %8583 }
 0xf35   :  { %v5486_v34 = vmul.f32 %v8584_v1, %v9909_v41 }
 0xf38   :  { %5462 = vadd.xlane.f32.xlu1 %v5461_v2  ;;  %v5445_v50 = vpop.xlane.xlu1 %5444 }
 0xf49   :  { %6654 = vrot.lane.b32.xlu1 %v9882_v20, %s8638_s13 }
 0xf5d   :  { %v9992_v39 = vpop.xlane.xlu0 %5465 }
 0xf61   :  { %v5427_v23 = vpop.xlane.xlu0 %5426  ;;  %v9994_v0 = vpop.f32.mrf.mxu0 }
 0xf62   :  { %8585 = vrcp.f32 %v5427_v23 }
 0xf63   :  { %v8282_v31 = vpop.f32.mrf.mxu0  ;;  %8587 = vrcp.f32 %v5433_v60 }
 0xf64   :  { %8589 = vrcp.f32 %v5454_v29 }
 0xf65   :  { %v5731_v20 = vpop.permute.xlu0 %5730  ;;  %8591 = vrcp.f32 %v5439_v62 }
 0xf66   :  { %8294 = vmatpush3.msk.msra.mxu1 %vm1764_vm4, %v5731_v20  ;;  %8593 = vrcp.f32 %v5460_v15 }
 0xf67   :  { %8296 = vmatmul.mubr.msk.f32.vlgmr.msra.gmra.mxu1 %vm1760_vm5, %v5474_v37  ;;  %8303 = vmatprep.subr.mxu1 %v8634_v27  ;;  %8595 = vrcp.f32 %v5445_v50 }
 0xf68   :  { %8304 = vmatpush3.msk.msra.mxu1 %vm1764_vm4, %v5885_v54  ;;  %8305 = vmatprep.mubr.msk.f32.mxu1 %vm8635_vm2, %v8634_v27  ;;  %8597 = vrcp.f32 %v9992_v39 }
 0xf69   :  { %8313 = vmatprep.subr.mxu1 %v8634_v27  ;;  %v5962_v5 = vpop.permute.xlu0 %5961 }
 0xf6b   :  { %8306 = vmatmul.mubr.msk.f32.vlgmr.msra.gmra.mxu1 %vm1760_vm5, %v5478_v25 }
 0xf6c   :  { %8314 = vmatpush3.msk.msra.mxu1 %vm1764_vm4, %v6039_v4  ;;  %8315 = vmatprep.mubr.msk.f32.mxu1 %vm8635_vm2, %v8634_v27 }
 0xf6d   :  { %8323 = vmatprep.subr.mxu1 %v8634_v27  ;;  %v6116_v38 = vpop.permute.xlu0 %6115 }
 0xf6f   :  { %v8586_v12 = vpop.eup %8585  ;;  %8316 = vmatmul.mubr.msk.f32.vlgmr.msra.gmra.mxu1 %vm1760_vm5, %v5482_v35 }
 0xf70   :  { %8324 = vmatpush3.msk.msra.mxu1 %vm1764_vm4, %v6193_v24  ;;  %v5472_v45 = vmul.f32 %v8586_v12, %v9952_v32  ;;  %8325 = vmatprep.mubr.msk.f32.mxu1 %vm8635_vm2, %v8634_v27  ;;  %v8588_v44 = vpop.eup %8587 }
 0xf71   :  { %8333 = vmatprep.subr.mxu1 %v8634_v27  ;;  %v8590_v14 = vpop.eup %8589  ;;  %v5476_v7 = vmul.f32 %v8588_v44, %v9931_v36  ;;  %v6270_v52 = vpop.permute.xlu0 %6269  ;;  %v7669_v44 = vld [vmem:[%s10353_s4 + $0x30] sm:$0xff] }
 0xf72   :  { %8291 = vmatmul.mubr.msk.f32.vlgmr.msra.gmra.mxu0 %vm1760_vm5, %v5472_v45  ;;  %v8592_v32 = vpop.eup %8591  ;;  %v5490_v41 = vmul.f32 %v8590_v14, %v9914_v59  ;;  %v7670_v45 = vld [vmem:[%s10353_s4 + $0x38] sm:$0xff] }
 0xf73   :  { %8299 = vmatpush3.msk.msra.mxu0 %vm1764_vm4, %v5808_v33  ;;  %8326 = vmatmul.mubr.msk.f32.vlgmr.msra.gmra.mxu1 %vm1760_vm5, %v5486_v34  ;;  %v8594_v55 = vpop.eup %8593  ;;  %v5480_v36 = vmul.f32 %v8592_v32, %v9936_v3  ;;  %v7668_v34 = vld [vmem:[%s10353_s4 + $0x28] sm:$0xff] }
 0xf74   :  { %8334 = vmatpush3.msk.msra.mxu1 %vm1764_vm4, %v6347_v26  ;;  %8300 = vmatprep.mubr.msk.f32.mxu0 %vm8635_vm2, %v8634_v27  ;;  %v8596_v46 = vpop.eup %8595  ;;  %v5494_v59 = vmul.f32 %v8594_v55, %v9919_v43 }
 0xf75   :  { %8308 = vmatprep.subr.mxu0 %v8634_v27  ;;  %8335 = vmatprep.mubr.msk.f32.mxu1 %vm8635_vm2, %v8634_v27  ;;  %v5484_v3 = vmul.f32 %v8596_v46, %v9940_v49  ;;  %v8598_v29 = vpop.eup %8597  ;;  %v6424_v13 = vpop.permute.xlu0 %6423 }
 0xf76   :  { %8301 = vmatmul.mubr.msk.f32.vlgmr.msra.gmra.mxu0 %vm1760_vm5, %v5476_v7  ;;  %8343 = vmatprep.subr.mxu1 %v8634_v27  ;;  %v5498_v61 = vmul.f32 %v8598_v29, %v9948_v11 }
 0xf77   :  { %8309 = vmatpush3.msk.msra.mxu0 %vm1764_vm4, %v5962_v5  ;;  %8336 = vmatmul.mubr.msk.f32.vlgmr.msra.gmra.mxu1 %vm1760_vm5, %v5490_v41  ;;  %v7667_v5 = vld [vmem:[%s10353_s4 + $0x20] sm:$0xff] }
 0xf78   :  { %8344 = vmatpush3.msk.msra.mxu1 %vm1764_vm4, %v6501_v53  ;;  %8310 = vmatprep.mubr.msk.f32.mxu0 %vm8635_vm2, %v8634_v27 }
 0xf79   :  { %8318 = vmatprep.subr.mxu0 %v8634_v27  ;;  %8345 = vmatprep.mubr.msk.f32.mxu1 %vm8635_vm2, %v8634_v27  ;;  %v6578_v2 = vpop.permute.xlu0 %6577 }
 0xf7a   :  { %8311 = vmatmul.mubr.msk.f32.vlgmr.msra.gmra.mxu0 %vm1760_vm5, %v5480_v36  ;;  %8353 = vmatprep.subr.mxu1 %v8634_v27 }
 0xf7b   :  { %8319 = vmatpush3.msk.msra.mxu0 %vm1764_vm4, %v6116_v38  ;;  %8346 = vmatmul.mubr.msk.f32.vlgmr.msra.gmra.mxu1 %vm1760_vm5, %v5494_v59 }
 0xf7c   :  { %8320 = vmatprep.mubr.msk.f32.mxu0 %vm8635_vm2, %v8634_v27  ;;  %8328 = vmatprep.subr.mxu0 %v8634_v27 }
 0xf7d   :  { %8355 = vmatprep.mubr.msk.f32.mxu1 %vm8635_vm2, %v8634_v27 }
 0xf7e   :  { %8321 = vmatmul.mubr.msk.f32.vlgmr.msra.gmra.mxu0 %vm1760_vm5, %v5484_v3 }
 0xf7f   :  { %8329 = vmatpush3.msk.msra.mxu0 %vm1764_vm4, %v6270_v52  ;;  %8330 = vmatprep.mubr.msk.f32.mxu0 %vm8635_vm2, %v8634_v27 }
 0xf80   :  { %8338 = vmatprep.subr.mxu0 %v8634_v27 }
 0xfb9   :  { %v5451_v43 = vpop.xlane.xlu1 %5450 }
 0xfba   :  { %8599 = vrcp.f32 %v5451_v43 }
 0xfbd   :  { %v5457_v22 = vpop.xlane.xlu1 %5456 }
 0xfbe   :  { %8601 = vrcp.f32 %v5457_v22 }
 0xfc1   :  { %v5463_v49 = vpop.xlane.xlu1 %5462 }
 0xfc2   :  { %8603 = vrcp.f32 %v5463_v49 }
 0xfc5   :  { %v6655_v15 = vpop.permute.xlu1 %6654 }
 0xfc6   :  { %8354 = vmatpush3.msk.msra.mxu1 %vm1764_vm4, %v6655_v15 }
 0xfc7   :  { %v8600_v19 = vpop.eup %8599  ;;  %8356 = vmatmul.mubr.msk.f32.vlgmr.msra.gmra.mxu1 %vm1760_vm5, %v5498_v61 }
 0xfc8   :  { %v5488_v42 = vmul.f32 %v8600_v19, %v9974_v48 }
 0xfca   :  { %8331 = vmatmul.mubr.msk.f32.vlgmr.msra.gmra.mxu0 %vm1760_vm5, %v5488_v42 }
 0xfcb   :  { %v8602_v47 = vpop.eup %8601  ;;  %8339 = vmatpush3.msk.msra.mxu0 %vm1764_vm4, %v6424_v13  ;;  %8340 = vmatprep.mubr.msk.f32.mxu0 %vm8635_vm2, %v8634_v27 }
 0xfcc   :  { %8348 = vmatprep.subr.mxu0 %v8634_v27  ;;  %v5492_v11 = vmul.f32 %v8602_v47, %v9982_v21 }
 0xfce   :  { %8341 = vmatmul.mubr.msk.f32.vlgmr.msra.gmra.mxu0 %vm1760_vm5, %v5492_v11 }
 0xfcf   :  { %v8604_v33 = vpop.eup %8603  ;;  %8349 = vmatpush3.msk.msra.mxu0 %vm1764_vm4, %v6578_v2  ;;  %8350 = vmatprep.mubr.msk.f32.mxu0 %vm8635_vm2, %v8634_v27 }
 0xfd0   :  { %v5496_v48 = vmul.f32 %v8604_v33, %v9986_v30  ;;  %8358 = vmatprep.subr.mxu0 %v7670_v45 }
 0xfd2   :  { %8351 = vmatmul.mubr.msk.f32.vlgmr.msra.gmra.mxu0 %vm1760_vm5, %v5496_v48 }
 0xfd3   :  { %8359 = vmatpush3.msra.mxu0 %v7670_v45  ;;  %v3882_v45 = vcombine.high %v9392_v6, %v9392_v6 }
 0xfd4   :  { %8360 = vmatprep.subr.mxu0 %v7669_v44 }
 0xfd5   :  { %8361 = vmatpush3.msra.mxu0 %v7669_v44 }
 0xfd6   :  { %8362 = vmatprep.subr.mxu0 %v7668_v34 }
 0xfd7   :  { %8363 = vmatpush3.msra.mxu0 %v7668_v34 }
 0xfd8   :  { %8364 = vmatprep.subr.mxu0 %v7667_v5 }
 0xfd9   :  { %8365 = vmatpush3.msra.mxu0 %v7667_v5 }
 0xfee   :  { %v10073_v54 = vpop.f32.mrf.mxu1 }
 0xff0   :  { %v8287_v4 = vpop.f32.mrf.mxu1 }
0x1027   :  { %v10075_v24 = vpop.f32.mrf.mxu1 }
0x1029   :  { %v8297_v26 = vpop.f32.mrf.mxu1 }
0x102b   :  { %v5957_v21 = vpop.f32.mrf.mxu1 }
0x102c   :  { %6737 = vrot.lane.b32.xlu1 %v5957_v21, %s8639_s14 }
0x102d   :  { %v8307_v53 = vpop.f32.mrf.mxu1 }
0x102f   :  { %v6111_v60 = vpop.f32.mrf.mxu1 }
0x1030   :  { %6741 = vrot.lane.b32.xlu1 %v6111_v60, %s8639_s14 }
0x1031   :  { %v8317_v39 = vpop.f32.mrf.mxu1 }
0x1032   :  { %v10079_v23 = vpop.f32.mrf.mxu0 }
0x1033   :  { %v6265_v63 = vpop.f32.mrf.mxu1 }
0x1034   :  { %v8292_v30 = vpop.f32.mrf.mxu0  ;;  %6753 = vrot.lane.b32.xlu1 %v6265_v63, %s8640_s15 }
0x1035   :  { %v8327_v62 = vpop.f32.mrf.mxu1 }
0x1036   :  { %v5880_v31 = vpop.f32.mrf.mxu0 }
0x1037   :  { %v6419_v20 = vpop.f32.mrf.mxu1  ;;  %6735 = vrot.lane.b32.xlu0 %v5880_v31, %s8639_s14 }
0x1038   :  { %6757 = vrot.lane.b32.xlu1 %v6419_v20, %s8640_s15  ;;  %v8302_v37 = vpop.f32.mrf.mxu0 }
0x1039   :  { %v8337_v16 = vpop.f32.mrf.mxu1 }
0x103a   :  { %v6034_v50 = vpop.f32.mrf.mxu0  ;;  %v3881_v16 = vcombine.high %v9394_v9, %v9394_v9 }
0x103b   :  { %v6573_v25 = vpop.f32.mrf.mxu1  ;;  %6739 = vrot.lane.b32.xlu0 %v6034_v50, %s8639_s14 }
0x103c   :  { %6769 = vrot.lane.b32.xlu1 %v6573_v25, %s8641_s22  ;;  %v8312_v57 = vpop.f32.mrf.mxu0 }
0x103d   :  { %v8347_v35 = vpop.f32.mrf.mxu1 }
0x103e   :  { %v6188_v1 = vpop.f32.mrf.mxu0 }
0x103f   :  { %6751 = vrot.lane.b32.xlu0 %v6188_v1, %s8640_s15 }
0x1040   :  { %v8322_v12 = vpop.f32.mrf.mxu0 }
0x1087   :  { %v6727_v14 = vpop.f32.mrf.mxu1 }
0x1088   :  { %6773 = vrot.lane.b32.xlu1 %v6727_v14, %s8641_s22 }
0x1089   :  { %v8357_v7 = vpop.f32.mrf.mxu1 }
0x108a   :  { %v6342_v32 = vpop.f32.mrf.mxu0 }
0x108b   :  { %6755 = vrot.lane.b32.xlu0 %v6342_v32, %s8640_s15 }
0x108c   :  { %v8332_v41 = vpop.f32.mrf.mxu0 }
0x108e   :  { %v6496_v55 = vpop.f32.mrf.mxu0 }
0x108f   :  { %6767 = vrot.lane.b32.xlu0 %v6496_v55, %s8641_s22 }
0x1090   :  { %v8342_v38 = vpop.f32.mrf.mxu0 }
0x1092   :  { %v6650_v36 = vpop.f32.mrf.mxu0 }
0x1093   :  { %6771 = vrot.lane.b32.xlu0 %v6650_v36, %s8641_s22 }
0x1094   :  { %v8352_v46 = vpop.f32.mrf.mxu0 }
0x109e   :  { %v6738_v59 = vpop.permute.xlu1 %6737 }
0x109f   :  { %v6780_v19 = vsel %vm57_vm0, %v10073_v54, %v6738_v59 }
0x10a2   :  { %v6742_v3 = vpop.permute.xlu1 %6741 }
0x10a3   :  { %v6782_v26 = vsel %vm57_vm0, %v10075_v24, %v6742_v3  ;;  %v10124_v24 = vld [vmem:[%s10352_s8 + $0x10] sm:$0xff] }
0x10a6   :  { %v6754_v43 = vpop.permute.xlu1 %6753 }
0x10a7   :  { %v6784_v42 = vsel %vm3044_vm6, %v6780_v19, %v6754_v43 }
0x10a9   :  { %v6736_v52 = vpop.permute.xlu0 %6735 }
0x10aa   :  { %v6758_v49 = vpop.permute.xlu1 %6757  ;;  %v6779_v13 = vsel %vm57_vm0, %v9994_v0, %v6736_v52 }
0x10ab   :  { %v6786_v21 = vsel %vm3044_vm6, %v6782_v26, %v6758_v49 }
0x10ad   :  { %v6740_v22 = vpop.permute.xlu0 %6739 }
0x10ae   :  { %v6770_v61 = vpop.permute.xlu1 %6769  ;;  %v6781_v54 = vsel %vm57_vm0, %v10079_v23, %v6740_v22  ;;  %v6799_v23 = vrot.slane %v10124_v24, %v9267_v58 }
0x10af   :  { %v6788_v2 = vsel %vm3049_vm7, %v6784_v42, %v6770_v61  ;;  %v7676_v42 = vld [vmem:[%s10354_s5 + $0x38] sm:$0xff] }
0x10b0   :  { %v6807_v30 = vcombine.low %v6799_v23, %v6799_v23  ;;  %8369 = vmatprep.subr.mxu1 %v7676_v42 }
0x10b1   :  { %v6752_v29 = vpop.permute.xlu0 %6751  ;;  %8370 = vmatpush3.msra.mxu1 %v7676_v42 }
0x10b2   :  { %v6783_v47 = vsel %vm3044_vm6, %v6779_v13, %v6752_v29 }
0x10fa   :  { %v6774_v48 = vpop.permute.xlu1 %6773 }
0x10fb   :  { %v6790_v60 = vsel %vm3049_vm7, %v6786_v21, %v6774_v48  ;;  %v7685_v48 = vld [vmem:[%s10355_s6 + $0x70] sm:$0xff] }
0x10fd   :  { %v6756_v15 = vpop.permute.xlu0 %6755 }
0x10fe   :  { %v6785_v0 = vsel %vm3044_vm6, %v6781_v54, %v6756_v15 }
0x1101   :  { %v6768_v11 = vpop.permute.xlu0 %6767 }
0x1102   :  { %v6787_v33 = vsel %vm3049_vm7, %v6783_v47, %v6768_v11  ;;  %v7675_v47 = vld [vmem:[%s10354_s5 + $0x30] sm:$0xff]  ;;  %v7674_v11 = vld [vmem:[%s10354_s5 + $0x28] sm:$0xff] }
0x1103   :  { %v6804_v4 = vcombine.low %v6787_v33, %v6788_v2  ;;  %8371 = vmatprep.subr.mxu1 %v7675_v47  ;;  %v7673_v2 = vld [vmem:[%s10354_s5 + $0x20] sm:$0xff]  ;;  %v7686_v33 = vld [vmem:[%s10355_s6 + $0x78] sm:$0xff] }
0x1104   :  { %8372 = vmatpush3.msra.mxu1 %v7675_v47  ;;  %8380 = vmatprep.subr.mxu0 %v7686_v33 }
0x1105   :  { %v6772_v53 = vpop.permute.xlu0 %6771  ;;  %8366 = vmatprep.mubr.msk.f32.mxu0 %vm147_vm1, %v6804_v4  ;;  %8373 = vmatprep.subr.mxu1 %v7674_v11 }
0x1106   :  { %v6789_v39 = vsel %vm3049_vm7, %v6785_v0, %v6772_v53  ;;  %8374 = vmatpush3.msra.mxu1 %v7674_v11 }
0x1107   :  { %v6805_v63 = vcombine.low %v6789_v39, %v6790_v60  ;;  %8375 = vmatprep.subr.mxu1 %v7673_v2 }
0x1108   :  { %8376 = vmatpush3.msra.mxu1 %v7673_v2 }
0x1109   :  { %8367 = vmatmul.mubr.msk.f32.vlgmr.msra.gmra.mxu0 %vm147_vm1, %v6805_v63  ;;  %8399 = vmatprep.subr.mxu1 %v8634_v27 }
0x110a   :  { %8381 = vmatpush3.msra.mxu0 %v7686_v33 }
0x110b   :  { %8382 = vmatprep.subr.mxu0 %v7685_v48 }
0x110c   :  { %8383 = vmatpush3.msra.mxu0 %v7685_v48 }
0x11c9   :  { %v8368_v62 = vpop.f32.mrf.mxu0 }
0x11ca   :  { %v6885_v20 = vadd.f32 %v8368_v62, %v6807_v30 }
0x11cb   :  { %v6879_v31 = vpop.f32.mrf.mxu0 }
0x11cc   :  { %v6880_v37 = vadd.f32 %v6879_v31, %v6807_v30  ;;  %v6891_v57 = vcombine.high %v6885_v20, %v6885_v20  ;;  %v6896_v35 = vadd.f32 %v6885_v20, %v9392_v6  ;;  %v6953_v31 = vrot.slane %v10124_v24, %v9310_v56 }
0x11ce   :  { %v6890_v50 = vcombine.high %v6880_v37, %v6880_v37  ;;  %v6894_v25 = vadd.f32 %v6880_v37, %v9394_v9  ;;  %v6904_v34 = vsel %vm3160_vm8, %v6896_v35, 0.0  ;;  %v6897_v14 = vadd.f32 %v6891_v57, %v3882_v45 }
0x11cf   :  { %v6961_v57 = vrot.slane %v10124_v24, %v3224_v40  ;;  %v7684_v40 = vld [vmem:[%s10355_s6 + $0x68] sm:$0xff] }
0x11d0   :  { %v6898_v1 = vsel %vm3160_vm8, %v6894_v25, 0.0  ;;  %v6895_v12 = vadd.f32 %v6890_v50, %v3881_v16  ;;  %v6907_v5 = vsel %vm3160_vm8, %v6897_v14, 0.0  ;;  %8384 = vmatprep.subr.mxu0 %v7684_v40 }
0x11d1   :  { %6899 = vadd.xlane.f32.xlu0 %v6898_v1  ;;  %8385 = vmatpush3.msra.mxu0 %v7684_v40 }
0x11d2   :  { %v6901_v44 = vsel %vm3160_vm8, %v6895_v12, 0.0 }
0x11d3   :  { %6902 = vadd.xlane.f32.xlu1 %v6901_v44 }
0x11d5   :  { %6905 = vadd.xlane.f32.xlu0 %v6904_v34 }
0x11d9   :  { %6908 = vadd.xlane.f32.xlu0 %v6907_v5 }
0x125a   :  { %v6900_v9 = vpop.xlane.xlu0 %6899 }
0x125b   :  { %v6910_v7 = vmul.f32 0.03125, %v6900_v9 }
0x125c   :  { %v6903_v32 = vpop.xlane.xlu1 %6902 }
0x125d   :  { %v6914_v41 = vsub.f32 %v6894_v25, %v6910_v7  ;;  %v6911_v55 = vmul.f32 0.03125, %v6903_v32 }
0x125e   :  { %v6906_v38 = vpop.xlane.xlu0 %6905 }
0x125f   :  { %v6915_v36 = vsub.f32 %v6895_v12, %v6911_v55  ;;  %v6912_v46 = vmul.f32 0.03125, %v6906_v38  ;;  %v6918_v59 = vmul.f32 %v6914_v41, %v6914_v41  ;;  %v7683_v38 = vld [vmem:[%s10355_s6 + $0x60] sm:$0xff] }
0x1260   :  { %8386 = vmatprep.subr.mxu0 %v7683_v38 }
0x1261   :  { %v6916_v6 = vsub.f32 %v6896_v35, %v6912_v46  ;;  %v6922_v3 = vsel %vm3160_vm8, %v6918_v59, 0.0  ;;  %v6919_v52 = vmul.f32 %v6915_v36, %v6915_v36  ;;  %8387 = vmatpush3.msra.mxu0 %v7683_v38  ;;  %v7681_v46 = vld [vmem:[%s10355_s6 + $0x50] sm:$0xff]  ;;  %v7680_v59 = vld [vmem:[%s10355_s6 + $0x48] sm:$0xff] }
0x1262   :  { %v6909_v43 = vpop.xlane.xlu0 %6908  ;;  %6923 = vadd.xlane.f32.xlu1 %v6922_v3  ;;  %v6974_v3 = vrot.slane %v10124_v24, %v3236_v17  ;;  %v7085_v17 = vrot.slane %v10124_v24, %v3346_v18 }
0x1263   :  { %v6913_v22 = vmul.f32 0.03125, %v6909_v43  ;;  %v6925_v49 = vsel %vm3160_vm8, %v6919_v52, 0.0  ;;  %v6920_v29 = vmul.f32 %v6916_v6, %v6916_v6 }
0x1264   :  { %6926 = vadd.xlane.f32.xlu0 %v6925_v49  ;;  %v6982_v52 = vcombine.low %v6974_v3, %v6974_v3  ;;  %v7093_v33 = vcombine.low %v7085_v17, %v7085_v17 }
0x1265   :  { %v6917_v15 = vsub.f32 %v6897_v14, %v6913_v22  ;;  %v6928_v61 = vsel %vm3160_vm8, %v6920_v29, 0.0 }
0x1266   :  { %6929 = vadd.xlane.f32.xlu1 %v6928_v61 }
0x1267   :  { %v6921_v19 = vmul.f32 %v6917_v15, %v6917_v15 }
0x1269   :  { %v6931_v13 = vsel %vm3160_vm8, %v6921_v19, 0.0 }
0x126a   :  { %6932 = vadd.xlane.f32.xlu0 %v6931_v13 }
0x12eb   :  { %v6924_v4 = vpop.xlane.xlu1 %6923 }
0x12ec   :  { %v6934_v26 = vmul.f32 0.03125, %v6924_v4 }
0x12ed   :  { %v6927_v54 = vpop.xlane.xlu0 %6926 }
0x12ee   :  { %v6938_v21 = vadd.f32 1e-05, %v6934_v26  ;;  %v6935_v0 = vmul.f32 0.03125, %v6927_v54 }
0x12ef   :  { %v6930_v53 = vpop.xlane.xlu1 %6929 }
0x12f0   :  { %8605 = vrsqrt.f32 %v6938_v21  ;;  %v6939_v60 = vadd.f32 1e-05, %v6935_v0  ;;  %v6936_v39 = vmul.f32 0.03125, %v6930_v53 }
0x12f2   :  { %8607 = vrsqrt.f32 %v6939_v60  ;;  %v6940_v63 = vadd.f32 1e-05, %v6936_v39 }
0x12f3   :  { %v6933_v23 = vpop.xlane.xlu0 %6932 }
0x12f4   :  { %8609 = vrsqrt.f32 %v6940_v63  ;;  %v6937_v30 = vmul.f32 0.03125, %v6933_v23 }
0x12f6   :  { %v6941_v62 = vadd.f32 1e-05, %v6937_v30 }
0x12f8   :  { %8611 = vrsqrt.f32 %v6941_v62 }
0x12fd   :  { %v8606_v20 = vpop.eup %8605 }
0x12fe   :  { %v6946_v37 = vmul.f32 %v8606_v20, %v6914_v41 }
0x12ff   :  { %v8608_v16 = vpop.eup %8607 }
0x1300   :  { %v6947_v50 = vmul.f32 %v8608_v16, %v6915_v36  ;;  %v6954_v25 = vmul.f32 %v6953_v31, %v6946_v37  ;;  %v7682_v36 = vld [vmem:[%s10355_s6 + $0x58] sm:$0xff] }
0x1301   :  { %v8610_v35 = vpop.eup %8609  ;;  %8388 = vmatprep.subr.mxu0 %v7682_v36 }
0x1302   :  { %v6948_v1 = vmul.f32 %v8610_v35, %v6916_v6  ;;  %v6955_v12 = vmul.f32 %v6953_v31, %v6947_v50  ;;  %v6962_v45 = vadd.f32 %v6961_v57, %v6954_v25  ;;  %8389 = vmatpush3.msra.mxu0 %v7682_v36  ;;  %v7679_v6 = vld [vmem:[%s10355_s6 + $0x40] sm:$0xff] }
0x1303   :  { %8390 = vmatprep.subr.mxu0 %v7681_v46 }
0x1304   :  { %v6963_v44 = vadd.f32 %v6961_v57, %v6955_v12  ;;  %v6956_v9 = vmul.f32 %v6953_v31, %v6948_v1  ;;  %8391 = vmatpush3.msra.mxu0 %v7681_v46 }
0x1305   :  { %v8612_v34 = vpop.eup %8611  ;;  %8392 = vmatprep.subr.mxu0 %v7680_v59 }
0x1306   :  { %v6949_v14 = vmul.f32 %v8612_v34, %v6917_v15  ;;  %v6979_v5 = vcombine.low %v6962_v45, %v6963_v44  ;;  %v6964_v32 = vadd.f32 %v6961_v57, %v6956_v9  ;;  %8393 = vmatpush3.msra.mxu0 %v7680_v59 }
0x1307   :  { %8394 = vmatprep.subr.mxu0 %v7679_v6 }
0x1308   :  { %8377 = vmatprep.mubr.msk.f32.mxu1 %vm147_vm1, %v6979_v5  ;;  %v6957_v7 = vmul.f32 %v6953_v31, %v6949_v14  ;;  %8395 = vmatpush3.msra.mxu0 %v7679_v6 }
0x130a   :  { %v6965_v41 = vadd.f32 %v6961_v57, %v6957_v7 }
0x130c   :  { %v6980_v55 = vcombine.low %v6964_v32, %v6965_v41 }
0x130e   :  { %8378 = vmatmul.mubr.msk.f32.vlgmr.msra.gmra.mxu1 %vm147_vm1, %v6980_v55 }
0x130f   :  { %8431 = vmatprep.mubr.msk.f32.mxu1 %vm8635_vm2, %v8634_v27 }
0x13ce   :  { %v8379_v43 = vpop.f32.mrf.mxu1 }
0x13cf   :  { %v7060_v22 = vadd.f32 %v8379_v43, %v6982_v52 }
0x13d0   :  { %v7054_v49 = vpop.f32.mrf.mxu1 }
0x13d1   :  { %v7066_v29 = vcombine.high %v7060_v22, %v7060_v22  ;;  %v7055_v15 = vadd.f32 %v7054_v49, %v6982_v52  ;;  %v7071_v47 = vmax.f32 %v7060_v22, 0.0  ;;  %v10207_v49 = vld [vmem:[%s10352_s8 + $0x18] sm:$0xff] }
0x13d3   :  { %v7065_v61 = vcombine.high %v7055_v15, %v7055_v15  ;;  %v7072_v19 = vmax.f32 %v7066_v29, 0.0  ;;  %v7069_v13 = vmax.f32 %v7055_v15, 0.0  ;;  %v7239_v29 = vrot.slane %v10207_v49, %v8775_v28 }
0x13d5   :  { %v7070_v42 = vmax.f32 %v7065_v61, 0.0  ;;  %v7091_v2 = vcombine.low %v7071_v47, %v7072_v19  ;;  %v7247_v19 = vrot.slane %v10207_v49, %v8723_v10 }
0x13d7   :  { %v7090_v11 = vcombine.low %v7069_v13, %v7070_v42 }
0x13d9   :  { %8396 = vmatprep.mubr.msk.f32.mxu0 %vm3357_vm9, %v7090_v11 }
0x13da   :  { %8397 = vmatmul.mubr.msk.f32.vlgmr.msra.gmra.mxu0 %vm3357_vm9, %v7091_v2 }
0x149a   :  { %v8398_v48 = vpop.f32.mrf.mxu0 }
0x149b   :  { %v7171_v4 = vadd.f32 %v8398_v48, %v7093_v33 }
0x149c   :  { %v7165_v26 = vpop.f32.mrf.mxu0 }
0x149d   :  { %v7166_v54 = vadd.f32 %v7165_v26, %v7093_v33  ;;  %v7177_v21 = vcombine.high %v7171_v4, %v7171_v4  ;;  %v7182_v60 = vadd.f32 %v7171_v4, %v6964_v32 }
0x149f   :  { %v7176_v0 = vcombine.high %v7166_v54, %v7166_v54  ;;  %v7180_v53 = vadd.f32 %v7166_v54, %v6962_v45  ;;  %v7183_v30 = vadd.f32 %v7177_v21, %v6965_v41  ;;  %v7190_v8 = vsel %vm3160_vm8, %v7182_v60, 0.0 }
0x14a1   :  { %v7184_v39 = vsel %vm3160_vm8, %v7180_v53, 0.0  ;;  %v7181_v63 = vadd.f32 %v7176_v0, %v6963_v44  ;;  %v7193_v18 = vsel %vm3160_vm8, %v7183_v30, 0.0 }
0x14a2   :  { %7185 = vadd.xlane.f32.xlu1 %v7184_v39 }
0x14a3   :  { %v7187_v23 = vsel %vm3160_vm8, %v7181_v63, 0.0 }
0x14a4   :  { %7188 = vadd.xlane.f32.xlu0 %v7187_v23 }
0x14a6   :  { %7191 = vadd.xlane.f32.xlu1 %v7190_v8 }
0x14a8   :  { %7194 = vadd.xlane.f32.xlu0 %v7193_v18 }
0x152b   :  { %v7186_v24 = vpop.xlane.xlu1 %7185 }
0x152c   :  { %v7196_v62 = vmul.f32 0.03125, %v7186_v24 }
0x152d   :  { %v7189_v31 = vpop.xlane.xlu0 %7188 }
0x152e   :  { %v7200_v20 = vsub.f32 %v7180_v53, %v7196_v62  ;;  %v7197_v37 = vmul.f32 0.03125, %v7189_v31 }
0x152f   :  { %v7192_v16 = vpop.xlane.xlu1 %7191 }
0x1530   :  { %v7201_v50 = vsub.f32 %v7181_v63, %v7197_v37  ;;  %v7198_v25 = vmul.f32 0.03125, %v7192_v16  ;;  %v7204_v57 = vmul.f32 %v7200_v20, %v7200_v20 }
0x1531   :  { %v7195_v35 = vpop.xlane.xlu0 %7194 }
0x1532   :  { %v7202_v1 = vsub.f32 %v7182_v60, %v7198_v25  ;;  %v7199_v12 = vmul.f32 0.03125, %v7195_v35  ;;  %v7208_v45 = vsel %vm3160_vm8, %v7204_v57, 0.0  ;;  %v7205_v44 = vmul.f32 %v7201_v50, %v7201_v50 }
0x1533   :  { %7209 = vadd.xlane.f32.xlu1 %v7208_v45 }
0x1534   :  { %v7203_v34 = vsub.f32 %v7183_v30, %v7199_v12  ;;  %v7211_v14 = vsel %vm3160_vm8, %v7205_v44, 0.0  ;;  %v7206_v5 = vmul.f32 %v7202_v1, %v7202_v1 }
0x1535   :  { %7212 = vadd.xlane.f32.xlu0 %v7211_v14 }
0x1536   :  { %v7214_v9 = vsel %vm3160_vm8, %v7206_v5, 0.0  ;;  %v7207_v7 = vmul.f32 %v7203_v34, %v7203_v34 }
0x1537   :  { %7215 = vadd.xlane.f32.xlu1 %v7214_v9  ;;  %v7704_v9 = vld [vmem:[%s10356_s7 + $0xf8] sm:$0xff] }
0x1538   :  { %v7217_v32 = vsel %vm3160_vm8, %v7207_v7, 0.0  ;;  %v7703_v7 = vld [vmem:[%s10356_s7 + $0xf0] sm:$0xff]  ;;  %8400 = vmatpush3.msra.mxu1 %v7704_v9 }
0x1539   :  { %7218 = vadd.xlane.f32.xlu0 %v7217_v32  ;;  %8401 = vmatprep.subr.mxu1 %v8634_v27  ;;  %v7702_v32 = vld [vmem:[%s10356_s7 + $0xe8] sm:$0xff] }
0x153a   :  { %8402 = vmatpush3.msra.mxu1 %v7703_v7 }
0x153b   :  { %8403 = vmatprep.subr.mxu1 %v8634_v27 }
0x153c   :  { %8404 = vmatpush3.msra.mxu1 %v7702_v32 }
0x153d   :  { %8405 = vmatprep.subr.mxu1 %v8634_v27 }
0x15bc   :  { %v7210_v41 = vpop.xlane.xlu1 %7209 }
0x15bd   :  { %v7220_v55 = vmul.f32 0.03125, %v7210_v41  ;;  %v7701_v41 = vld [vmem:[%s10356_s7 + $0xe0] sm:$0xff] }
0x15be   :  { %v7213_v40 = vpop.xlane.xlu0 %7212  ;;  %8406 = vmatpush3.msra.mxu1 %v7701_v41 }
0x15bf   :  { %v7224_v38 = vadd.f32 1e-05, %v7220_v55  ;;  %v7221_v36 = vmul.f32 0.03125, %v7213_v40  ;;  %v7700_v55 = vld [vmem:[%s10356_s7 + $0xd8] sm:$0xff]  ;;  %8407 = vmatprep.subr.mxu1 %v8634_v27  ;;  %v7699_v40 = vld [vmem:[%s10356_s7 + $0xd0] sm:$0xff] }
0x15c0   :  { %v7216_v46 = vpop.xlane.xlu1 %7215  ;;  %8408 = vmatpush3.msra.mxu1 %v7700_v55 }
0x15c1   :  { %8613 = vrsqrt.f32 %v7224_v38  ;;  %v7225_v59 = vadd.f32 1e-05, %v7221_v36  ;;  %v7222_v6 = vmul.f32 0.03125, %v7216_v46  ;;  %8409 = vmatprep.subr.mxu1 %v8634_v27  ;;  %v7698_v38 = vld [vmem:[%s10356_s7 + $0xc8] sm:$0xff]  ;;  %v7697_v36 = vld [vmem:[%s10356_s7 + $0xc0] sm:$0xff]  ;;  %v7696_v46 = vld [vmem:[%s10356_s7 + $0xb8] sm:$0xff] }
0x15c2   :  { %v7219_v3 = vpop.xlane.xlu0 %7218  ;;  %8410 = vmatpush3.msra.mxu1 %v7699_v40 }
0x15c3   :  { %8615 = vrsqrt.f32 %v7225_v59  ;;  %v7226_v52 = vadd.f32 1e-05, %v7222_v6  ;;  %v7223_v43 = vmul.f32 0.03125, %v7219_v3  ;;  %8411 = vmatprep.subr.mxu1 %v8634_v27  ;;  %v7695_v59 = vld [vmem:[%s10356_s7 + $0xb0] sm:$0xff]  ;;  %v7694_v6 = vld [vmem:[%s10356_s7 + $0xa8] sm:$0xff]  ;;  %v7693_v3 = vld [vmem:[%s10356_s7 + $0xa0] sm:$0xff] }
0x15c4   :  { %8412 = vmatpush3.msra.mxu1 %v7698_v38 }
0x15c5   :  { %8617 = vrsqrt.f32 %v7226_v52  ;;  %v7227_v22 = vadd.f32 1e-05, %v7223_v43  ;;  %8413 = vmatprep.subr.mxu1 %v8634_v27  ;;  %v7692_v52 = vld [vmem:[%s10356_s7 + $0x98] sm:$0xff] }
0x15c6   :  { %8414 = vmatpush3.msra.mxu1 %v7697_v36 }
0x15c7   :  { %8619 = vrsqrt.f32 %v7227_v22  ;;  %8415 = vmatprep.subr.mxu1 %v8634_v27 }
0x15c8   :  { %8416 = vmatpush3.msra.mxu1 %v7696_v46 }
0x15c9   :  { %8417 = vmatprep.subr.mxu1 %v8634_v27 }
0x15ca   :  { %8418 = vmatpush3.msra.mxu1 %v7695_v59 }
0x15cb   :  { %8419 = vmatprep.subr.mxu1 %v8634_v27 }
0x15cc   :  { %8420 = vmatpush3.msra.mxu1 %v7694_v6 }
0x15cd   :  { %8421 = vmatprep.subr.mxu1 %v8634_v27 }
0x15ce   :  { %v8614_v15 = vpop.eup %8613  ;;  %8422 = vmatpush3.msra.mxu1 %v7693_v3 }
0x15cf   :  { %v7232_v61 = vmul.f32 %v8614_v15, %v7200_v20  ;;  %8423 = vmatprep.subr.mxu1 %v8634_v27 }
0x15d0   :  { %v8616_v13 = vpop.eup %8615  ;;  %8424 = vmatpush3.msra.mxu1 %v7692_v52 }
0x15d1   :  { %v7240_v42 = vmul.f32 %v7239_v29, %v7232_v61  ;;  %v7233_v47 = vmul.f32 %v8616_v13, %v7201_v50  ;;  %8425 = vmatprep.subr.mxu1 %v8634_v27 }
0x15d2   :  { %v8618_v11 = vpop.eup %8617 }
0x15d3   :  { %v7248_v2 = vadd.f32 %v7247_v19, %v7240_v42  ;;  %v7241_v17 = vmul.f32 %v7239_v29, %v7233_v47  ;;  %v7234_v33 = vmul.f32 %v8618_v11, %v7202_v1 }
0x15d4   :  { %v8620_v48 = vpop.eup %8619 }
0x15d5   :  { %v7252_v4 = vsel %vm3160_vm8, %v7248_v2, 0.0  ;;  %v7249_v26 = vadd.f32 %v7247_v19, %v7241_v17  ;;  %v7242_v54 = vmul.f32 %v7239_v29, %v7234_v33  ;;  %v7235_v21 = vmul.f32 %v8620_v48, %v7203_v34 }
0x15d6   :  { %7253 = vadd.xlane.f32.xlu1 %v7252_v4  ;;  %v7307_v33 = vrot.slane %v10207_v49, %v8825_v51  ;;  %v7315_v4 = vrot.slane %v10207_v49, %v9267_v58 }
0x15d7   :  { %v7255_v0 = vsel %vm3160_vm8, %v7249_v26, 0.0  ;;  %v7250_v53 = vadd.f32 %v7247_v19, %v7242_v54  ;;  %v7243_v60 = vmul.f32 %v7239_v29, %v7235_v21 }
0x15d8   :  { %7256 = vadd.xlane.f32.xlu0 %v7255_v0 }
0x15d9   :  { %v7258_v39 = vsel %vm3160_vm8, %v7250_v53, 0.0  ;;  %v7251_v63 = vadd.f32 %v7247_v19, %v7243_v60  ;;  %v7690_v60 = vld [vmem:[%s10356_s7 + $0x88] sm:$0xff] }
0x15da   :  { %7259 = vadd.xlane.f32.xlu1 %v7258_v39 }
0x15db   :  { %v7261_v23 = vsel %vm3160_vm8, %v7251_v63, 0.0 }
0x15dc   :  { %7262 = vadd.xlane.f32.xlu0 %v7261_v23 }
0x165f   :  { %v7254_v30 = vpop.xlane.xlu1 %7253 }
0x1660   :  { %v7264_v8 = vmul.f32 0.03125, %v7254_v30 }
0x1661   :  { %v7257_v18 = vpop.xlane.xlu0 %7256 }
0x1662   :  { %v10217_v24 = vsub.f32 %v7248_v2, %v7264_v8  ;;  %v7265_v62 = vmul.f32 0.03125, %v7257_v18 }
0x1663   :  { %v7260_v31 = vpop.xlane.xlu1 %7259 }
0x1664   :  { %v10219_v20 = vsub.f32 %v7249_v26, %v7265_v62  ;;  %v7266_v37 = vmul.f32 0.03125, %v7260_v31  ;;  %v7272_v16 = vmul.f32 %v10217_v24, %v10217_v24  ;;  %v7689_v31 = vld [vmem:[%s10356_s7 + $0x80] sm:$0xff] }
0x1665   :  { %v7263_v50 = vpop.xlane.xlu0 %7262 }
0x1666   :  { %v10223_v25 = vsub.f32 %v7250_v53, %v7266_v37  ;;  %v7267_v57 = vmul.f32 0.03125, %v7263_v50  ;;  %v7276_v35 = vsel %vm3160_vm8, %v7272_v16, 0.0  ;;  %v7273_v1 = vmul.f32 %v10219_v20, %v10219_v20  ;;  %v7691_v53 = vld [vmem:[%s10356_s7 + $0x90] sm:$0xff] }
0x1667   :  { %7277 = vadd.xlane.f32.xlu1 %v7276_v35  ;;  %8426 = vmatpush3.msra.mxu1 %v7691_v53 }
0x1668   :  { %v10228_v12 = vsub.f32 %v7251_v63, %v7267_v57  ;;  %v7279_v45 = vsel %vm3160_vm8, %v7273_v1, 0.0  ;;  %v7274_v44 = vmul.f32 %v10223_v25, %v10223_v25  ;;  %8427 = vmatprep.subr.mxu1 %v8634_v27 }
0x1669   :  { %7280 = vadd.xlane.f32.xlu0 %v7279_v45  ;;  %8428 = vmatpush3.msra.mxu1 %v7690_v60 }
0x166a   :  { %v7282_v34 = vsel %vm3160_vm8, %v7274_v44, 0.0  ;;  %v7275_v14 = vmul.f32 %v10228_v12, %v10228_v12  ;;  %8429 = vmatprep.subr.mxu1 %v8634_v27 }
0x166b   :  { %7283 = vadd.xlane.f32.xlu1 %v7282_v34  ;;  %8430 = vmatpush3.msra.mxu1 %v7689_v31 }
0x166c   :  { %v7285_v5 = vsel %vm3160_vm8, %v7275_v14, 0.0 }
0x166d   :  { %7286 = vadd.xlane.f32.xlu0 %v7285_v5 }
0x16f0   :  { %v7278_v43 = vpop.xlane.xlu1 %7277 }
0x16f1   :  { %v7288_v22 = vmul.f32 0.03125, %v7278_v43 }
0x16f2   :  { %v7281_v29 = vpop.xlane.xlu0 %7280 }
0x16f3   :  { %v7292_v15 = vadd.f32 1e-05, %v7288_v22  ;;  %v7289_v61 = vmul.f32 0.03125, %v7281_v29 }
0x16f4   :  { %v7284_v19 = vpop.xlane.xlu1 %7283 }
0x16f5   :  { %8621 = vrsqrt.f32 %v7292_v15  ;;  %v7293_v13 = vadd.f32 1e-05, %v7289_v61  ;;  %v7290_v42 = vmul.f32 0.03125, %v7284_v19  ;;  %v7433_v19 = vrot.slane %v10207_v49, %v9310_v56 }
0x16f6   :  { %v7287_v47 = vpop.xlane.xlu0 %7286 }
0x16f7   :  { %8623 = vrsqrt.f32 %v7293_v13  ;;  %v7294_v11 = vadd.f32 1e-05, %v7290_v42  ;;  %v7291_v2 = vmul.f32 0.03125, %v7287_v47 }
0x16f9   :  { %8625 = vrsqrt.f32 %v7294_v11  ;;  %v7295_v17 = vadd.f32 1e-05, %v7291_v2 }
0x16fb   :  { %8627 = vrsqrt.f32 %v7295_v17 }
0x1702   :  { %v8622_v48 = vpop.eup %8621 }
0x1703   :  { %v7300_v26 = vmul.f32 %v8622_v48, %v10217_v24 }
0x1704   :  { %v8624_v54 = vpop.eup %8623 }
0x1705   :  { %v7308_v21 = vmul.f32 %v7307_v33, %v7300_v26  ;;  %v7301_v0 = vmul.f32 %v8624_v54, %v10219_v20 }
0x1706   :  { %v8626_v39 = vpop.eup %8625 }
0x1707   :  { %v7316_v63 = vadd.f32 %v7315_v4, %v7308_v21  ;;  %v7309_v23 = vmul.f32 %v7307_v33, %v7301_v0  ;;  %v7302_v30 = vmul.f32 %v8626_v39, %v10223_v25 }
0x1708   :  { %v8628_v8 = vpop.eup %8627 }
0x1709   :  { %v7317_v18 = vadd.f32 %v7315_v4, %v7309_v23  ;;  %v7310_v24 = vmul.f32 %v7307_v33, %v7302_v30  ;;  %v7303_v62 = vmul.f32 %v8628_v8, %v10228_v12  ;;  %v7369_v20 = vrot.slane %v7316_v63, %v8825_v51 }
0x170a   :  { %v7347_v37 = vrot.slane %v7316_v63, %v8723_v10  ;;  %v7391_v35 = vrot.slane %v7316_v63, %v9267_v58  ;;  %v7327_v27 = vrot.slane %v7316_v63, %v8775_v28 }
0x170b   :  { %v7311_v16 = vmul.f32 %v7307_v33, %v7303_v62  ;;  %v7318_v50 = vadd.f32 %v7315_v4, %v7310_v24  ;;  %v7373_v25 = vrot.slane %v7317_v18, %v8825_v51  ;;  %v7351_v57 = vrot.slane %v7317_v18, %v8723_v10 }
0x170c   :  { %v7395_v1 = vrot.slane %v7317_v18, %v9267_v58  ;;  %v7331_v12 = vrot.slane %v7317_v18, %v8775_v28 }
0x170d   :  { %v7319_v45 = vadd.f32 %v7315_v4, %v7311_v16  ;;  %v7377_v44 = vrot.slane %v7318_v50, %v8825_v51  ;;  %v7382_v34 = vsel %vm3603_vm10, %v7373_v25, %v7369_v20  ;;  %v7355_v14 = vrot.slane %v7318_v50, %v8723_v10 }
0x170e   :  { %v7360_v5 = vsel %vm3603_vm10, %v7351_v57, %v7347_v37  ;;  %v7399_v9 = vrot.slane %v7318_v50, %v9267_v58  ;;  %v7404_v7 = vsel %vm3603_vm10, %v7395_v1, %v7391_v35  ;;  %v7335_v32 = vrot.slane %v7318_v50, %v8775_v28 }
0x170f   :  { %v7381_v41 = vrot.slane %v7319_v45, %v8825_v51  ;;  %v7383_v55 = vsel %vm3605_vm11, %v7377_v44, %v7382_v34  ;;  %v7359_v40 = vrot.slane %v7319_v45, %v8723_v10  ;;  %v7361_v38 = vsel %vm3605_vm11, %v7355_v14, %v7360_v5 }
0x1710   :  { %v7340_v36 = vsel %vm3603_vm10, %v7331_v12, %v7327_v27  ;;  %v7339_v46 = vrot.slane %v7319_v45, %v8775_v28  ;;  %v7403_v3 = vrot.slane %v7319_v45, %v9267_v58  ;;  %v7405_v10 = vsel %vm3605_vm11, %v7399_v9, %v7404_v7 }
0x1711   :  { %v7384_v59 = vsel %vm3607_vm12, %v7381_v41, %v7383_v55  ;;  %v7362_v6 = vsel %vm3607_vm12, %v7359_v40, %v7361_v38  ;;  %v7341_v52 = vsel %vm3605_vm11, %v7335_v32, %v7340_v36 }
0x1712   :  { %7385 = vrot.lane.b32.xlu0 %v7384_v59, %s8638_s13  ;;  %7363 = vrot.lane.b32.xlu1 %v7362_v6, %s8631_s25  ;;  %v7342_v51 = vsel %vm3607_vm12, %v7339_v46, %v7341_v52  ;;  %v7406_v43 = vsel %vm3607_vm12, %v7403_v3, %v7405_v10 }
0x1716   :  { %7407 = vrot.lane.b32.xlu1 %v7406_v43, %s8637_s12 }
0x1784   :  { %v7364_v28 = vpop.permute.xlu1 %7363  ;;  %v7386_v22 = vpop.permute.xlu0 %7385 }
0x1785   :  { %v7410_v29 = vsel %vm147_vm1, %v7342_v51, %v7364_v28 }
0x1786   :  { %v7411_v58 = vsel %vm3357_vm9, %v7410_v29, %v7386_v22 }
0x1788   :  { %v7408_v15 = vpop.permute.xlu1 %7407 }
0x1789   :  { %v7412_v61 = vsel %vm3678_vm13, %v7411_v58, %v7408_v15 }
0x178a   :  { %8432 = vmatmul.mubr.f32.vlgmr.msra.gmra.mxu1 %v7412_v61 }
0x184a   :  { %v7500_v13 = vpop.f32.mrf.mxu1 }
0x184b   :  { %v7501_v42 = vadd.f32 %v7500_v13, %v7433_v19 }
0x184c   :  { %v8433_v47 = vpop.f32.mrf.mxu1 }
0x184d   :  { %7705 = vst.msk [vmem:[%s10357_s9 + $0x4] sm:$0xf] %vm3160_vm8, %v7501_v42 }

</bundles_post_ra>
